<compile_context>
chip_gen: v6e
topology: v6e:2x2x1
jax: 0.10.0
libtpu: 0.0.40
codegen_flags: <defaults>
</compile_context>

<pallas_src>
import functools

import numpy as np
import jax
import jax.numpy as jnp
from jax import lax
from jax.experimental import pallas as pl
from jax.experimental.pallas import tpu as pltpu

# Full-f32 matmuls in the pure-JAX reference so the tolerance check is fair.
jax.config.update("jax_default_matmul_precision", "highest")


# ------------------------------ Pallas kernel -------------------------------

def _ts_encoder_kernel(x_ref, wih_big_ref, bih_big_ref, whh_ref, bhh_n_ref,
                       wlin_ref, blin_ref, o_ref):
    """Fused single-layer GRU (all timesteps) + final Linear, all in VMEM.

    x_ref       : (batch, ts*indim)    x flattened batch-major (NO transpose)
    wih_big_ref : (ts*indim, ts*3H)    block-diagonal: block t = weight_ih_l0^T
    bih_big_ref : (1, ts*3H)           (b_ih + [b_hh_r, b_hh_z, 0]) tiled ts times
    whh_ref     : (H, 3H)              weight_hh_l0 transposed (gates r,z,n)
    bhh_n_ref   : (1, H)               b_hh n-gate slice (must stay inside r*(.))
    wlin_ref    : (ts*H, 2F)           linear.weight transposed
    blin_ref    : (1, 2F)
    o_ref       : (batch, 2F)          lane-dense output (2F = 128)
    """
    batch = o_ref.shape[0]
    hidden = whh_ref.shape[0]
    ts = wlin_ref.shape[0] // hidden
    g = 3 * hidden

    # (1) Input projection for ALL timesteps as ONE MXU matmul (block-diagonal
    #     weight), with the folded input/recurrent biases added once.
    xg = jnp.dot(x_ref[...], wih_big_ref[...],
                 precision=lax.Precision.HIGHEST,
                 preferred_element_type=jnp.float32) + bih_big_ref[...]

    whh = whh_ref[...]                                          # (H,3H) ~12 KiB
    bhh_n = jnp.broadcast_to(bhh_n_ref[...], (batch, hidden))   # hoisted: once

    # (2) Recurrence: only the tiny h @ whh dot + gate math is on the serial
    #     chain.  h_t is stacked for the deferred Linear; ts is small, so a
    #     static unroll is appropriate.
    h = jnp.zeros((batch, hidden), jnp.float32)
    hs = []
    for t in range(ts):
        xg_t = xg[:, t * g:(t + 1) * g]
        hg = jnp.dot(h, whh, precision=lax.Precision.HIGHEST,
                     preferred_element_type=jnp.float32)
        r = jax.nn.sigmoid(xg_t[:, :hidden] + hg[:, :hidden])
        z = jax.nn.sigmoid(xg_t[:, hidden:2 * hidden] + hg[:, hidden:2 * hidden])
        n = jnp.tanh(xg_t[:, 2 * hidden:] + r * (hg[:, 2 * hidden:] + bhh_n))
        h = (1.0 - z) * n + z * h
        hs.append(h)

    # (3) Deferred final Linear: ONE (batch, ts*H) @ (ts*H, 2F) matmul.
    h_flat = jnp.concatenate(hs, axis=1)                         # (batch, ts*H)
    o_ref[...] = (jnp.dot(h_flat, wlin_ref[...],
                          precision=lax.Precision.HIGHEST,
                          preferred_element_type=jnp.float32)
                  + blin_ref[...])


_VMEM = pl.BlockSpec(memory_space=pltpu.MemorySpace.VMEM)


def tsencoder_forward_pallas(x, kp, *, indim, outdim, finaldim, ts):
    """Matches TSEncoder.forward with returnvar=True: returns (mu, var)."""
    batch = x.shape[0]
    # Contiguous flatten only — the time-major transpose is folded into the
    # block-diagonal input-projection weight inside the kernel.
    x2d = x.reshape(batch, ts * indim)
    out = pl.pallas_call(
        _ts_encoder_kernel,
        out_shape=jax.ShapeDtypeStruct((batch, 2 * finaldim), jnp.float32),
        in_specs=[_VMEM] * 7,
        out_specs=_VMEM,
    )(x2d, kp['w_ih_big'], kp['b_ih_big'], kp['w_hh_t'], kp['b_hh_n'],
      kp['w_lin_t'], kp['b_lin_row'])
    return out[:, :finaldim], out[:, finaldim:]


# ------------------------------- parameters ---------------------------------

def init_tsencoder_params(key, indim, outdim, finaldim, ts, returnvar=True):
    """PyTorch-layout parameters (nn.GRU + nn.Linear shapes, gate order r,z,n)."""
    outsz = 2 * finaldim if returnvar else finaldim
    k = jax.random.split(key, 6)
    s_gru = 1.0 / np.sqrt(outdim)
    s_lin = 1.0 / np.sqrt(outdim * ts)
    return dict(
        w_ih=jax.random.uniform(k[0], (3 * outdim, indim), jnp.float32, -s_gru, s_gru),
        w_hh=jax.random.uniform(k[1], (3 * outdim, outdim), jnp.float32, -s_gru, s_gru),
        b_ih=jax.random.uniform(k[2], (3 * outdim,), jnp.float32, -s_gru, s_gru),
        b_hh=jax.random.uniform(k[3], (3 * outdim,), jnp.float32, -s_gru, s_gru),
        lin_w=jax.random.uniform(k[4], (outsz, outdim * ts), jnp.float32, -s_lin, s_lin),
        lin_b=jax.random.uniform(k[5], (outsz,), jnp.float32, -s_lin, s_lin),
    )


def prepare_kernel_params(params, *, indim, outdim, ts):
    """Kernel-layout weights, computed ONCE at init time (device resident).

    - w_ih_big : block-diagonal (ts*indim, ts*3H) so the input projection for
      every timestep is one matmul on batch-major x (no time-major transpose).
    - b_ih_big : (b_ih + [b_hh_r, b_hh_z, 0]) tiled over timesteps; only the
      n-gate recurrent bias stays separate (PyTorch keeps it inside r*(.)).
    """
    H = outdim
    w_ih_t = np.asarray(params['w_ih']).T                      # (indim, 3H)
    b_ih = np.asarray(params['b_ih'])
    b_hh = np.asarray(params['b_hh'])

    b_fold = b_ih + np.concatenate(
        [b_hh[:H], b_hh[H:2 * H], np.zeros((H,), np.float32)])

    w_big = np.zeros((ts * indim, ts * 3 * H), np.float32)
    for t in range(ts):
        w_big[t * indim:(t + 1) * indim, t * 3 * H:(t + 1) * 3 * H] = w_ih_t
    b_big = np.tile(b_fold, ts)[None, :]                        # (1, ts*3H)

    return dict(
        w_ih_big=jnp.asarray(w_big),
        b_ih_big=jnp.asarray(b_big),
        w_hh_t=jnp.asarray(np.asarray(params['w_hh']).T),       # (H, 3H)
        b_hh_n=jnp.asarray(b_hh[2 * H:][None, :]),              # (1, H)
        w_lin_t=jnp.asarray(np.asarray(params['lin_w']).T),     # (ts*H, 2F)
        b_lin_row=jnp.asarray(np.asarray(params['lin_b'])[None, :]),
    )


# ------------------------------ pure-JAX reference ---------------------------

def tsencoder_forward_ref(x, params, *, indim, outdim, finaldim, ts):
    batch = x.shape[0]
    xt = x.reshape(batch, ts, indim).transpose(1, 0, 2)         # (ts, batch, indim)
    H = outdim

    def step(h, x_t):
        gi = x_t @ params['w_ih'].T + params['b_ih']
        gh = h @ params['w_hh'].T + params['b_hh']
        r = jax.nn.sigmoid(gi[:, :H] + gh[:, :H])
        z = jax.nn.sigmoid(gi[:, H:2 * H] + gh[:, H:2 * H])
        n = jnp.tanh(gi[:, 2 * H:] + r * gh[:, 2 * H:])
        h = (1.0 - z) * n + z * h
        return h, h

    h0 = jnp.zeros((batch, H), jnp.float32)
    _, hs = jax.lax.scan(step, h0, xt)                          # (ts, batch, H)
    flat = hs.transpose(1, 0, 2).reshape(batch, ts * H)         # flatten(start_dim=1)
    out = flat @ params['lin_w'].T + params['lin_b']
    return out[:, :finaldim], out[:, finaldim:]


# ----------------------------------- main ------------------------------------

if __name__ == "__main__":
    # Small TSEncoder config: indim=8, outdim(hidden)=32, finaldim=64, timestep=8
    indim, outdim, finaldim, timestep = 8, 32, 64, 8
    batch = 2

    key = jax.random.PRNGKey(0)
    kparam_key, kx = jax.random.split(key)
    params = init_tsencoder_params(kparam_key, indim, outdim, finaldim, timestep)
    kparams = prepare_kernel_params(params, indim=indim, outdim=outdim, ts=timestep)

    x = jax.random.normal(kx, (batch, timestep, indim), jnp.float32)

    fwd = jax.jit(functools.partial(tsencoder_forward_pallas,
                                    indim=indim, outdim=outdim,
                                    finaldim=finaldim, ts=timestep))
    mu, var = fwd(x, kparams)
    mu, var = jax.block_until_ready((mu, var))

    assert mu.shape == (batch, finaldim), mu.shape
    assert var.shape == (batch, finaldim), var.shape

    mu_ref, var_ref = tsencoder_forward_ref(
        x, params, indim=indim, outdim=outdim, finaldim=finaldim, ts=timestep)
    np.testing.assert_allclose(np.asarray(mu), np.asarray(mu_ref), rtol=1e-4, atol=1e-4)
    np.testing.assert_allclose(np.asarray(var), np.asarray(var_ref), rtol=1e-4, atol=1e-4)
    print("KERNEL_OK")
</pallas_src>

<mosaic_0001>
module attributes {stable_mosaic.version = 11 : i64} {
  func.func @_ts_encoder_kernel(%arg0: memref<2x64xf32, #tpu.memory_space<vmem>>, %arg1: memref<64x768xf32, #tpu.memory_space<vmem>>, %arg2: memref<1x768xf32, #tpu.memory_space<vmem>>, %arg3: memref<32x96xf32, #tpu.memory_space<vmem>>, %arg4: memref<1x32xf32, #tpu.memory_space<vmem>>, %arg5: memref<256x128xf32, #tpu.memory_space<vmem>>, %arg6: memref<1x128xf32, #tpu.memory_space<vmem>>, %arg7: memref<2x128xf32, #tpu.memory_space<vmem>>) attributes {dimension_semantics = [], scalar_prefetch = 0 : i64, scratch_operands = 0 : i64, tpu.core_type = #tpu.core_type<tc>} {
    %c0 = arith.constant 0 : index
    %c0_0 = arith.constant 0 : index
    %0 = vector.load %arg0[%c0, %c0_0] : memref<2x64xf32, #tpu.memory_space<vmem>>, vector<2x64xf32>
    %c0_1 = arith.constant 0 : index
    %c0_2 = arith.constant 0 : index
    %1 = vector.load %arg1[%c0_1, %c0_2] : memref<64x768xf32, #tpu.memory_space<vmem>>, vector<64x768xf32>
    %cst = arith.constant dense<0.000000e+00> : vector<2x768xf32>
    %2 = tpu.matmul %0, %1, %cst {dimension_numbers = #tpu.dot_dimension_numbers<[1], [0], [0], [1], [0, 0, 1, 1], [], []>, precision = #tpu.contract_precision<fp32>} : vector<2x64xf32>, vector<64x768xf32>, vector<2x768xf32> -> vector<2x768xf32>
    %c0_3 = arith.constant 0 : index
    %c0_4 = arith.constant 0 : index
    %3 = vector.load %arg2[%c0_3, %c0_4] : memref<1x768xf32, #tpu.memory_space<vmem>>, vector<1x768xf32>
    %4 = vector.broadcast %3 : vector<1x768xf32> to vector<2x768xf32>
    %5 = arith.addf %2, %4 : vector<2x768xf32>
    %c0_5 = arith.constant 0 : index
    %c0_6 = arith.constant 0 : index
    %6 = vector.load %arg3[%c0_5, %c0_6] : memref<32x96xf32, #tpu.memory_space<vmem>>, vector<32x96xf32>
    %c0_7 = arith.constant 0 : index
    %c0_8 = arith.constant 0 : index
    %7 = vector.load %arg4[%c0_7, %c0_8] : memref<1x32xf32, #tpu.memory_space<vmem>>, vector<1x32xf32>
    %8 = vector.shape_cast %7 : vector<1x32xf32> to vector<1x32xf32>
    %9 = vector.broadcast %8 : vector<1x32xf32> to vector<2x32xf32>
    %cst_9 = arith.constant 0.000000e+00 : f32
    %10 = vector.broadcast %cst_9 : f32 to vector<2x32xf32>
    %11 = vector.extract_strided_slice %5 {offsets = [0, 0], sizes = [2, 96], strides = [1, 1]} : vector<2x768xf32> to vector<2x96xf32>
    %cst_10 = arith.constant dense<0.000000e+00> : vector<2x96xf32>
    %12 = tpu.matmul %10, %6, %cst_10 {dimension_numbers = #tpu.dot_dimension_numbers<[1], [0], [0], [1], [0, 0, 1, 1], [], []>, precision = #tpu.contract_precision<fp32>} : vector<2x32xf32>, vector<32x96xf32>, vector<2x96xf32> -> vector<2x96xf32>
    %13 = vector.extract_strided_slice %11 {offsets = [0, 0], sizes = [2, 32], strides = [1, 1]} : vector<2x96xf32> to vector<2x32xf32>
    %14 = vector.extract_strided_slice %12 {offsets = [0, 0], sizes = [2, 32], strides = [1, 1]} : vector<2x96xf32> to vector<2x32xf32>
    %15 = arith.addf %13, %14 : vector<2x32xf32>
    %16 = arith.negf %15 : vector<2x32xf32>
    %17 = math.exp %16 : vector<2x32xf32>
    %cst_11 = arith.constant 1.000000e+00 : f32
    %18 = vector.broadcast %cst_11 : f32 to vector<2x32xf32>
    %19 = arith.addf %18, %17 : vector<2x32xf32>
    %20 = arith.divf %18, %19 : vector<2x32xf32>
    %21 = vector.extract_strided_slice %11 {offsets = [0, 32], sizes = [2, 32], strides = [1, 1]} : vector<2x96xf32> to vector<2x32xf32>
    %22 = vector.extract_strided_slice %12 {offsets = [0, 32], sizes = [2, 32], strides = [1, 1]} : vector<2x96xf32> to vector<2x32xf32>
    %23 = arith.addf %21, %22 : vector<2x32xf32>
    %24 = arith.negf %23 : vector<2x32xf32>
    %25 = math.exp %24 : vector<2x32xf32>
    %cst_12 = arith.constant 1.000000e+00 : f32
    %26 = vector.broadcast %cst_12 : f32 to vector<2x32xf32>
    %27 = arith.addf %26, %25 : vector<2x32xf32>
    %28 = arith.divf %26, %27 : vector<2x32xf32>
    %29 = vector.extract_strided_slice %11 {offsets = [0, 64], sizes = [2, 32], strides = [1, 1]} : vector<2x96xf32> to vector<2x32xf32>
    %30 = vector.extract_strided_slice %12 {offsets = [0, 64], sizes = [2, 32], strides = [1, 1]} : vector<2x96xf32> to vector<2x32xf32>
    %31 = arith.addf %30, %9 : vector<2x32xf32>
    %32 = arith.mulf %20, %31 : vector<2x32xf32>
    %33 = arith.addf %29, %32 : vector<2x32xf32>
    %34 = math.tanh %33 : vector<2x32xf32>
    %cst_13 = arith.constant 1.000000e+00 : f32
    %35 = vector.broadcast %cst_13 : f32 to vector<2x32xf32>
    %36 = arith.subf %35, %28 : vector<2x32xf32>
    %37 = arith.mulf %36, %34 : vector<2x32xf32>
    %38 = arith.mulf %28, %10 : vector<2x32xf32>
    %39 = arith.addf %37, %38 : vector<2x32xf32>
    %40 = vector.extract_strided_slice %5 {offsets = [0, 96], sizes = [2, 96], strides = [1, 1]} : vector<2x768xf32> to vector<2x96xf32>
    %cst_14 = arith.constant dense<0.000000e+00> : vector<2x96xf32>
    %41 = tpu.matmul %39, %6, %cst_14 {dimension_numbers = #tpu.dot_dimension_numbers<[1], [0], [0], [1], [0, 0, 1, 1], [], []>, precision = #tpu.contract_precision<fp32>} : vector<2x32xf32>, vector<32x96xf32>, vector<2x96xf32> -> vector<2x96xf32>
    %42 = vector.extract_strided_slice %40 {offsets = [0, 0], sizes = [2, 32], strides = [1, 1]} : vector<2x96xf32> to vector<2x32xf32>
    %43 = vector.extract_strided_slice %41 {offsets = [0, 0], sizes = [2, 32], strides = [1, 1]} : vector<2x96xf32> to vector<2x32xf32>
    %44 = arith.addf %42, %43 : vector<2x32xf32>
    %45 = arith.negf %44 : vector<2x32xf32>
    %46 = math.exp %45 : vector<2x32xf32>
    %cst_15 = arith.constant 1.000000e+00 : f32
    %47 = vector.broadcast %cst_15 : f32 to vector<2x32xf32>
    %48 = arith.addf %47, %46 : vector<2x32xf32>
    %49 = arith.divf %47, %48 : vector<2x32xf32>
    %50 = vector.extract_strided_slice %40 {offsets = [0, 32], sizes = [2, 32], strides = [1, 1]} : vector<2x96xf32> to vector<2x32xf32>
    %51 = vector.extract_strided_slice %41 {offsets = [0, 32], sizes = [2, 32], strides = [1, 1]} : vector<2x96xf32> to vector<2x32xf32>
    %52 = arith.addf %50, %51 : vector<2x32xf32>
    %53 = arith.negf %52 : vector<2x32xf32>
    %54 = math.exp %53 : vector<2x32xf32>
    %cst_16 = arith.constant 1.000000e+00 : f32
    %55 = vector.broadcast %cst_16 : f32 to vector<2x32xf32>
    %56 = arith.addf %55, %54 : vector<2x32xf32>
    %57 = arith.divf %55, %56 : vector<2x32xf32>
    %58 = vector.extract_strided_slice %40 {offsets = [0, 64], sizes = [2, 32], strides = [1, 1]} : vector<2x96xf32> to vector<2x32xf32>
    %59 = vector.extract_strided_slice %41 {offsets = [0, 64], sizes = [2, 32], strides = [1, 1]} : vector<2x96xf32> to vector<2x32xf32>
    %60 = arith.addf %59, %9 : vector<2x32xf32>
    %61 = arith.mulf %49, %60 : vector<2x32xf32>
    %62 = arith.addf %58, %61 : vector<2x32xf32>
    %63 = math.tanh %62 : vector<2x32xf32>
    %cst_17 = arith.constant 1.000000e+00 : f32
    %64 = vector.broadcast %cst_17 : f32 to vector<2x32xf32>
    %65 = arith.subf %64, %57 : vector<2x32xf32>
    %66 = arith.mulf %65, %63 : vector<2x32xf32>
    %67 = arith.mulf %57, %39 : vector<2x32xf32>
    %68 = arith.addf %66, %67 : vector<2x32xf32>
    %69 = vector.extract_strided_slice %5 {offsets = [0, 192], sizes = [2, 96], strides = [1, 1]} : vector<2x768xf32> to vector<2x96xf32>
    %cst_18 = arith.constant dense<0.000000e+00> : vector<2x96xf32>
    %70 = tpu.matmul %68, %6, %cst_18 {dimension_numbers = #tpu.dot_dimension_numbers<[1], [0], [0], [1], [0, 0, 1, 1], [], []>, precision = #tpu.contract_precision<fp32>} : vector<2x32xf32>, vector<32x96xf32>, vector<2x96xf32> -> vector<2x96xf32>
    %71 = vector.extract_strided_slice %69 {offsets = [0, 0], sizes = [2, 32], strides = [1, 1]} : vector<2x96xf32> to vector<2x32xf32>
    %72 = vector.extract_strided_slice %70 {offsets = [0, 0], sizes = [2, 32], strides = [1, 1]} : vector<2x96xf32> to vector<2x32xf32>
    %73 = arith.addf %71, %72 : vector<2x32xf32>
    %74 = arith.negf %73 : vector<2x32xf32>
    %75 = math.exp %74 : vector<2x32xf32>
    %cst_19 = arith.constant 1.000000e+00 : f32
    %76 = vector.broadcast %cst_19 : f32 to vector<2x32xf32>
    %77 = arith.addf %76, %75 : vector<2x32xf32>
    %78 = arith.divf %76, %77 : vector<2x32xf32>
    %79 = vector.extract_strided_slice %69 {offsets = [0, 32], sizes = [2, 32], strides = [1, 1]} : vector<2x96xf32> to vector<2x32xf32>
    %80 = vector.extract_strided_slice %70 {offsets = [0, 32], sizes = [2, 32], strides = [1, 1]} : vector<2x96xf32> to vector<2x32xf32>
    %81 = arith.addf %79, %80 : vector<2x32xf32>
    %82 = arith.negf %81 : vector<2x32xf32>
    %83 = math.exp %82 : vector<2x32xf32>
    %cst_20 = arith.constant 1.000000e+00 : f32
    %84 = vector.broadcast %cst_20 : f32 to vector<2x32xf32>
    %85 = arith.addf %84, %83 : vector<2x32xf32>
    %86 = arith.divf %84, %85 : vector<2x32xf32>
    %87 = vector.extract_strided_slice %69 {offsets = [0, 64], sizes = [2, 32], strides = [1, 1]} : vector<2x96xf32> to vector<2x32xf32>
    %88 = vector.extract_strided_slice %70 {offsets = [0, 64], sizes = [2, 32], strides = [1, 1]} : vector<2x96xf32> to vector<2x32xf32>
    %89 = arith.addf %88, %9 : vector<2x32xf32>
    %90 = arith.mulf %78, %89 : vector<2x32xf32>
    %91 = arith.addf %87, %90 : vector<2x32xf32>
    %92 = math.tanh %91 : vector<2x32xf32>
    %cst_21 = arith.constant 1.000000e+00 : f32
    %93 = vector.broadcast %cst_21 : f32 to vector<2x32xf32>
    %94 = arith.subf %93, %86 : vector<2x32xf32>
    %95 = arith.mulf %94, %92 : vector<2x32xf32>
    %96 = arith.mulf %86, %68 : vector<2x32xf32>
    %97 = arith.addf %95, %96 : vector<2x32xf32>
    %98 = vector.extract_strided_slice %5 {offsets = [0, 288], sizes = [2, 96], strides = [1, 1]} : vector<2x768xf32> to vector<2x96xf32>
    %cst_22 = arith.constant dense<0.000000e+00> : vector<2x96xf32>
    %99 = tpu.matmul %97, %6, %cst_22 {dimension_numbers = #tpu.dot_dimension_numbers<[1], [0], [0], [1], [0, 0, 1, 1], [], []>, precision = #tpu.contract_precision<fp32>} : vector<2x32xf32>, vector<32x96xf32>, vector<2x96xf32> -> vector<2x96xf32>
    %100 = vector.extract_strided_slice %98 {offsets = [0, 0], sizes = [2, 32], strides = [1, 1]} : vector<2x96xf32> to vector<2x32xf32>
    %101 = vector.extract_strided_slice %99 {offsets = [0, 0], sizes = [2, 32], strides = [1, 1]} : vector<2x96xf32> to vector<2x32xf32>
    %102 = arith.addf %100, %101 : vector<2x32xf32>
    %103 = arith.negf %102 : vector<2x32xf32>
    %104 = math.exp %103 : vector<2x32xf32>
    %cst_23 = arith.constant 1.000000e+00 : f32
    %105 = vector.broadcast %cst_23 : f32 to vector<2x32xf32>
    %106 = arith.addf %105, %104 : vector<2x32xf32>
    %107 = arith.divf %105, %106 : vector<2x32xf32>
    %108 = vector.extract_strided_slice %98 {offsets = [0, 32], sizes = [2, 32], strides = [1, 1]} : vector<2x96xf32> to vector<2x32xf32>
    %109 = vector.extract_strided_slice %99 {offsets = [0, 32], sizes = [2, 32], strides = [1, 1]} : vector<2x96xf32> to vector<2x32xf32>
    %110 = arith.addf %108, %109 : vector<2x32xf32>
    %111 = arith.negf %110 : vector<2x32xf32>
    %112 = math.exp %111 : vector<2x32xf32>
    %cst_24 = arith.constant 1.000000e+00 : f32
    %113 = vector.broadcast %cst_24 : f32 to vector<2x32xf32>
    %114 = arith.addf %113, %112 : vector<2x32xf32>
    %115 = arith.divf %113, %114 : vector<2x32xf32>
    %116 = vector.extract_strided_slice %98 {offsets = [0, 64], sizes = [2, 32], strides = [1, 1]} : vector<2x96xf32> to vector<2x32xf32>
    %117 = vector.extract_strided_slice %99 {offsets = [0, 64], sizes = [2, 32], strides = [1, 1]} : vector<2x96xf32> to vector<2x32xf32>
    %118 = arith.addf %117, %9 : vector<2x32xf32>
    %119 = arith.mulf %107, %118 : vector<2x32xf32>
    %120 = arith.addf %116, %119 : vector<2x32xf32>
    %121 = math.tanh %120 : vector<2x32xf32>
    %cst_25 = arith.constant 1.000000e+00 : f32
    %122 = vector.broadcast %cst_25 : f32 to vector<2x32xf32>
    %123 = arith.subf %122, %115 : vector<2x32xf32>
    %124 = arith.mulf %123, %121 : vector<2x32xf32>
    %125 = arith.mulf %115, %97 : vector<2x32xf32>
    %126 = arith.addf %124, %125 : vector<2x32xf32>
    %127 = vector.extract_strided_slice %5 {offsets = [0, 384], sizes = [2, 96], strides = [1, 1]} : vector<2x768xf32> to vector<2x96xf32>
    %cst_26 = arith.constant dense<0.000000e+00> : vector<2x96xf32>
    %128 = tpu.matmul %126, %6, %cst_26 {dimension_numbers = #tpu.dot_dimension_numbers<[1], [0], [0], [1], [0, 0, 1, 1], [], []>, precision = #tpu.contract_precision<fp32>} : vector<2x32xf32>, vector<32x96xf32>, vector<2x96xf32> -> vector<2x96xf32>
    %129 = vector.extract_strided_slice %127 {offsets = [0, 0], sizes = [2, 32], strides = [1, 1]} : vector<2x96xf32> to vector<2x32xf32>
    %130 = vector.extract_strided_slice %128 {offsets = [0, 0], sizes = [2, 32], strides = [1, 1]} : vector<2x96xf32> to vector<2x32xf32>
    %131 = arith.addf %129, %130 : vector<2x32xf32>
    %132 = arith.negf %131 : vector<2x32xf32>
    %133 = math.exp %132 : vector<2x32xf32>
    %cst_27 = arith.constant 1.000000e+00 : f32
    %134 = vector.broadcast %cst_27 : f32 to vector<2x32xf32>
    %135 = arith.addf %134, %133 : vector<2x32xf32>
    %136 = arith.divf %134, %135 : vector<2x32xf32>
    %137 = vector.extract_strided_slice %127 {offsets = [0, 32], sizes = [2, 32], strides = [1, 1]} : vector<2x96xf32> to vector<2x32xf32>
    %138 = vector.extract_strided_slice %128 {offsets = [0, 32], sizes = [2, 32], strides = [1, 1]} : vector<2x96xf32> to vector<2x32xf32>
    %139 = arith.addf %137, %138 : vector<2x32xf32>
    %140 = arith.negf %139 : vector<2x32xf32>
    %141 = math.exp %140 : vector<2x32xf32>
    %cst_28 = arith.constant 1.000000e+00 : f32
    %142 = vector.broadcast %cst_28 : f32 to vector<2x32xf32>
    %143 = arith.addf %142, %141 : vector<2x32xf32>
    %144 = arith.divf %142, %143 : vector<2x32xf32>
    %145 = vector.extract_strided_slice %127 {offsets = [0, 64], sizes = [2, 32], strides = [1, 1]} : vector<2x96xf32> to vector<2x32xf32>
    %146 = vector.extract_strided_slice %128 {offsets = [0, 64], sizes = [2, 32], strides = [1, 1]} : vector<2x96xf32> to vector<2x32xf32>
    %147 = arith.addf %146, %9 : vector<2x32xf32>
    %148 = arith.mulf %136, %147 : vector<2x32xf32>
    %149 = arith.addf %145, %148 : vector<2x32xf32>
    %150 = math.tanh %149 : vector<2x32xf32>
    %cst_29 = arith.constant 1.000000e+00 : f32
    %151 = vector.broadcast %cst_29 : f32 to vector<2x32xf32>
    %152 = arith.subf %151, %144 : vector<2x32xf32>
    %153 = arith.mulf %152, %150 : vector<2x32xf32>
    %154 = arith.mulf %144, %126 : vector<2x32xf32>
    %155 = arith.addf %153, %154 : vector<2x32xf32>
    %156 = vector.extract_strided_slice %5 {offsets = [0, 480], sizes = [2, 96], strides = [1, 1]} : vector<2x768xf32> to vector<2x96xf32>
    %cst_30 = arith.constant dense<0.000000e+00> : vector<2x96xf32>
    %157 = tpu.matmul %155, %6, %cst_30 {dimension_numbers = #tpu.dot_dimension_numbers<[1], [0], [0], [1], [0, 0, 1, 1], [], []>, precision = #tpu.contract_precision<fp32>} : vector<2x32xf32>, vector<32x96xf32>, vector<2x96xf32> -> vector<2x96xf32>
    %158 = vector.extract_strided_slice %156 {offsets = [0, 0], sizes = [2, 32], strides = [1, 1]} : vector<2x96xf32> to vector<2x32xf32>
    %159 = vector.extract_strided_slice %157 {offsets = [0, 0], sizes = [2, 32], strides = [1, 1]} : vector<2x96xf32> to vector<2x32xf32>
    %160 = arith.addf %158, %159 : vector<2x32xf32>
    %161 = arith.negf %160 : vector<2x32xf32>
    %162 = math.exp %161 : vector<2x32xf32>
    %cst_31 = arith.constant 1.000000e+00 : f32
    %163 = vector.broadcast %cst_31 : f32 to vector<2x32xf32>
    %164 = arith.addf %163, %162 : vector<2x32xf32>
    %165 = arith.divf %163, %164 : vector<2x32xf32>
    %166 = vector.extract_strided_slice %156 {offsets = [0, 32], sizes = [2, 32], strides = [1, 1]} : vector<2x96xf32> to vector<2x32xf32>
    %167 = vector.extract_strided_slice %157 {offsets = [0, 32], sizes = [2, 32], strides = [1, 1]} : vector<2x96xf32> to vector<2x32xf32>
    %168 = arith.addf %166, %167 : vector<2x32xf32>
    %169 = arith.negf %168 : vector<2x32xf32>
    %170 = math.exp %169 : vector<2x32xf32>
    %cst_32 = arith.constant 1.000000e+00 : f32
    %171 = vector.broadcast %cst_32 : f32 to vector<2x32xf32>
    %172 = arith.addf %171, %170 : vector<2x32xf32>
    %173 = arith.divf %171, %172 : vector<2x32xf32>
    %174 = vector.extract_strided_slice %156 {offsets = [0, 64], sizes = [2, 32], strides = [1, 1]} : vector<2x96xf32> to vector<2x32xf32>
    %175 = vector.extract_strided_slice %157 {offsets = [0, 64], sizes = [2, 32], strides = [1, 1]} : vector<2x96xf32> to vector<2x32xf32>
    %176 = arith.addf %175, %9 : vector<2x32xf32>
    %177 = arith.mulf %165, %176 : vector<2x32xf32>
    %178 = arith.addf %174, %177 : vector<2x32xf32>
    %179 = math.tanh %178 : vector<2x32xf32>
    %cst_33 = arith.constant 1.000000e+00 : f32
    %180 = vector.broadcast %cst_33 : f32 to vector<2x32xf32>
    %181 = arith.subf %180, %173 : vector<2x32xf32>
    %182 = arith.mulf %181, %179 : vector<2x32xf32>
    %183 = arith.mulf %173, %155 : vector<2x32xf32>
    %184 = arith.addf %182, %183 : vector<2x32xf32>
    %185 = vector.extract_strided_slice %5 {offsets = [0, 576], sizes = [2, 96], strides = [1, 1]} : vector<2x768xf32> to vector<2x96xf32>
    %cst_34 = arith.constant dense<0.000000e+00> : vector<2x96xf32>
    %186 = tpu.matmul %184, %6, %cst_34 {dimension_numbers = #tpu.dot_dimension_numbers<[1], [0], [0], [1], [0, 0, 1, 1], [], []>, precision = #tpu.contract_precision<fp32>} : vector<2x32xf32>, vector<32x96xf32>, vector<2x96xf32> -> vector<2x96xf32>
    %187 = vector.extract_strided_slice %185 {offsets = [0, 0], sizes = [2, 32], strides = [1, 1]} : vector<2x96xf32> to vector<2x32xf32>
    %188 = vector.extract_strided_slice %186 {offsets = [0, 0], sizes = [2, 32], strides = [1, 1]} : vector<2x96xf32> to vector<2x32xf32>
    %189 = arith.addf %187, %188 : vector<2x32xf32>
    %190 = arith.negf %189 : vector<2x32xf32>
    %191 = math.exp %190 : vector<2x32xf32>
    %cst_35 = arith.constant 1.000000e+00 : f32
    %192 = vector.broadcast %cst_35 : f32 to vector<2x32xf32>
    %193 = arith.addf %192, %191 : vector<2x32xf32>
    %194 = arith.divf %192, %193 : vector<2x32xf32>
    %195 = vector.extract_strided_slice %185 {offsets = [0, 32], sizes = [2, 32], strides = [1, 1]} : vector<2x96xf32> to vector<2x32xf32>
    %196 = vector.extract_strided_slice %186 {offsets = [0, 32], sizes = [2, 32], strides = [1, 1]} : vector<2x96xf32> to vector<2x32xf32>
    %197 = arith.addf %195, %196 : vector<2x32xf32>
    %198 = arith.negf %197 : vector<2x32xf32>
    %199 = math.exp %198 : vector<2x32xf32>
    %cst_36 = arith.constant 1.000000e+00 : f32
    %200 = vector.broadcast %cst_36 : f32 to vector<2x32xf32>
    %201 = arith.addf %200, %199 : vector<2x32xf32>
    %202 = arith.divf %200, %201 : vector<2x32xf32>
    %203 = vector.extract_strided_slice %185 {offsets = [0, 64], sizes = [2, 32], strides = [1, 1]} : vector<2x96xf32> to vector<2x32xf32>
    %204 = vector.extract_strided_slice %186 {offsets = [0, 64], sizes = [2, 32], strides = [1, 1]} : vector<2x96xf32> to vector<2x32xf32>
    %205 = arith.addf %204, %9 : vector<2x32xf32>
    %206 = arith.mulf %194, %205 : vector<2x32xf32>
    %207 = arith.addf %203, %206 : vector<2x32xf32>
    %208 = math.tanh %207 : vector<2x32xf32>
    %cst_37 = arith.constant 1.000000e+00 : f32
    %209 = vector.broadcast %cst_37 : f32 to vector<2x32xf32>
    %210 = arith.subf %209, %202 : vector<2x32xf32>
    %211 = arith.mulf %210, %208 : vector<2x32xf32>
    %212 = arith.mulf %202, %184 : vector<2x32xf32>
    %213 = arith.addf %211, %212 : vector<2x32xf32>
    %214 = vector.extract_strided_slice %5 {offsets = [0, 672], sizes = [2, 96], strides = [1, 1]} : vector<2x768xf32> to vector<2x96xf32>
    %cst_38 = arith.constant dense<0.000000e+00> : vector<2x96xf32>
    %215 = tpu.matmul %213, %6, %cst_38 {dimension_numbers = #tpu.dot_dimension_numbers<[1], [0], [0], [1], [0, 0, 1, 1], [], []>, precision = #tpu.contract_precision<fp32>} : vector<2x32xf32>, vector<32x96xf32>, vector<2x96xf32> -> vector<2x96xf32>
    %216 = vector.extract_strided_slice %214 {offsets = [0, 0], sizes = [2, 32], strides = [1, 1]} : vector<2x96xf32> to vector<2x32xf32>
    %217 = vector.extract_strided_slice %215 {offsets = [0, 0], sizes = [2, 32], strides = [1, 1]} : vector<2x96xf32> to vector<2x32xf32>
    %218 = arith.addf %216, %217 : vector<2x32xf32>
    %219 = arith.negf %218 : vector<2x32xf32>
    %220 = math.exp %219 : vector<2x32xf32>
    %cst_39 = arith.constant 1.000000e+00 : f32
    %221 = vector.broadcast %cst_39 : f32 to vector<2x32xf32>
    %222 = arith.addf %221, %220 : vector<2x32xf32>
    %223 = arith.divf %221, %222 : vector<2x32xf32>
    %224 = vector.extract_strided_slice %214 {offsets = [0, 32], sizes = [2, 32], strides = [1, 1]} : vector<2x96xf32> to vector<2x32xf32>
    %225 = vector.extract_strided_slice %215 {offsets = [0, 32], sizes = [2, 32], strides = [1, 1]} : vector<2x96xf32> to vector<2x32xf32>
    %226 = arith.addf %224, %225 : vector<2x32xf32>
    %227 = arith.negf %226 : vector<2x32xf32>
    %228 = math.exp %227 : vector<2x32xf32>
    %cst_40 = arith.constant 1.000000e+00 : f32
    %229 = vector.broadcast %cst_40 : f32 to vector<2x32xf32>
    %230 = arith.addf %229, %228 : vector<2x32xf32>
    %231 = arith.divf %229, %230 : vector<2x32xf32>
    %232 = vector.extract_strided_slice %214 {offsets = [0, 64], sizes = [2, 32], strides = [1, 1]} : vector<2x96xf32> to vector<2x32xf32>
    %233 = vector.extract_strided_slice %215 {offsets = [0, 64], sizes = [2, 32], strides = [1, 1]} : vector<2x96xf32> to vector<2x32xf32>
    %234 = arith.addf %233, %9 : vector<2x32xf32>
    %235 = arith.mulf %223, %234 : vector<2x32xf32>
    %236 = arith.addf %232, %235 : vector<2x32xf32>
    %237 = math.tanh %236 : vector<2x32xf32>
    %cst_41 = arith.constant 1.000000e+00 : f32
    %238 = vector.broadcast %cst_41 : f32 to vector<2x32xf32>
    %239 = arith.subf %238, %231 : vector<2x32xf32>
    %240 = arith.mulf %239, %237 : vector<2x32xf32>
    %241 = arith.mulf %231, %213 : vector<2x32xf32>
    %242 = arith.addf %240, %241 : vector<2x32xf32>
    %243 = tpu.concatenate %39, %68, %97, %126, %155, %184, %213, %242 in 1 : vector<2x32xf32>, vector<2x32xf32>, vector<2x32xf32>, vector<2x32xf32>, vector<2x32xf32>, vector<2x32xf32>, vector<2x32xf32>, vector<2x32xf32> -> vector<2x256xf32>
    %c0_42 = arith.constant 0 : index
    %c0_43 = arith.constant 0 : index
    %244 = vector.load %arg5[%c0_42, %c0_43] : memref<256x128xf32, #tpu.memory_space<vmem>>, vector<256x128xf32>
    %cst_44 = arith.constant dense<0.000000e+00> : vector<2x128xf32>
    %245 = tpu.matmul %243, %244, %cst_44 {dimension_numbers = #tpu.dot_dimension_numbers<[1], [0], [0], [1], [0, 0, 1, 1], [], []>, precision = #tpu.contract_precision<fp32>} : vector<2x256xf32>, vector<256x128xf32>, vector<2x128xf32> -> vector<2x128xf32>
    %c0_45 = arith.constant 0 : index
    %c0_46 = arith.constant 0 : index
    %246 = vector.load %arg6[%c0_45, %c0_46] : memref<1x128xf32, #tpu.memory_space<vmem>>, vector<1x128xf32>
    %247 = vector.broadcast %246 : vector<1x128xf32> to vector<2x128xf32>
    %248 = arith.addf %245, %247 : vector<2x128xf32>
    %c0_47 = arith.constant 0 : index
    %c0_48 = arith.constant 0 : index
    %249 = vector.load %arg7[%c0_47, %c0_48] : memref<2x128xf32, #tpu.memory_space<vmem>>, vector<2x128xf32>
    tpu.vector_store %arg7[%c0_47, %c0_48], %248 {strides = array<i32>} : memref<2x128xf32, #tpu.memory_space<vmem>>, vector<2x128xf32>,
    return
  }
}

</mosaic_0001>

<bundles_post_ra>
// kernel: tsencoder_forward_pallas.1
= control target key start
LH: loop header
LB: loop body
LE: loop exit
PB: predicated region body
PF: predicated region fallthrough
CT: control target
= control target key end

     0   :  { %12 = vsyncpa [#allocation3], 0  ;;  %s10382_s0 = inlined_call_operand.vmem [shape: f32[2,64], index: 0, kind: input, shape index: {}]   ;;  %s10383_s1 = inlined_call_operand.hbm [shape: f32[64,768], index: 1, kind: input, shape index: {}]   ;;  %s10384_s2 = inlined_call_operand.vmem [shape: f32[1,768], index: 2, kind: input, shape index: {}]   ;;  %s10385_s3 = inlined_call_operand.hbm [shape: f32[32,96], index: 3, kind: input, shape index: {}]   ;;  %s10386_s4 = inlined_call_operand.vmem [shape: f32[1,32], index: 4, kind: input, shape index: {}]   ;;  %s10387_s5 = inlined_call_operand.hbm [shape: f32[256,128], index: 5, kind: input, shape index: {}]   ;;  %s10388_s6 = inlined_call_operand.vmem [shape: f32[1,128], index: 6, kind: input, shape index: {}]   ;;  %s10389_s7 = inlined_call_operand.vmem [shape: f32[2,128], index: 7, kind: output, shape index: {}]  }
   0x1   :  { %13 = vsyncpa [#allocation5], 0  ;;  %s8334_s24 = smov [#allocation4]  }
   0x2   :  { %s35_s25 = sshll.u32 %s8334_s24, 4  ;;  %s36_s25 = int_to_ptr.vmem [resolvable:$true] %s35_s25 }
   0x3   :  { %s8278_s26 = scalar_lea.vmem %s36_s25, 512  ;;  %p8283_p1 = scmp.lt.s32.totalorder %s36_s25, %s36_s25 }
   0x4   :  { %p8279_p0 = scmp.ne.s32.totalorder %s36_s25, %s8278_s26  ;;  %p8284_p2 = scmp.lt.s32.totalorder %s8278_s26, %s8278_s26 }
   0x6   :  { %p8285_p3 = por %p8284_p2, %p8283_p1 }
   0x8   :  { %p8286_p4 = pnand %p8285_p3, %p8279_p0 }
   0xa   :  { %8289 = shalt.err (!%p8286_p4)
}
   0xb   :  { %s8335_s27 = smov 128   ;;  %s8336_s28 = smov 8  }
   0xc   :  { %41 = dma.hbm_to_vmem [thread:$0]  %s10385_s3, 512, %s36_s25, [#allocation5], %s8335_s27, %s8335_s27, %s8336_s28  }
   0xd   :  { %s8337_s8 = smov [#allocation2]  }
   0xe   :  { %s21_s9 = sshll.u32 %s8337_s8, 4  ;;  %s22_s9 = int_to_ptr.vmem [resolvable:$true] %s21_s9 }
   0xf   :  { %s8298_s10 = scalar_lea.vmem %s22_s9, 6144  ;;  %p8303_p6 = scmp.lt.s32.totalorder %s22_s9, %s22_s9 }
  0x10   :  { %p8299_p5 = scmp.ne.s32.totalorder %s22_s9, %s8298_s10  ;;  %p8304_p7 = scmp.lt.s32.totalorder %s8298_s10, %s8298_s10 }
  0x12   :  { %p8305_p8 = por %p8304_p7, %p8303_p6 }
  0x14   :  { %p8306_p9 = pnand %p8305_p8, %p8299_p5 }
  0x16   :  { %8309 = shalt.err (!%p8306_p9)
}
  0x17   :  { %s8338_s11 = smov 768   ;;  %s8339_s12 = smov 48  }
  0x18   :  { %27 = dma.hbm_to_vmem [thread:$0]  %s10383_s1, 6144, %s22_s9, [#allocation3], %s8338_s11, %s8338_s11, %s8339_s12  }
  0x19   :  { %s8340_s15 = smov [#allocation6]  }
  0x1a   :  { %s49_s16 = sshll.u32 %s8340_s15, 4  ;;  %s50_s16 = int_to_ptr.vmem [resolvable:$true] %s49_s16 }
  0x1b   :  { %s8318_s3 = scalar_lea.vmem %s50_s16, 4096  ;;  %p8323_p11 = scmp.lt.s32.totalorder %s50_s16, %s50_s16 }
  0x1c   :  { %p8319_p10 = scmp.ne.s32.totalorder %s50_s16, %s8318_s3  ;;  %p8324_p12 = scmp.lt.s32.totalorder %s8318_s3, %s8318_s3 }
  0x1e   :  { %p8325_p13 = por %p8324_p12, %p8323_p11 }
  0x20   :  { %p8326_p0 = pnand %p8325_p13, %p8319_p10 }
  0x22   :  { %8329 = shalt.err (!%p8326_p0)
}
  0x23   :  { %55 = dma.hbm_to_vmem [thread:$0]  %s10387_s5, 4096, %s50_s16, [#allocation5], %s8335_s27, %s8335_s27, %s8336_s28  }
  0x24   :  { %8330 = dma.done.wait [#allocation3], 6144  }
  0x25   :  { %8331 = vsyncadd [#allocation3], 4294961152 }
  0x26   :  { %8332 = dma.done.wait [#allocation5], 4608  }
  0x27   :  { %8333 = vsyncadd [#allocation5], 4294962688  ;;  %v8341_v0 = vmov 0.0   ;;  %v111_v1 = vld [vmem:[#allocation2 + $0x158] sm:$0xff]  ;;  %v110_v2 = vld [vmem:[#allocation2 + $0x150] sm:$0xff]  ;;  %vm148_vm0 = vcmask 523264  }
  0x28   :  { %232 = vmatprep.mubr.f32.mxu0 %v8341_v0  ;;  %388 = vmatprep.mubr.f32.mxu1 %v8341_v0  ;;  %v105_v3 = vld [vmem:[#allocation2 + $0x128] sm:$0xff]  ;;  %v8397_v4 = vand.u32 4294901760, %v111_v1  ;;  %v8399_v5 = vand.u32 4294901760, %v110_v2  ;;  %v104_v7 = vld [vmem:[#allocation2 + $0x120] sm:$0xff]  ;;  %v99_v8 = vld [vmem:[#allocation2 + $0xf8] sm:$0xff]  ;;  %vm8342_vm1 = vmmov 0  }
  0x29   :  { %v8401_v6 = vand.u32 4294901760, %v105_v3  ;;  %v98_v9 = vld [vmem:[#allocation2 + $0xf0] sm:$0xff]  ;;  %v8403_v10 = vand.u32 4294901760, %v104_v7  ;;  %v8405_v11 = vand.u32 4294901760, %v99_v8  ;;  %v93_v13 = vld [vmem:[#allocation2 + $0xc8] sm:$0xff]  ;;  %v92_v14 = vld [vmem:[#allocation2 + $0xc0] sm:$0xff] }
  0x2a   :  { %v8407_v12 = vand.u32 4294901760, %v98_v9  ;;  %v87_v15 = vld [vmem:[#allocation2 + $0x98] sm:$0xff]  ;;  %169 = vmatprep.subr.mxu0 %v8397_v4  ;;  %v8410_v16 = vand.u32 4294901760, %v93_v13  ;;  %v8412_v17 = vand.u32 4294901760, %v92_v14  ;;  %v8417_v19 = vsub.f32 %v111_v1, %v8397_v4  ;;  %v86_v20 = vld [vmem:[#allocation2 + $0x90] sm:$0xff]  ;;  %v8419_v21 = vld [vmem:[#allocation2 + $0x68] sm:$0xff] }
  0x2b   :  { %v8414_v18 = vand.u32 4294901760, %v87_v15  ;;  %v8421_v22 = vld [vmem:[#allocation2 + $0x60] sm:$0xff]  ;;  %171 = vmatpush1.msra.mxu0 %v8399_v5  ;;  %v8424_v23 = vand.u32 4294901760, %v86_v20  ;;  %v8427_v24 = vsub.f32 %v110_v2, %v8399_v5  ;;  %v8430_v25 = vand.u32 4294901760, %v8419_v21  ;;  %v8435_v27 = vld [vmem:[#allocation2 + $0x38] sm:$0xff]  ;;  %v8437_v28 = vld [vmem:[#allocation2 + $0x30] sm:$0xff] }
  0x2c   :  { %v8433_v26 = vsub.f32 %v105_v3, %v8401_v6  ;;  %v8439_v29 = vld [vmem:[#allocation2 + $0x8] sm:$0xff]  ;;  %173 = vmatprep.subr.mxu0 %v8401_v6  ;;  %v262_v30 = vand.u32 4294901760, %v8417_v19  ;;  %v8444_v31 = vand.u32 4294901760, %v8421_v22  ;;  %v8447_v32 = vsub.f32 %v104_v7, %v8403_v10  ;;  %v8461_v38 = vld [vmem:[#allocation2] sm:$0xff]  ;;  %s8343_s20 = smov 64   ;;  %s8345_s22 = smov 32  }
  0x2d   :  { %v8450_v33 = vand.u32 4294901760, %v8435_v27  ;;  %175 = vmatpush1.msra.mxu0 %v8403_v10  ;;  %v268_v34 = vand.u32 4294901760, %v8427_v24  ;;  %v8456_v36 = vsub.f32 %v99_v8, %v8405_v11  ;;  %v8459_v37 = vand.u32 4294901760, %v8437_v28  ;;  %v67_v51 = vld [vmem:[%s10382_s0] sm:$0x3] }
  0x2e   :  { %v274_v35 = vand.u32 4294901760, %v8433_v26  ;;  %177 = vmatprep.subr.mxu0 %v8405_v11  ;;  %v263_v39 = vsub.f32 %v8417_v19, %v262_v30  ;;  %v280_v40 = vand.u32 4294901760, %v8447_v32  ;;  %v8469_v41 = vsub.f32 %v98_v9, %v8407_v12 }
  0x2f   :  { %v8472_v42 = vand.u32 4294901760, %v8439_v29  ;;  %179 = vmatpush1.msra.mxu0 %v8407_v12  ;;  %v269_v43 = vsub.f32 %v8427_v24, %v268_v34  ;;  %v286_v45 = vand.u32 4294901760, %v8456_v36  ;;  %v8483_v46 = vsub.f32 %v93_v13, %v8410_v16 }
  0x30   :  { %v275_v44 = vsub.f32 %v8433_v26, %v274_v35  ;;  %181 = vmatprep.subr.mxu0 %v8410_v16  ;;  %v264_v47 = vand.u32 4294901760, %v263_v39  ;;  %v281_v48 = vsub.f32 %v8447_v32, %v280_v40  ;;  %v292_v49 = vand.u32 4294901760, %v8469_v41 }
  0x31   :  { %v8491_v50 = vand.u32 4294901760, %v8461_v38  ;;  %183 = vmatpush1.msra.mxu0 %v8412_v17  ;;  %v270_v52 = vand.u32 4294901760, %v269_v43  ;;  %v287_v54 = vsub.f32 %v8456_v36, %v286_v45  ;;  %v298_v55 = vand.u32 4294901760, %v8483_v46 }
  0x32   :  { %v276_v53 = vand.u32 4294901760, %v275_v44  ;;  %185 = vmatprep.subr.mxu0 %v8414_v18  ;;  %265 = vmatprep.subr.mxu1 %v264_v47  ;;  %v282_v56 = vand.u32 4294901760, %v281_v48  ;;  %v293_v57 = vsub.f32 %v8469_v41, %v292_v49  ;;  %v8506_v58 = vsub.f32 %v92_v14, %v8412_v17 }
  0x33   :  { %v8509_v59 = vsub.f32 %v87_v15, %v8414_v18  ;;  %187 = vmatpush1.msra.mxu0 %v8424_v23  ;;  %271 = vmatpush1.msra.mxu1 %v270_v52  ;;  %v288_v60 = vand.u32 4294901760, %v287_v54  ;;  %v299_v61 = vsub.f32 %v8483_v46, %v298_v55  ;;  %v150_v62 = vsel %vm148_vm0, %v67_v51, 0 }
  0x34   :  { %v8517_v63 = vsub.f32 %v86_v20, %v8424_v23  ;;  %189 = vmatprep.subr.mxu0 %v8430_v25  ;;  %277 = vmatprep.subr.mxu1 %v276_v53  ;;  %v294_v1 = vand.u32 4294901760, %v293_v57  ;;  %v304_v2 = vand.u32 4294901760, %v8506_v58  ;;  %v8522_v7 = vand.u32 4294901760, %v150_v62 }
  0x35   :  { %v310_v3 = vand.u32 4294901760, %v8509_v59  ;;  %191 = vmatpush1.msra.mxu0 %v8444_v31  ;;  %283 = vmatpush1.msra.mxu1 %v282_v56  ;;  %v300_v8 = vand.u32 4294901760, %v299_v61  ;;  %v8528_v13 = vsub.f32 %v8419_v21, %v8430_v25  ;;  %v8532_v14 = vsub.f32 %v8421_v22, %v8444_v31 }
  0x36   :  { %v316_v9 = vand.u32 4294901760, %v8517_v63  ;;  %193 = vmatprep.subr.mxu0 %v8450_v33  ;;  %289 = vmatprep.subr.mxu1 %v288_v60  ;;  %v305_v15 = vsub.f32 %v8506_v58, %v304_v2  ;;  %v8542_v39 = vsub.f32 %v150_v62, %v8522_v7  ;;  %v8552_v44 = vsub.f32 %v8435_v27, %v8450_v33 }
  0x37   :  { %v311_v20 = vsub.f32 %v8509_v59, %v310_v3  ;;  %195 = vmatpush1.msra.mxu0 %v8459_v37  ;;  %295 = vmatpush1.msra.mxu1 %v294_v1  ;;  %v322_v22 = vand.u32 4294901760, %v8528_v13  ;;  %v328_v43 = vand.u32 4294901760, %v8532_v14  ;;  %v8560_v52 = vsub.f32 %v8437_v28, %v8459_v37 }
  0x38   :  { %v317_v21 = vsub.f32 %v8517_v63, %v316_v9  ;;  %197 = vmatprep.subr.mxu0 %v8472_v42  ;;  %301 = vmatprep.subr.mxu1 %v300_v8  ;;  %v306_v47 = vand.u32 4294901760, %v305_v15  ;;  %v8556_v51 = vand.u32 4294901760, %v8542_v39  ;;  %v334_v56 = vand.u32 4294901760, %v8552_v44 }
  0x39   :  { %v312_v48 = vand.u32 4294901760, %v311_v20  ;;  %199 = vmatpush1.msra.mxu0 %v8491_v50  ;;  %v323_v27 = vsub.f32 %v8528_v13, %v322_v22  ;;  %v329_v54 = vsub.f32 %v8532_v14, %v328_v43  ;;  %v340_v57 = vand.u32 4294901760, %v8560_v52 }
  0x3a   :  { %v318_v53 = vand.u32 4294901760, %v317_v21  ;;  %307 = vmatpush1.msra.mxu1 %v306_v47  ;;  %414 = vmatprep.subr.mxu0 %v8417_v19  ;;  %v236_v28 = vsub.f32 %v8542_v39, %v8556_v51  ;;  %v8576_v60 = vsub.f32 %v8439_v29, %v8472_v42  ;;  %v8580_v61 = vsub.f32 %v8461_v38, %v8491_v50  ;;  %v113_v19 = vld [vmem:[#allocation2 + $0x168] sm:$0xff] }
  0x3b   :  { %313 = vmatprep.subr.mxu1 %v312_v48  ;;  %v324_v62 = vand.u32 4294901760, %v323_v27  ;;  %v330_v1 = vand.u32 4294901760, %v329_v54  ;;  %v335_v8 = vsub.f32 %v8552_v44, %v334_v56  ;;  %v341_v20 = vsub.f32 %v8560_v52, %v340_v57 }
  0x3c   :  { %v8585_v15 = vand.u32 4294901760, %v236_v28  ;;  %319 = vmatpush1.msra.mxu1 %v318_v53  ;;  %v346_v29 = vand.u32 4294901760, %v8576_v60  ;;  %v352_v21 = vand.u32 4294901760, %v8580_v61  ;;  %vm2103_vm2 = vcmask 261120  }
  0x3d   :  { %325 = vmatprep.subr.mxu1 %v324_v62  ;;  %v336_v38 = vand.u32 4294901760, %v335_v8  ;;  %v342_v47 = vand.u32 4294901760, %v341_v20  ;;  %v71_v62 = vld [vmem:[#allocation2 + $0x18] sm:$0xff]  ;;  %vm6299_vm3 = vcmask 785408  }
  0x3e   :  { %238 = vmatmul.mubr.f32.vlgmr.msra.gmra.mxu0 %v8585_v15  ;;  %331 = vmatpush1.msra.mxu1 %v330_v1  ;;  %v347_v48 = vsub.f32 %v8576_v60, %v346_v29  ;;  %v353_v53 = vsub.f32 %v8580_v61, %v352_v21 }
  0x3f   :  { %417 = vmatpush1.msra.mxu0 %v8427_v24  ;;  %337 = vmatprep.subr.mxu1 %v336_v38  ;;  %v112_v24 = vld [vmem:[#allocation2 + $0x160] sm:$0xff] }
  0x40   :  { %420 = vmatprep.subr.mxu0 %v8433_v26  ;;  %343 = vmatpush1.msra.mxu1 %v342_v47  ;;  %v348_v27 = vand.u32 4294901760, %v347_v48  ;;  %v354_v54 = vand.u32 4294901760, %v353_v53  ;;  %v107_v26 = vld [vmem:[#allocation2 + $0x138] sm:$0xff]  ;;  %v8767_v53 = vand.u32 4294901760, %v71_v62 }
  0x41   :  { %423 = vmatpush1.msra.mxu0 %v8447_v32  ;;  %492 = vmatprep.mubr.f32.mxu0 %v8341_v0  ;;  %v106_v32 = vld [vmem:[#allocation2 + $0x130] sm:$0xff] }
  0x42   :  { %426 = vmatprep.subr.mxu0 %v8456_v36  ;;  %349 = vmatprep.subr.mxu1 %v348_v27  ;;  %v8658_v36 = vand.u32 4294901760, %v107_v26 }
  0x43   :  { %429 = vmatpush1.msra.mxu0 %v8469_v41  ;;  %355 = vmatpush1.msra.mxu1 %v354_v54  ;;  %v8663_v41 = vand.u32 4294901760, %v106_v32 }
  0x44   :  { %432 = vmatprep.subr.mxu0 %v8483_v46  ;;  %390 = vmatmul.mubr.f32.vlgmr.msra.gmra.mxu1 %v8522_v7 }
  0x45   :  { %435 = vmatpush1.msra.mxu0 %v8506_v58  ;;  %518 = vmatprep.subr.mxu1 %v8397_v4  ;;  %v89_v58 = vld [vmem:[#allocation2 + $0xa8] sm:$0xff] }
  0x46   :  { %438 = vmatprep.subr.mxu0 %v8509_v59  ;;  %520 = vmatpush1.msra.mxu1 %v8399_v5  ;;  %v88_v59 = vld [vmem:[#allocation2 + $0xa0] sm:$0xff] }
  0x47   :  { %441 = vmatpush1.msra.mxu0 %v8517_v63  ;;  %522 = vmatprep.subr.mxu1 %v8401_v6  ;;  %v8687_v63 = vsub.f32 %v107_v26, %v8658_v36 }
  0x48   :  { %444 = vmatprep.subr.mxu0 %v8528_v13  ;;  %524 = vmatpush1.msra.mxu1 %v8403_v10  ;;  %v83_v13 = vld [vmem:[#allocation2 + $0x78] sm:$0xff] }
  0x49   :  { %447 = vmatpush1.msra.mxu0 %v8532_v14  ;;  %526 = vmatprep.subr.mxu1 %v8405_v11 }
  0x4a   :  { %450 = vmatprep.subr.mxu0 %v8552_v44  ;;  %528 = vmatpush1.msra.mxu1 %v8407_v12 }
  0x4b   :  { %453 = vmatpush1.msra.mxu0 %v8560_v52  ;;  %530 = vmatprep.subr.mxu1 %v8410_v16  ;;  %v77_v52 = vld [vmem:[#allocation2 + $0x48] sm:$0xff] }
  0x4c   :  { %456 = vmatprep.subr.mxu0 %v8576_v60  ;;  %532 = vmatpush1.msra.mxu1 %v8412_v17  ;;  %v76_v60 = vld [vmem:[#allocation2 + $0x40] sm:$0xff]  ;;  %v8748_v20 = vand.u32 4294901760, %v77_v52 }
  0x4d   :  { %459 = vmatpush1.msra.mxu0 %v8580_v61  ;;  %534 = vmatprep.subr.mxu1 %v8414_v18  ;;  %v8759_v47 = vand.u32 4294901760, %v76_v60 }
  0x4e   :  { %495 = vmatmul.mubr.f32.vlgmr.msra.gmra.mxu0 %v8542_v39  ;;  %610 = vmatprep.subr.mxu0 %v262_v30  ;;  %v8648_v30 = vand.u32 4294901760, %v113_v19 }
  0x4f   :  { %536 = vmatpush1.msra.mxu1 %v8424_v23  ;;  %614 = vmatpush1.msra.mxu0 %v268_v34  ;;  %v8653_v34 = vand.u32 4294901760, %v112_v24 }
  0x50   :  { %538 = vmatprep.subr.mxu1 %v8430_v25  ;;  %618 = vmatprep.subr.mxu0 %v274_v35  ;;  %v101_v35 = vld [vmem:[#allocation2 + $0x108] sm:$0xff] }
  0x51   :  { %540 = vmatpush1.msra.mxu1 %v8444_v31  ;;  %622 = vmatpush1.msra.mxu0 %v280_v40  ;;  %v100_v40 = vld [vmem:[#allocation2 + $0x100] sm:$0xff]  ;;  %v8668_v46 = vand.u32 4294901760, %v101_v35 }
  0x52   :  { %542 = vmatprep.subr.mxu1 %v8450_v33  ;;  %626 = vmatprep.subr.mxu0 %v286_v45  ;;  %v95_v45 = vld [vmem:[#allocation2 + $0xd8] sm:$0xff] }
  0x53   :  { %544 = vmatpush1.msra.mxu1 %v8459_v37  ;;  %630 = vmatpush1.msra.mxu0 %v292_v49  ;;  %v94_v49 = vld [vmem:[#allocation2 + $0xd0] sm:$0xff]  ;;  %v8704_v14 = vsub.f32 %v101_v35, %v8668_v46  ;;  %v8787_v35 = vsub.f32 %v77_v52, %v8748_v20 }
  0x54   :  { %546 = vmatprep.subr.mxu1 %v8472_v42  ;;  %634 = vmatprep.subr.mxu0 %v298_v55  ;;  %v8679_v55 = vand.u32 4294901760, %v100_v40 }
  0x55   :  { %548 = vmatpush1.msra.mxu1 %v8491_v50  ;;  %581 = vmatprep.mubr.f32.mxu1 %v8341_v0 }
  0x56   :  { %638 = vmatpush1.msra.mxu0 %v304_v2  ;;  %585 = vmatmul.mubr.f32.vlgmr.msra.gmra.mxu1 %v8556_v51  ;;  %v8695_v2 = vand.u32 4294901760, %v94_v49 }
  0x57   :  { %642 = vmatprep.subr.mxu0 %v310_v3  ;;  %728 = vmatprep.subr.mxu1 %v8397_v4  ;;  %v8671_v4 = vsub.f32 %v113_v19, %v8648_v30  ;;  %v82_v3 = vld [vmem:[#allocation2 + $0x70] sm:$0xff] }
  0x58   :  { %646 = vmatpush1.msra.mxu0 %v316_v9  ;;  %730 = vmatpush1.msra.mxu1 %v8399_v5  ;;  %v8677_v5 = vsub.f32 %v112_v24, %v8653_v34  ;;  %v8718_v44 = vand.u32 4294901760, %v82_v3  ;;  %v8726_v28 = vsub.f32 %v94_v49, %v8695_v2 }
  0x59   :  { %650 = vmatprep.subr.mxu0 %v322_v22  ;;  %732 = vmatprep.subr.mxu1 %v8401_v6  ;;  %v8684_v6 = vand.u32 4294901760, %v95_v45  ;;  %v909_v9 = vand.u32 4294901760, %v8671_v4  ;;  %v8712_v22 = vand.u32 4294901760, %v88_v59 }
  0x5a   :  { %654 = vmatpush1.msra.mxu0 %v328_v43  ;;  %734 = vmatpush1.msra.mxu1 %v8403_v10  ;;  %v8693_v10 = vsub.f32 %v106_v32, %v8663_v41  ;;  %v921_v43 = vand.u32 4294901760, %v8687_v63  ;;  %v8757_v38 = vsub.f32 %v82_v3, %v8718_v44  ;;  %v951_v27 = vand.u32 4294901760, %v8726_v28 }
  0x5b   :  { %658 = vmatprep.subr.mxu0 %v334_v56  ;;  %736 = vmatprep.subr.mxu1 %v8405_v11  ;;  %v8700_v11 = vand.u32 4294901760, %v89_v58  ;;  %v8721_v56 = vsub.f32 %v95_v45, %v8684_v6  ;;  %v910_v61 = vsub.f32 %v8671_v4, %v909_v9  ;;  %v8743_v8 = vsub.f32 %v88_v59, %v8712_v22 }
  0x5c   :  { %662 = vmatpush1.msra.mxu0 %v340_v57  ;;  %738 = vmatpush1.msra.mxu1 %v8407_v12  ;;  %v8710_v12 = vsub.f32 %v100_v40, %v8679_v55  ;;  %v8728_v57 = vand.u32 4294901760, %v83_v13  ;;  %v8792_v45 = vsub.f32 %v76_v60, %v8759_v47  ;;  %v8805_v3 = vsub.f32 %v71_v62, %v8767_v53 }
  0x5d   :  { %666 = vmatprep.subr.mxu0 %v346_v29  ;;  %740 = vmatprep.subr.mxu1 %v8410_v16  ;;  %v915_v16 = vand.u32 4294901760, %v8677_v5  ;;  %v8738_v1 = vsub.f32 %v89_v58, %v8700_v11  ;;  %v945_v48 = vand.u32 4294901760, %v8721_v56  ;;  %v911_v19 = vand.u32 4294901760, %v910_v61 }
  0x5e   :  { %670 = vmatpush1.msra.mxu0 %v352_v21  ;;  %703 = vmatprep.mubr.f32.mxu0 %v8341_v0  ;;  %v939_v29 = vand.u32 4294901760, %v8710_v12  ;;  %v70_v21 = vld [vmem:[#allocation2 + $0x10] sm:$0xff]  ;;  %v8771_v54 = vsub.f32 %v83_v13, %v8728_v57  ;;  %v963_v49 = vand.u32 4294901760, %v8743_v8  ;;  %v975_v61 = vand.u32 4294901760, %v8757_v38 }
  0x5f   :  { %742 = vmatpush1.msra.mxu1 %v8412_v17  ;;  %705 = vmatmul.mubr.f32.vlgmr.msra.gmra.mxu0 %v8522_v7  ;;  %v927_v17 = vand.u32 4294901760, %v8693_v10  ;;  %v8778_v24 = vand.u32 4294901760, %v70_v21  ;;  %v957_v26 = vand.u32 4294901760, %v8738_v1  ;;  %v10390_v62 = vand.u32 4294901760, %v8787_v35 }
  0x60   :  { %744 = vmatprep.subr.mxu1 %v8414_v18  ;;  %816 = vmatprep.subr.mxu0 %v8648_v30  ;;  %v933_v18 = vand.u32 4294901760, %v8704_v14  ;;  %v969_v59 = vand.u32 4294901760, %v8771_v54 }
  0x61   :  { %746 = vmatpush1.msra.mxu1 %v8424_v23  ;;  %818 = vmatpush1.msra.mxu0 %v8653_v34  ;;  %v916_v23 = vsub.f32 %v8677_v5, %v915_v16  ;;  %v8809_v52 = vsub.f32 %v70_v21, %v8778_v24  ;;  %v958_v60 = vsub.f32 %v8738_v1, %v957_v26 }
  0x62   :  { %748 = vmatprep.subr.mxu1 %v8430_v25  ;;  %820 = vmatprep.subr.mxu0 %v8658_v36  ;;  %v922_v25 = vsub.f32 %v8687_v63, %v921_v43  ;;  %v964_v21 = vsub.f32 %v8743_v8, %v963_v49 }
  0x63   :  { %750 = vmatpush1.msra.mxu1 %v8444_v31  ;;  %822 = vmatpush1.msra.mxu0 %v8663_v41  ;;  %v928_v31 = vsub.f32 %v8693_v10, %v927_v17  ;;  %v917_v32 = vand.u32 4294901760, %v916_v23 }
  0x64   :  { %752 = vmatprep.subr.mxu1 %v8450_v33  ;;  %824 = vmatprep.subr.mxu0 %v8668_v46  ;;  %v934_v33 = vsub.f32 %v8704_v14, %v933_v18  ;;  %v923_v40 = vand.u32 4294901760, %v922_v25 }
  0x65   :  { %754 = vmatpush1.msra.mxu1 %v8459_v37  ;;  %826 = vmatpush1.msra.mxu0 %v8679_v55  ;;  %v940_v37 = vsub.f32 %v8710_v12, %v939_v29  ;;  %v929_v58 = vand.u32 4294901760, %v928_v31  ;;  %v987_v31 = vand.u32 4294901760, %v8792_v45 }
  0x66   :  { %756 = vmatprep.subr.mxu1 %v8472_v42  ;;  %828 = vmatprep.subr.mxu0 %v8684_v6  ;;  %v946_v42 = vsub.f32 %v8721_v56, %v945_v48  ;;  %v935_v13 = vand.u32 4294901760, %v934_v33  ;;  %v970_v33 = vsub.f32 %v8771_v54, %v969_v59 }
  0x67   :  { %758 = vmatpush1.msra.mxu1 %v8491_v50  ;;  %791 = vmatprep.mubr.f32.mxu1 %v8341_v0  ;;  %v952_v50 = vsub.f32 %v8726_v28, %v951_v27  ;;  %v941_v23 = vand.u32 4294901760, %v940_v37  ;;  %v959_v37 = vand.u32 4294901760, %v958_v60 }
  0x68   :  { %830 = vmatpush1.msra.mxu0 %v8695_v2  ;;  %793 = vmatmul.mubr.f32.vlgmr.msra.gmra.mxu1 %v8522_v7  ;;  %v947_v25 = vand.u32 4294901760, %v946_v42  ;;  %v999_v42 = vand.u32 4294901760, %v8809_v52  ;;  %v971_v60 = vand.u32 4294901760, %v970_v33 }
  0x69   :  { %832 = vmatprep.subr.mxu0 %v8700_v11  ;;  %912 = vmatprep.subr.mxu1 %v911_v19  ;;  %v953_v19 = vand.u32 4294901760, %v952_v50  ;;  %v965_v50 = vand.u32 4294901760, %v964_v21 }
  0x6a   :  { %834 = vmatpush1.msra.mxu0 %v8712_v22  ;;  %918 = vmatpush1.msra.mxu1 %v917_v32  ;;  %v993_v32 = vand.u32 4294901760, %v8805_v3 }
  0x6b   :  { %836 = vmatprep.subr.mxu0 %v8728_v57  ;;  %924 = vmatprep.subr.mxu1 %v923_v40  ;;  %v976_v40 = vsub.f32 %v8757_v38, %v975_v61 }
  0x6c   :  { %838 = vmatpush1.msra.mxu0 %v8718_v44  ;;  %930 = vmatpush1.msra.mxu1 %v929_v58  ;;  %v982_v58 = vsub.f32 %v8787_v35, %v10390_v62 }
  0x6d   :  { %840 = vmatprep.subr.mxu0 %v8748_v20  ;;  %936 = vmatprep.subr.mxu1 %v935_v13  ;;  %v988_v13 = vsub.f32 %v8792_v45, %v987_v31  ;;  %v977_v62 = vand.u32 4294901760, %v976_v40 }
  0x6e   :  { %842 = vmatpush1.msra.mxu0 %v8759_v47  ;;  %942 = vmatpush1.msra.mxu1 %v941_v23  ;;  %v994_v23 = vsub.f32 %v8805_v3, %v993_v32  ;;  %v983_v21 = vand.u32 4294901760, %v982_v58 }
  0x6f   :  { %844 = vmatprep.subr.mxu0 %v8767_v53  ;;  %948 = vmatprep.subr.mxu1 %v947_v25  ;;  %v1000_v25 = vsub.f32 %v8809_v52, %v999_v42 }
  0x70   :  { %846 = vmatpush1.msra.mxu0 %v8778_v24  ;;  %954 = vmatpush1.msra.mxu1 %v953_v19  ;;  %v989_v19 = vand.u32 4294901760, %v988_v13  ;;  %v995_v33 = vand.u32 4294901760, %v994_v23  ;;  %v72_v23 = vld [vmem:[#allocation2 + $0x20] sm:$0xff] }
  0x71   :  { %879 = vmatprep.mubr.f32.mxu0 %v8341_v0  ;;  %960 = vmatprep.subr.mxu1 %v959_v37  ;;  %v1001_v37 = vand.u32 4294901760, %v1000_v25 }
  0x72   :  { %1061 = vmatprep.subr.mxu0 %v8671_v4  ;;  %885 = vmatmul.mubr.f32.vlgmr.msra.gmra.mxu0 %v8585_v15  ;;  %v115_v4 = vld [vmem:[#allocation2 + $0x178] sm:$0xff] }
  0x73   :  { %966 = vmatpush1.msra.mxu1 %v965_v50  ;;  %1064 = vmatpush1.msra.mxu0 %v8677_v5  ;;  %v114_v5 = vld [vmem:[#allocation2 + $0x170] sm:$0xff] }
  0x74   :  { %972 = vmatprep.subr.mxu1 %v971_v60  ;;  %1067 = vmatprep.subr.mxu0 %v8687_v63  ;;  %v109_v63 = vld [vmem:[#allocation2 + $0x148] sm:$0xff] }
  0x75   :  { %978 = vmatpush1.msra.mxu1 %v977_v62  ;;  %1070 = vmatpush1.msra.mxu0 %v8693_v10  ;;  %v8900_v10 = vand.u32 4294901760, %v115_v4 }
  0x76   :  { %984 = vmatprep.subr.mxu1 %v983_v21  ;;  %1073 = vmatprep.subr.mxu0 %v8704_v14  ;;  %v8905_v14 = vand.u32 4294901760, %v114_v5 }
  0x77   :  { %990 = vmatpush1.msra.mxu1 %v989_v19  ;;  %1076 = vmatpush1.msra.mxu0 %v8710_v12  ;;  %v103_v12 = vld [vmem:[#allocation2 + $0x118] sm:$0xff] }
  0x78   :  { %996 = vmatprep.subr.mxu1 %v995_v33  ;;  %1079 = vmatprep.subr.mxu0 %v8721_v56 }
  0x79   :  { %1002 = vmatpush1.msra.mxu1 %v1001_v37  ;;  %1035 = vmatprep.mubr.f32.mxu1 %v8341_v0 }
  0x7a   :  { %1082 = vmatpush1.msra.mxu0 %v8726_v28  ;;  %1037 = vmatmul.mubr.f32.vlgmr.msra.gmra.mxu1 %v8522_v7  ;;  %v97_v28 = vld [vmem:[#allocation2 + $0xe8] sm:$0xff] }
  0x7b   :  { %1085 = vmatprep.subr.mxu0 %v8738_v1  ;;  %1165 = vmatprep.subr.mxu1 %v8648_v30 }
  0x7c   :  { %1088 = vmatpush1.msra.mxu0 %v8743_v8  ;;  %1167 = vmatpush1.msra.mxu1 %v8653_v34  ;;  %v91_v8 = vld [vmem:[#allocation2 + $0xb8] sm:$0xff] }
  0x7d   :  { %1091 = vmatprep.subr.mxu0 %v8771_v54  ;;  %1169 = vmatprep.subr.mxu1 %v8658_v36  ;;  %v84_v54 = vld [vmem:[#allocation2 + $0x80] sm:$0xff] }
  0x7e   :  { %1094 = vmatpush1.msra.mxu0 %v8757_v38  ;;  %1171 = vmatpush1.msra.mxu1 %v8663_v41 }
  0x7f   :  { %1097 = vmatprep.subr.mxu0 %v8787_v35  ;;  %1173 = vmatprep.subr.mxu1 %v8668_v46 }
  0x80   :  { %1100 = vmatpush1.msra.mxu0 %v8792_v45  ;;  %1175 = vmatpush1.msra.mxu1 %v8679_v55 }
  0x81   :  { %1103 = vmatprep.subr.mxu0 %v8805_v3  ;;  %1177 = vmatprep.subr.mxu1 %v8684_v6  ;;  %v8970_v3 = vand.u32 4294901760, %v84_v54 }
  0x82   :  { %1106 = vmatpush1.msra.mxu0 %v8809_v52  ;;  %1139 = vmatprep.mubr.f32.mxu0 %v8341_v0 }
  0x83   :  { %1179 = vmatpush1.msra.mxu1 %v8695_v2  ;;  %1142 = vmatmul.mubr.f32.vlgmr.msra.gmra.mxu0 %v8542_v39  ;;  %v9009_v25 = vsub.f32 %v84_v54, %v8970_v3 }
  0x84   :  { %1181 = vmatprep.subr.mxu1 %v8700_v11  ;;  %1257 = vmatprep.subr.mxu0 %v909_v9  ;;  %v108_v9 = vld [vmem:[#allocation2 + $0x140] sm:$0xff] }
  0x85   :  { %1183 = vmatpush1.msra.mxu1 %v8712_v22  ;;  %1261 = vmatpush1.msra.mxu0 %v915_v16  ;;  %v8910_v16 = vand.u32 4294901760, %v109_v63  ;;  %v8915_v56 = vand.u32 4294901760, %v108_v9 }
  0x86   :  { %1185 = vmatprep.subr.mxu1 %v8728_v57  ;;  %1265 = vmatprep.subr.mxu0 %v921_v43  ;;  %v102_v43 = vld [vmem:[#allocation2 + $0x110] sm:$0xff] }
  0x87   :  { %1187 = vmatpush1.msra.mxu1 %v8718_v44  ;;  %1269 = vmatpush1.msra.mxu0 %v927_v17  ;;  %v8920_v17 = vand.u32 4294901760, %v103_v12  ;;  %v8931_v1 = vand.u32 4294901760, %v102_v43 }
  0x88   :  { %1189 = vmatprep.subr.mxu1 %v8748_v20  ;;  %1273 = vmatprep.subr.mxu0 %v933_v18  ;;  %v96_v18 = vld [vmem:[#allocation2 + $0xe0] sm:$0xff] }
  0x89   :  { %1191 = vmatpush1.msra.mxu1 %v8759_v47  ;;  %1277 = vmatpush1.msra.mxu0 %v939_v29  ;;  %v10458_v29 = vand.u32 4294901760, %v8787_v35  ;;  %v8947_v38 = vand.u32 4294901760, %v96_v18  ;;  %v85_v35 = vld [vmem:[#allocation2 + $0x88] sm:$0xff]  ;;  %v8956_v45 = vsub.f32 %v103_v12, %v8920_v17 }
  0x8a   :  { %1193 = vmatprep.subr.mxu1 %v8767_v53  ;;  %1281 = vmatprep.subr.mxu0 %v945_v48  ;;  %v90_v48 = vld [vmem:[#allocation2 + $0xb0] sm:$0xff] }
  0x8b   :  { %1195 = vmatpush1.msra.mxu1 %v8778_v24  ;;  %1228 = vmatprep.mubr.f32.mxu1 %v8341_v0  ;;  %v8978_v62 = vsub.f32 %v96_v18, %v8947_v38 }
  0x8c   :  { %1285 = vmatpush1.msra.mxu0 %v951_v27  ;;  %1232 = vmatmul.mubr.f32.vlgmr.msra.gmra.mxu1 %v8556_v51  ;;  %v8939_v27 = vsub.f32 %v109_v63, %v8910_v16  ;;  %v9030_v63 = vand.u32 4294901760, %v72_v23 }
  0x8d   :  { %1289 = vmatprep.subr.mxu0 %v957_v26  ;;  %1375 = vmatprep.subr.mxu1 %v8648_v30  ;;  %v8923_v30 = vsub.f32 %v115_v4, %v8900_v10  ;;  %v1598_v37 = vand.u32 4294901760, %v8978_v62 }
  0x8e   :  { %1293 = vmatpush1.msra.mxu0 %v963_v49  ;;  %1377 = vmatpush1.msra.mxu1 %v8653_v34  ;;  %v8929_v34 = vsub.f32 %v114_v5, %v8905_v14  ;;  %v8964_v49 = vand.u32 4294901760, %v90_v48 }
  0x8f   :  { %1297 = vmatprep.subr.mxu0 %v969_v59  ;;  %1379 = vmatprep.subr.mxu1 %v8658_v36  ;;  %v8936_v36 = vand.u32 4294901760, %v97_v28  ;;  %v1556_v26 = vand.u32 4294901760, %v8923_v30  ;;  %v1568_v59 = vand.u32 4294901760, %v8939_v27 }
  0x90   :  { %1301 = vmatpush1.msra.mxu0 %v975_v61  ;;  %1381 = vmatpush1.msra.mxu1 %v8663_v41  ;;  %v8945_v41 = vsub.f32 %v108_v9, %v8915_v56  ;;  %v79_v61 = vld [vmem:[#allocation2 + $0x58] sm:$0xff]  ;;  %v8995_v50 = vsub.f32 %v90_v48, %v8964_v49 }
  0x91   :  { %1305 = vmatprep.subr.mxu0 %v10458_v29  ;;  %1383 = vmatprep.subr.mxu1 %v8668_v46  ;;  %v8952_v46 = vand.u32 4294901760, %v91_v8  ;;  %v8973_v52 = vsub.f32 %v97_v28, %v8936_v36  ;;  %v1557_v40 = vsub.f32 %v8923_v30, %v1556_v26  ;;  %v9000_v13 = vand.u32 4294901760, %v79_v61 }
  0x92   :  { %1309 = vmatpush1.msra.mxu0 %v987_v31  ;;  %1385 = vmatpush1.msra.mxu1 %v8679_v55  ;;  %v8962_v55 = vsub.f32 %v102_v43, %v8931_v1  ;;  %v8980_v31 = vand.u32 4294901760, %v85_v35 }
  0x93   :  { %1313 = vmatprep.subr.mxu0 %v993_v32  ;;  %1387 = vmatprep.subr.mxu1 %v8684_v6  ;;  %v1562_v6 = vand.u32 4294901760, %v8929_v34  ;;  %v78_v32 = vld [vmem:[#allocation2 + $0x50] sm:$0xff]  ;;  %v8990_v58 = vsub.f32 %v91_v8, %v8952_v46  ;;  %v1592_v19 = vand.u32 4294901760, %v8973_v52  ;;  %v1558_v5 = vand.u32 4294901760, %v1557_v40 }
  0x94   :  { %1317 = vmatpush1.msra.mxu0 %v999_v42  ;;  %1350 = vmatprep.mubr.f32.mxu0 %v8341_v0  ;;  %v73_v42 = vld [vmem:[#allocation2 + $0x28] sm:$0xff]  ;;  %v1586_v60 = vand.u32 4294901760, %v8962_v55  ;;  %v9011_v21 = vand.u32 4294901760, %v78_v32  ;;  %v9023_v4 = vsub.f32 %v85_v35, %v8980_v31  ;;  %v9039_v43 = vsub.f32 %v79_v61, %v9000_v13 }
  0x95   :  { %1389 = vmatpush1.msra.mxu1 %v8695_v2  ;;  %1352 = vmatmul.mubr.f32.vlgmr.msra.gmra.mxu0 %v8522_v7  ;;  %v1574_v2 = vand.u32 4294901760, %v8945_v41  ;;  %v9019_v33 = vand.u32 4294901760, %v73_v42  ;;  %v1604_v9 = vand.u32 4294901760, %v8990_v58  ;;  %v1610_v8 = vand.u32 4294901760, %v8995_v50 }
  0x96   :  { %1391 = vmatprep.subr.mxu1 %v8700_v11  ;;  %1463 = vmatprep.subr.mxu0 %v8900_v10  ;;  %v1580_v11 = vand.u32 4294901760, %v8956_v45  ;;  %v9044_v18 = vsub.f32 %v78_v32, %v9011_v21  ;;  %v1616_v48 = vand.u32 4294901760, %v9023_v4  ;;  %v9061_v61 = vsub.f32 %v72_v23, %v9030_v63 }
  0x97   :  { %1393 = vmatpush1.msra.mxu1 %v8712_v22  ;;  %1465 = vmatpush1.msra.mxu0 %v8905_v14  ;;  %v1563_v22 = vsub.f32 %v8929_v34, %v1562_v6  ;;  %v9057_v54 = vsub.f32 %v73_v42, %v9019_v33  ;;  %v1605_v32 = vsub.f32 %v8990_v58, %v1604_v9  ;;  %v1622_v40 = vand.u32 4294901760, %v9009_v25 }
  0x98   :  { %1395 = vmatprep.subr.mxu1 %v8728_v57  ;;  %1467 = vmatprep.subr.mxu0 %v8910_v16  ;;  %v1569_v57 = vsub.f32 %v8939_v27, %v1568_v59  ;;  %v10391_v42 = vand.u32 4294901760, %v9039_v43  ;;  %v1611_v23 = vsub.f32 %v8995_v50, %v1610_v8 }
  0x99   :  { %1397 = vmatpush1.msra.mxu1 %v8718_v44  ;;  %1469 = vmatpush1.msra.mxu0 %v8915_v56  ;;  %v1575_v44 = vsub.f32 %v8945_v41, %v1574_v2  ;;  %v1564_v12 = vand.u32 4294901760, %v1563_v22 }
  0x9a   :  { %1399 = vmatprep.subr.mxu1 %v8748_v20  ;;  %1471 = vmatprep.subr.mxu0 %v8920_v17  ;;  %v1581_v20 = vsub.f32 %v8956_v45, %v1580_v11  ;;  %v1570_v28 = vand.u32 4294901760, %v1569_v57 }
  0x9b   :  { %1401 = vmatpush1.msra.mxu1 %v8759_v47  ;;  %1473 = vmatpush1.msra.mxu0 %v8931_v1  ;;  %v1587_v47 = vsub.f32 %v8962_v55, %v1586_v60  ;;  %v1576_v29 = vand.u32 4294901760, %v1575_v44  ;;  %v1634_v44 = vand.u32 4294901760, %v9044_v18 }
  0x9c   :  { %1403 = vmatprep.subr.mxu1 %v8767_v53  ;;  %1475 = vmatprep.subr.mxu0 %v8936_v36  ;;  %v1593_v53 = vsub.f32 %v8973_v52, %v1592_v19  ;;  %v1582_v35 = vand.u32 4294901760, %v1581_v20  ;;  %v1617_v20 = vsub.f32 %v9023_v4, %v1616_v48 }
  0x9d   :  { %1405 = vmatpush1.msra.mxu1 %v8778_v24  ;;  %1438 = vmatprep.mubr.f32.mxu1 %v8341_v0  ;;  %v1599_v24 = vsub.f32 %v8978_v62, %v1598_v37  ;;  %v1588_v22 = vand.u32 4294901760, %v1587_v47  ;;  %v1606_v47 = vand.u32 4294901760, %v1605_v32 }
  0x9e   :  { %1477 = vmatpush1.msra.mxu0 %v8947_v38  ;;  %1440 = vmatmul.mubr.f32.vlgmr.msra.gmra.mxu1 %v8522_v7  ;;  %v1594_v57 = vand.u32 4294901760, %v1593_v53  ;;  %v1646_v53 = vand.u32 4294901760, %v9061_v61  ;;  %v1618_v32 = vand.u32 4294901760, %v1617_v20 }
  0x9f   :  { %1479 = vmatprep.subr.mxu0 %v8952_v46  ;;  %1559 = vmatprep.subr.mxu1 %v1558_v5  ;;  %v1600_v5 = vand.u32 4294901760, %v1599_v24  ;;  %v1612_v24 = vand.u32 4294901760, %v1611_v23 }
  0xa0   :  { %1481 = vmatpush1.msra.mxu0 %v8964_v49  ;;  %1565 = vmatpush1.msra.mxu1 %v1564_v12  ;;  %v1640_v12 = vand.u32 4294901760, %v9057_v54 }
  0xa1   :  { %1483 = vmatprep.subr.mxu0 %v8980_v31  ;;  %1571 = vmatprep.subr.mxu1 %v1570_v28  ;;  %v1623_v28 = vsub.f32 %v9009_v25, %v1622_v40 }
  0xa2   :  { %1485 = vmatpush1.msra.mxu0 %v8970_v3  ;;  %1577 = vmatpush1.msra.mxu1 %v1576_v29  ;;  %v1629_v29 = vsub.f32 %v9039_v43, %v10391_v42 }
  0xa3   :  { %1487 = vmatprep.subr.mxu0 %v9000_v13  ;;  %1583 = vmatprep.subr.mxu1 %v1582_v35  ;;  %v1635_v35 = vsub.f32 %v9044_v18, %v1634_v44  ;;  %v1624_v42 = vand.u32 4294901760, %v1623_v28 }
  0xa4   :  { %1489 = vmatpush1.msra.mxu0 %v9011_v21  ;;  %1589 = vmatpush1.msra.mxu1 %v1588_v22  ;;  %v1641_v22 = vsub.f32 %v9057_v54, %v1640_v12  ;;  %v1630_v23 = vand.u32 4294901760, %v1629_v29 }
  0xa5   :  { %1491 = vmatprep.subr.mxu0 %v9019_v33  ;;  %1595 = vmatprep.subr.mxu1 %v1594_v57  ;;  %v1647_v57 = vsub.f32 %v9061_v61, %v1646_v53 }
  0xa6   :  { %1493 = vmatpush1.msra.mxu0 %v9030_v63  ;;  %1601 = vmatpush1.msra.mxu1 %v1600_v5  ;;  %v1636_v5 = vand.u32 4294901760, %v1635_v35  ;;  %v1642_v20 = vand.u32 4294901760, %v1641_v22 }
  0xa7   :  { %1526 = vmatprep.mubr.f32.mxu0 %v8341_v0  ;;  %1607 = vmatprep.subr.mxu1 %v1606_v47  ;;  %v1648_v47 = vand.u32 4294901760, %v1647_v57 }
  0xa8   :  { %1708 = vmatprep.subr.mxu0 %v8923_v30  ;;  %1532 = vmatmul.mubr.f32.vlgmr.msra.gmra.mxu0 %v8585_v15  ;;  %v2095_v30 = vld [vmem:[#allocation4 + $0x10] sm:$0xff] }
  0xa9   :  { %1613 = vmatpush1.msra.mxu1 %v1612_v24  ;;  %1711 = vmatpush1.msra.mxu0 %v8929_v34  ;;  %v2094_v34 = vld [vmem:[#allocation4 + $0x8] sm:$0xff] }
  0xaa   :  { %1619 = vmatprep.subr.mxu1 %v1618_v32  ;;  %1714 = vmatprep.subr.mxu0 %v8939_v27  ;;  %v9163_v27 = vand.u32 4294901760, %v2095_v30 }
  0xab   :  { %1625 = vmatpush1.msra.mxu1 %v1624_v42  ;;  %1717 = vmatpush1.msra.mxu0 %v8945_v41  ;;  %v2093_v41 = vld [vmem:[#allocation4] sm:$0xff] }
  0xac   :  { %1631 = vmatprep.subr.mxu1 %v1630_v23  ;;  %1720 = vmatprep.subr.mxu0 %v8956_v45 }
  0xad   :  { %1637 = vmatpush1.msra.mxu1 %v1636_v5  ;;  %1723 = vmatpush1.msra.mxu0 %v8962_v55 }
  0xae   :  { %1643 = vmatprep.subr.mxu1 %v1642_v20  ;;  %1726 = vmatprep.subr.mxu0 %v8973_v52 }
  0xaf   :  { %1649 = vmatpush1.msra.mxu1 %v1648_v47  ;;  %1682 = vmatprep.mubr.f32.mxu1 %v8341_v0 }
  0xb0   :  { %1729 = vmatpush1.msra.mxu0 %v8978_v62  ;;  %1684 = vmatmul.mubr.f32.vlgmr.msra.gmra.mxu1 %v8522_v7  ;;  %v7212_v62 = vld [vmem:[%s10386_s4] ss:$0 sm:$0xff] }
  0xb1   :  { %1732 = vmatprep.subr.mxu0 %v8990_v58  ;;  %1812 = vmatprep.subr.mxu1 %v8900_v10  ;;  %v116_v58 = vld [vmem:[%s10384_s2] sm:$0x3f]  ;;  %s8344_s2 = smov 96  }
  0xb2   :  { %1735 = vmatpush1.msra.mxu0 %v8995_v50  ;;  %1814 = vmatpush1.msra.mxu1 %v8905_v14 }
  0xb3   :  { %1738 = vmatprep.subr.mxu0 %v9023_v4  ;;  %1816 = vmatprep.subr.mxu1 %v8910_v16 }
  0xb4   :  { %1741 = vmatpush1.msra.mxu0 %v9009_v25  ;;  %1818 = vmatpush1.msra.mxu1 %v8915_v56 }
  0xb5   :  { %1744 = vmatprep.subr.mxu0 %v9039_v43  ;;  %1820 = vmatprep.subr.mxu1 %v8920_v17 }
  0xb6   :  { %1747 = vmatpush1.msra.mxu0 %v9044_v18  ;;  %1822 = vmatpush1.msra.mxu1 %v8931_v1 }
  0xb7   :  { %1750 = vmatprep.subr.mxu0 %v9057_v54  ;;  %1824 = vmatprep.subr.mxu1 %v8936_v36 }
  0xb8   :  { %1753 = vmatpush1.msra.mxu0 %v9061_v61  ;;  %1786 = vmatprep.mubr.f32.mxu0 %v8341_v0 }
  0xb9   :  { %1826 = vmatpush1.msra.mxu1 %v8947_v38  ;;  %1789 = vmatmul.mubr.f32.vlgmr.msra.gmra.mxu0 %v8542_v39  ;;  %v2096_v39 = vld [vmem:[#allocation4 + $0x18] sm:$0xff] }
  0xba   :  { %1828 = vmatprep.subr.mxu1 %v8952_v46  ;;  %1904 = vmatprep.subr.mxu0 %v1556_v26  ;;  %v9152_v15 = vand.u32 4294901760, %v2096_v39  ;;  %v9185_v26 = vsub.f32 %v2095_v30, %v9163_v27 }
  0xbb   :  { %1830 = vmatpush1.msra.mxu1 %v8964_v49  ;;  %1908 = vmatpush1.msra.mxu0 %v1562_v6 }
  0xbc   :  { %1832 = vmatprep.subr.mxu1 %v8980_v31  ;;  %1912 = vmatprep.subr.mxu0 %v1568_v59 }
  0xbd   :  { %1834 = vmatpush1.msra.mxu1 %v8970_v3  ;;  %1916 = vmatpush1.msra.mxu0 %v1574_v2 }
  0xbe   :  { %1836 = vmatprep.subr.mxu1 %v9000_v13  ;;  %1920 = vmatprep.subr.mxu0 %v1580_v11 }
  0xbf   :  { %1838 = vmatpush1.msra.mxu1 %v9011_v21  ;;  %1924 = vmatpush1.msra.mxu0 %v1586_v60 }
  0xc0   :  { %1840 = vmatprep.subr.mxu1 %v9019_v33  ;;  %1928 = vmatprep.subr.mxu0 %v1592_v19 }
  0xc1   :  { %1842 = vmatpush1.msra.mxu1 %v9030_v63  ;;  %1875 = vmatprep.mubr.f32.mxu1 %v8341_v0 }
  0xc2   :  { %1932 = vmatpush1.msra.mxu0 %v1598_v37  ;;  %1879 = vmatmul.mubr.f32.vlgmr.msra.gmra.mxu1 %v8556_v51  ;;  %v9169_v51 = vsub.f32 %v2096_v39, %v9152_v15 }
  0xc3   :  { %1936 = vmatprep.subr.mxu0 %v1604_v9  ;;  %2022 = vmatprep.subr.mxu1 %v8900_v10  ;;  %v9174_v10 = vand.u32 4294901760, %v2094_v34 }
  0xc4   :  { %1940 = vmatpush1.msra.mxu0 %v1610_v8  ;;  %2024 = vmatpush1.msra.mxu1 %v8905_v14  ;;  %v10459_v14 = vand.u32 4294901760, %v9039_v43 }
  0xc5   :  { %1944 = vmatprep.subr.mxu0 %v1616_v48  ;;  %2026 = vmatprep.subr.mxu1 %v8910_v16  ;;  %v9182_v16 = vand.u32 4294901760, %v2093_v41 }
  0xc6   :  { %1948 = vmatpush1.msra.mxu0 %v1622_v40  ;;  %2028 = vmatpush1.msra.mxu1 %v8915_v56  ;;  %v9191_v56 = vand.u32 4294901760, %v9169_v51 }
  0xc7   :  { %1952 = vmatprep.subr.mxu0 %v10459_v14  ;;  %2030 = vmatprep.subr.mxu1 %v8920_v17  ;;  %v9197_v17 = vsub.f32 %v2094_v34, %v9174_v10 }
  0xc8   :  { %1956 = vmatpush1.msra.mxu0 %v1634_v44  ;;  %2032 = vmatpush1.msra.mxu1 %v8931_v1  ;;  %v9204_v1 = vand.u32 4294901760, %v9185_v26  ;;  %v2214_v45 = vsub.f32 %v9169_v51, %v9191_v56 }
  0xc9   :  { %1960 = vmatprep.subr.mxu0 %v1640_v12  ;;  %2034 = vmatprep.subr.mxu1 %v8936_v36  ;;  %v9207_v36 = vsub.f32 %v2093_v41, %v9182_v16 }
  0xca   :  { %1964 = vmatpush1.msra.mxu0 %v1646_v53  ;;  %1997 = vmatprep.mubr.f32.mxu0 %v8341_v0 }
  0xcb   :  { %2036 = vmatpush1.msra.mxu1 %v8947_v38  ;;  %1999 = vmatmul.mubr.f32.vlgmr.msra.gmra.mxu0 %v8522_v7  ;;  %v9216_v38 = vand.u32 4294901760, %v9197_v17  ;;  %v9225_v55 = vand.u32 4294901760, %v9207_v36 }
  0xcc   :  { %2038 = vmatprep.subr.mxu1 %v8952_v46  ;;  %7674 = vmatprep.subr.mxu0 %v8341_v0  ;;  %v2221_v46 = vsub.f32 %v9185_v26, %v9204_v1 }
  0xcd   :  { %2040 = vmatpush1.msra.mxu1 %v8964_v49  ;;  %7675 = vmatpush3.msra.mxu0 %v9152_v15  ;;  %v9229_v49 = vand.u32 4294901760, %v2214_v45  ;;  %v2228_v6 = vsub.f32 %v9197_v17, %v9216_v38 }
  0xce   :  { %2042 = vmatprep.subr.mxu1 %v8980_v31  ;;  %7676 = vmatprep.subr.mxu0 %v8341_v0  ;;  %v9239_v59 = vand.u32 4294901760, %v2221_v46  ;;  %v118_v31 = vlaneseq }
  0xcf   :  { %2044 = vmatpush1.msra.mxu1 %v8970_v3  ;;  %7677 = vmatpush3.msra.mxu0 %v9163_v27  ;;  %v2235_v3 = vsub.f32 %v9207_v36, %v9225_v55  ;;  %v9248_v52 = vand.u32 4294901760, %v2228_v6 }
  0xd0   :  { %2046 = vmatprep.subr.mxu1 %v9000_v13  ;;  %7678 = vmatprep.subr.mxu0 %v8341_v0  ;;  %v9321_v2 = vshrl.u32 %v118_v31, 7 }
  0xd1   :  { %2048 = vmatpush1.msra.mxu1 %v9011_v21  ;;  %2085 = vmatprep.mubr.f32.mxu1 %v8341_v0 }
  0xd2   :  { %2050 = vmatprep.subr.mxu1 %v9019_v33  ;;  %7679 = vmatpush3.msra.mxu0 %v9174_v10  ;;  %v120_v11 = vsub.s32 0, %v9321_v2  ;;  %v124_v50 = vsub.s32 1, %v9321_v2  ;;  %v128_v22 = vsub.s32 2, %v9321_v2  ;;  %v132_v57 = vsub.s32 3, %v9321_v2 }
  0xd3   :  { %2052 = vmatpush1.msra.mxu1 %v9030_v63  ;;  %7680 = vmatprep.subr.mxu0 %v8341_v0 }
  0xd4   :  { %2087 = vmatmul.mubr.f32.vlgmr.msra.gmra.mxu1 %v8522_v7  ;;  %7685 = vmatprep.subr.mxu1 %v8341_v0  ;;  %v9254_v7 = vand.u32 4294901760, %v2235_v3  ;;  %v121_v13 = vrot.slane %v116_v58, %v120_v11  ;;  %v125_v25 = vrot.slane %v116_v58, %v124_v50  ;;  %v129_v5 = vrot.slane %v116_v58, %v128_v22 }
  0xd5   :  { %7681 = vmatpush3.msra.mxu0 %v9182_v16  ;;  %7686 = vmatpush3.msra.mxu1 %v9229_v49  ;;  %v133_v20 = vrot.slane %v116_v58, %v132_v57 }
  0xd6   :  { %7682 = vmatprep.mubr.msk.f32.mxu0 %vm8342_vm1, %v8341_v0  ;;  %7687 = vmatprep.subr.mxu1 %v8341_v0 }
  0xd7   :  { %7696 = vmatprep.subr.mxu0 %v8341_v0  ;;  %7683 = vmatmul.mubr.f32.vlgmr.msra.gmra.mxu0 %v8341_v0 }
  0xd8   :  { %7688 = vmatpush3.msra.mxu1 %v9239_v59  ;;  %7697 = vmatpush3.msra.mxu0 %v9169_v51 }
  0xd9   :  { %7689 = vmatprep.subr.mxu1 %v8341_v0  ;;  %7698 = vmatprep.subr.mxu0 %v8341_v0 }
  0xda   :  { %7690 = vmatpush3.msra.mxu1 %v9248_v52  ;;  %7699 = vmatpush3.msra.mxu0 %v9185_v26 }
  0xdb   :  { %7691 = vmatprep.subr.mxu1 %v8341_v0  ;;  %7700 = vmatprep.subr.mxu0 %v8341_v0 }
  0xdc   :  { %7692 = vmatpush3.msra.mxu1 %v9254_v7  ;;  %7693 = vmatprep.mubr.msk.f32.mxu1 %vm8342_vm1, %v8341_v0 }
  0xdd   :  { %7701 = vmatpush3.msra.mxu0 %v9197_v17  ;;  %7694 = vmatmul.mubr.f32.vlgmr.msra.gmra.mxu1 %v8341_v0 }
  0xde   :  { %7702 = vmatprep.subr.mxu0 %v8341_v0  ;;  %7707 = vmatprep.subr.mxu1 %v8341_v0 }
  0xdf   :  { %7703 = vmatpush3.msra.mxu0 %v9207_v36  ;;  %7704 = vmatprep.mubr.msk.f32.mxu0 %vm8342_vm1, %v8341_v0 }
  0xe0   :  { %7708 = vmatpush3.msra.mxu1 %v9152_v15  ;;  %7705 = vmatmul.mubr.f32.vlgmr.msra.gmra.mxu0 %v8341_v0 }
  0xe1   :  { %7709 = vmatprep.subr.mxu1 %v8341_v0  ;;  %7718 = vmatprep.subr.mxu0 %v8341_v0 }
  0xe2   :  { %7710 = vmatpush3.msra.mxu1 %v9163_v27  ;;  %7719 = vmatpush3.msra.mxu0 %v9191_v56 }
  0xe3   :  { %7711 = vmatprep.subr.mxu1 %v8341_v0  ;;  %7720 = vmatprep.subr.mxu0 %v8341_v0 }
  0xe4   :  { %7712 = vmatpush3.msra.mxu1 %v9174_v10  ;;  %7721 = vmatpush3.msra.mxu0 %v9204_v1 }
  0xe5   :  { %7713 = vmatprep.subr.mxu1 %v8341_v0  ;;  %7722 = vmatprep.subr.mxu0 %v8341_v0 }
  0xe6   :  { %7714 = vmatpush3.msra.mxu1 %v9182_v16  ;;  %7715 = vmatprep.mubr.msk.f32.mxu1 %vm8342_vm1, %v8341_v0 }
  0xe7   :  { %7723 = vmatpush3.msra.mxu0 %v9216_v38  ;;  %7716 = vmatmul.mubr.f32.vlgmr.msra.gmra.mxu1 %v8341_v0 }
  0xe8   :  { %7724 = vmatprep.subr.mxu0 %v8341_v0  ;;  %7729 = vmatprep.subr.mxu1 %v8341_v0 }
  0xe9   :  { %7725 = vmatpush3.msra.mxu0 %v9225_v55  ;;  %7726 = vmatprep.mubr.msk.f32.mxu0 %vm8342_vm1, %v8341_v0 }
  0xea   :  { %7730 = vmatpush3.msra.mxu1 %v9152_v15  ;;  %7727 = vmatmul.mubr.f32.vlgmr.msra.gmra.mxu0 %v8341_v0 }
  0xeb   :  { %7731 = vmatprep.subr.mxu1 %v8341_v0  ;;  %7737 = vmatprep.mubr.msk.f32.mxu1 %vm8342_vm1, %v8341_v0 }
  0xec   :  { %7732 = vmatpush3.msra.mxu1 %v9163_v27  ;;  %2599 = vrot.lane.b32.xlu0 %v7212_v62, %s8343_s20 }
  0xed   :  { %7733 = vmatprep.subr.mxu1 %v8341_v0  ;;  %7740 = vmatprep.subr.mxu0 %v8341_v0 }
  0xee   :  { %7734 = vmatpush3.msra.mxu1 %v9174_v10  ;;  %7741 = vmatpush3.msra.mxu0 %v9152_v15 }
  0xef   :  { %7735 = vmatprep.subr.mxu1 %v8341_v0  ;;  %7742 = vmatprep.subr.mxu0 %v8341_v0 }
  0xf0   :  { %7736 = vmatpush3.msra.mxu1 %v9182_v16  ;;  %7743 = vmatpush3.msra.mxu0 %v9163_v27 }
  0xf1   :  { %7738 = vmatmul.mubr.f32.vlgmr.msra.gmra.mxu1 %v8341_v0  ;;  %7751 = vmatprep.subr.mxu1 %v8341_v0 }
  0xf2   :  { %7752 = vmatpush3.msra.mxu1 %v9229_v49  ;;  %7759 = vmatprep.mubr.msk.f32.mxu1 %vm8342_vm1, %v8341_v0 }
  0xf3   :  { %7753 = vmatprep.subr.mxu1 %v8341_v0  ;;  %7744 = vmatprep.subr.mxu0 %v8341_v0 }
  0xf4   :  { %7754 = vmatpush3.msra.mxu1 %v9239_v59  ;;  %7745 = vmatpush3.msra.mxu0 %v9174_v10 }
  0xf5   :  { %7755 = vmatprep.subr.mxu1 %v8341_v0  ;;  %7746 = vmatprep.subr.mxu0 %v8341_v0 }
  0xf6   :  { %7756 = vmatpush3.msra.mxu1 %v9248_v52  ;;  %7747 = vmatpush3.msra.mxu0 %v9182_v16 }
  0xf7   :  { %7757 = vmatprep.subr.mxu1 %v8341_v0  ;;  %7748 = vmatprep.mubr.msk.f32.mxu0 %vm8342_vm1, %v8341_v0 }
  0xf8   :  { %7758 = vmatpush3.msra.mxu1 %v9254_v7  ;;  %7762 = vmatprep.subr.mxu0 %v8341_v0 }
  0xf9   :  { %7773 = vmatprep.subr.mxu1 %v8341_v0 }
  0xfe   :  { %v239_v60 = vpop.f32.mrf.mxu0 }
  0xff   :  { %v240_v19 = vadd.f32 %v239_v60, %v121_v13 }
 0x100   :  { %v241_v21 = vpop.f32.mrf.mxu0 }
 0x101   :  { %v242_v33 = vadd.f32 %v241_v21, %v125_v25 }
 0x104   :  { %v391_v37 = vpop.f32.mrf.mxu1 }
 0x105   :  { %v392_v4 = vadd.f32 %v391_v37, %v240_v19 }
 0x106   :  { %v393_v63 = vpop.f32.mrf.mxu1 }
 0x107   :  { %v394_v9 = vadd.f32 %v393_v63, %v242_v33 }
 0x10e   :  { %v496_v43 = vpop.f32.mrf.mxu0 }
 0x10f   :  { %v497_v18 = vadd.f32 %v496_v43, %v392_v4  ;;  %v140_v43 = vsub.s32 5, %v9321_v2 }
 0x110   :  { %v498_v8 = vpop.f32.mrf.mxu0 }
 0x111   :  { %v499_v48 = vadd.f32 %v498_v8, %v394_v9  ;;  %v136_v9 = vsub.s32 4, %v9321_v2 }
 0x113   :  { %v137_v8 = vrot.slane %v116_v58, %v136_v9 }
 0x116   :  { %v586_v54 = vpop.f32.mrf.mxu1 }
 0x117   :  { %v587_v61 = vadd.f32 %v586_v54, %v497_v18 }
 0x118   :  { %v588_v40 = vpop.f32.mrf.mxu1 }
 0x119   :  { %v589_v42 = vadd.f32 %v588_v40, %v499_v48  ;;  %v141_v48 = vrot.slane %v116_v58, %v140_v43 }
 0x11f   :  { %v706_v44 = vpop.f32.mrf.mxu0 }
 0x120   :  { %v707_v12 = vadd.f32 %v706_v44, %v587_v61 }
 0x121   :  { %v708_v28 = vpop.f32.mrf.mxu0 }
 0x122   :  { %v709_v53 = vadd.f32 %v708_v28, %v589_v42 }
 0x128   :  { %v794_v29 = vpop.f32.mrf.mxu1 }
 0x129   :  { %v9338_v24 = vadd.f32 %v794_v29, %v707_v12 }
 0x12a   :  { %v796_v35 = vpop.f32.mrf.mxu1 }
 0x12b   :  { %v9340_v32 = vadd.f32 %v796_v35, %v709_v53 }
 0x132   :  { %v886_v23 = vpop.f32.mrf.mxu0 }
 0x133   :  { %v887_v39 = vadd.f32 %v886_v23, %v129_v5 }
 0x134   :  { %v888_v47 = vpop.f32.mrf.mxu0 }
 0x135   :  { %v889_v30 = vadd.f32 %v888_v47, %v133_v20 }
 0x13a   :  { %v1038_v34 = vpop.f32.mrf.mxu1 }
 0x13b   :  { %v1039_v41 = vadd.f32 %v1038_v34, %v887_v39 }
 0x13c   :  { %v1040_v14 = vpop.f32.mrf.mxu1 }
 0x13d   :  { %v1041_v45 = vadd.f32 %v1040_v14, %v889_v30 }
 0x143   :  { %v1143_v46 = vpop.f32.mrf.mxu0 }
 0x144   :  { %v1144_v6 = vadd.f32 %v1143_v46, %v1039_v41 }
 0x145   :  { %v1145_v3 = vpop.f32.mrf.mxu0 }
 0x146   :  { %v1146_v62 = vadd.f32 %v1145_v3, %v1041_v45 }
 0x14c   :  { %v1233_v31 = vpop.f32.mrf.mxu1 }
 0x14d   :  { %v1234_v11 = vadd.f32 %v1233_v31, %v1144_v6 }
 0x14e   :  { %v1235_v50 = vpop.f32.mrf.mxu1 }
 0x14f   :  { %v1236_v13 = vadd.f32 %v1235_v50, %v1146_v62 }
 0x155   :  { %v1353_v60 = vpop.f32.mrf.mxu0 }
 0x156   :  { %v1354_v25 = vadd.f32 %v1353_v60, %v1234_v11 }
 0x157   :  { %v1355_v21 = vpop.f32.mrf.mxu0 }
 0x158   :  { %v1356_v19 = vadd.f32 %v1355_v21, %v1236_v13 }
 0x15e   :  { %v1441_v33 = vpop.f32.mrf.mxu1  ;;  %v9354_v9 = vpop.permute.xlu0 %2599 }
 0x15f   :  { %v9344_v37 = vadd.f32 %v1441_v33, %v1354_v25 }
 0x160   :  { %v1443_v4 = vpop.f32.mrf.mxu1 }
 0x161   :  { %v9346_v63 = vadd.f32 %v1443_v4, %v1356_v19 }
 0x168   :  { %v1533_v18 = vpop.f32.mrf.mxu0 }
 0x169   :  { %v1534_v61 = vadd.f32 %v1533_v18, %v137_v8 }
 0x16a   :  { %v1535_v54 = vpop.f32.mrf.mxu0 }
 0x16b   :  { %v1536_v40 = vadd.f32 %v1535_v54, %v141_v48 }
 0x170   :  { %v1685_v42 = vpop.f32.mrf.mxu1 }
 0x171   :  { %v1686_v44 = vadd.f32 %v1685_v42, %v1534_v61 }
 0x172   :  { %v1687_v12 = vpop.f32.mrf.mxu1 }
 0x173   :  { %v1688_v28 = vadd.f32 %v1687_v12, %v1536_v40 }
 0x179   :  { %v1790_v53 = vpop.f32.mrf.mxu0 }
 0x17a   :  { %v1791_v29 = vadd.f32 %v1790_v53, %v1686_v44 }
 0x17b   :  { %v1792_v35 = vpop.f32.mrf.mxu0 }
 0x17c   :  { %v1793_v22 = vadd.f32 %v1792_v35, %v1688_v28 }
 0x182   :  { %v1880_v57 = vpop.f32.mrf.mxu1 }
 0x183   :  { %v1881_v23 = vadd.f32 %v1880_v57, %v1791_v29 }
 0x184   :  { %v1882_v5 = vpop.f32.mrf.mxu1 }
 0x185   :  { %v1883_v20 = vadd.f32 %v1882_v5, %v1793_v22 }
 0x18b   :  { %v2000_v47 = vpop.f32.mrf.mxu0 }
 0x18c   :  { %v2001_v2 = vadd.f32 %v2000_v47, %v1881_v23 }
 0x18d   :  { %v2002_v39 = vpop.f32.mrf.mxu0 }
 0x18e   :  { %v2003_v30 = vadd.f32 %v2002_v39, %v1883_v20 }
 0x194   :  { %v2088_v58 = vpop.f32.mrf.mxu1 }
 0x195   :  { %v9350_v34 = vadd.f32 %v2088_v58, %v2001_v2 }
 0x196   :  { %v2090_v41 = vpop.f32.mrf.mxu1 }
 0x197   :  { %v9352_v14 = vadd.f32 %v2090_v41, %v2003_v30  ;;  %v2182_v45 = vpop.f32.mrf.mxu0 }
 0x199   :  { %v7684_v46 = vpop.f32.mrf.mxu0 }
 0x19d   :  { %v2273_v6 = vpop.f32.mrf.mxu1 }
 0x19e   :  { %v2274_v11 = vadd.f32 %v2273_v6, %v2182_v45 }
 0x19f   :  { %v7695_v3 = vpop.f32.mrf.mxu1 }
 0x1a0   :  { %v2353_v62 = vpop.f32.mrf.mxu0 }
 0x1a1   :  { %v2354_v60 = vadd.f32 %v2353_v62, %v2274_v11 }
 0x1a2   :  { %v7706_v31 = vpop.f32.mrf.mxu0 }
 0x1a7   :  { %v2430_v50 = vpop.f32.mrf.mxu1 }
 0x1a8   :  { %v2431_v21 = vadd.f32 %v2430_v50, %v2354_v60 }
 0x1a9   :  { %v7717_v13 = vpop.f32.mrf.mxu1 }
 0x1aa   :  { %v2513_v25 = vpop.f32.mrf.mxu0 }
 0x1ab   :  { %v2514_v33 = vadd.f32 %v2513_v25, %v2431_v21 }
 0x1ac   :  { %v7728_v19 = vpop.f32.mrf.mxu0 }
 0x1b1   :  { %v2588_v4 = vpop.f32.mrf.mxu1 }
 0x1b2   :  { %v2589_v43 = vadd.f32 %v2588_v4, %v2514_v33 }
 0x1b3   :  { %v7739_v18 = vpop.f32.mrf.mxu1 }
 0x1b4   :  { %v2602_v8 = vadd.f32 %v9354_v9, %v2589_v43  ;;  %v2592_v48 = vadd.f32 %v2589_v43, %v9338_v24 }
 0x1b6   :  { %2604 = vrot.lane.b32.xlu0 %v2602_v8, %s8343_s20  ;;  %v7213_v54 = vmul.f32 -1.442695, %v2592_v48 }
 0x1b8   :  { %8214 = vpow2.f32 %v7213_v54 }
 0x1c5   :  { %v8215_v61 = vpop.eup %8214 }
 0x1c6   :  { %v2596_v40 = vadd.f32 1.0, %v8215_v61 }
 0x1c8   :  { %8216 = vrcp.f32 %v2596_v40 }
 0x1d5   :  { %v8217_v42 = vpop.eup %8216 }
 0x1d6   :  { %v2614_v35 = vsub.f32 1.0, %v8217_v42  ;;  %v2620_v57 = vmul.f32 0.0, %v8217_v42 }
 0x228   :  { %v2605_v44 = vpop.permute.xlu0 %2604 }
 0x229   :  { %v2607_v12 = vmul.f32 %v8217_v42, %v2605_v44 }
 0x22b   :  { %2609 = vrot.lane.b32.xlu1 %v2607_v12, %s8343_s20 }
 0x29d   :  { %v2610_v28 = vpop.permute.xlu1 %2609 }
 0x29e   :  { %v2612_v53 = vadd.f32 %v2610_v28, %v9338_v24 }
 0x2a0   :  { %8218 = vtanh.f32 %v2612_v53 }
 0x2ad   :  { %v8219_v29 = vpop.eup %8218 }
 0x2ae   :  { %2616 = vrot.lane.b32.xlu1 %v8219_v29, %s8344_s2 }
 0x320   :  { %v2617_v22 = vpop.permute.xlu1 %2616 }
 0x321   :  { %v2619_v23 = vmul.f32 %v2617_v22, %v2614_v35 }
 0x323   :  { %v2621_v5 = vadd.f32 %v2620_v57, %v2619_v23 }
 0x325   :  { %2623 = vrot.lane.b32.xlu0 %v2621_v5, %s8344_s2 }
 0x397   :  { %v9363_v20 = vpop.permute.xlu0 %2623 }
 0x398   :  { %v2625_v47 = vsel %vm2103_vm2, %v9363_v20, 0 }
 0x399   :  { %v2696_v2 = vand.u32 4294901760, %v2625_v47 }
 0x39b   :  { %v2697_v39 = vsub.f32 %v2625_v47, %v2696_v2  ;;  %7760 = vmatmul.mubr.f32.vlgmr.msra.gmra.mxu1 %v2696_v2 }
 0x39c   :  { %7774 = vmatpush3.msra.mxu1 %v9152_v15  ;;  %7781 = vmatprep.mubr.msk.f32.mxu1 %vm8342_vm1, %v8341_v0 }
 0x39d   :  { %7775 = vmatprep.subr.mxu1 %v8341_v0  ;;  %v2698_v30 = vand.u32 4294901760, %v2697_v39 }
 0x39e   :  { %7776 = vmatpush3.msra.mxu1 %v9163_v27 }
 0x39f   :  { %7777 = vmatprep.subr.mxu1 %v8341_v0  ;;  %v2699_v58 = vsub.f32 %v2697_v39, %v2698_v30 }
 0x3a0   :  { %7778 = vmatpush3.msra.mxu1 %v9174_v10 }
 0x3a1   :  { %7779 = vmatprep.subr.mxu1 %v8341_v0  ;;  %v2700_v41 = vand.u32 4294901760, %v2699_v58 }
 0x3a2   :  { %7780 = vmatpush3.msra.mxu1 %v9182_v16 }
 0x3a3   :  { %7782 = vmatmul.mubr.f32.vlgmr.msra.gmra.mxu1 %v2698_v30  ;;  %7795 = vmatprep.subr.mxu1 %v8341_v0 }
 0x3a4   :  { %7749 = vmatmul.mubr.f32.vlgmr.msra.gmra.mxu0 %v2700_v41  ;;  %7796 = vmatpush3.msra.mxu1 %v9152_v15 }
 0x3a5   :  { %7763 = vmatpush3.msra.mxu0 %v9169_v51  ;;  %7797 = vmatprep.subr.mxu1 %v8341_v0 }
 0x3a6   :  { %7764 = vmatprep.subr.mxu0 %v8341_v0  ;;  %7798 = vmatpush3.msra.mxu1 %v9163_v27 }
 0x3a7   :  { %7765 = vmatpush3.msra.mxu0 %v9185_v26  ;;  %7799 = vmatprep.subr.mxu1 %v8341_v0 }
 0x3a8   :  { %7766 = vmatprep.subr.mxu0 %v8341_v0  ;;  %7800 = vmatpush3.msra.mxu1 %v9174_v10 }
 0x3a9   :  { %7767 = vmatpush3.msra.mxu0 %v9197_v17  ;;  %7801 = vmatprep.subr.mxu1 %v8341_v0 }
 0x3aa   :  { %7768 = vmatprep.subr.mxu0 %v8341_v0  ;;  %7770 = vmatprep.mubr.msk.f32.mxu0 %vm8342_vm1, %v8341_v0 }
 0x3ab   :  { %7769 = vmatpush3.msra.mxu0 %v9207_v36  ;;  %7802 = vmatpush3.msra.mxu1 %v9182_v16 }
 0x3ac   :  { %7803 = vmatprep.mubr.msk.f32.mxu1 %vm8342_vm1, %v8341_v0  ;;  %7771 = vmatmul.mubr.f32.vlgmr.msra.gmra.mxu0 %v2697_v39 }
 0x3ad   :  { %7784 = vmatprep.subr.mxu0 %v8341_v0  ;;  %7804 = vmatmul.mubr.f32.vlgmr.msra.gmra.mxu1 %v2696_v2 }
 0x3ae   :  { %7785 = vmatpush3.msra.mxu0 %v9191_v56  ;;  %7792 = vmatprep.mubr.msk.f32.mxu0 %vm8342_vm1, %v8341_v0 }
 0x3af   :  { %7786 = vmatprep.subr.mxu0 %v8341_v0  ;;  %7817 = vmatprep.subr.mxu1 %v8341_v0 }
 0x3b0   :  { %7787 = vmatpush3.msra.mxu0 %v9204_v1  ;;  %7818 = vmatpush3.msra.mxu1 %v9229_v49 }
 0x3b1   :  { %7788 = vmatprep.subr.mxu0 %v8341_v0  ;;  %7819 = vmatprep.subr.mxu1 %v8341_v0 }
 0x3b2   :  { %7789 = vmatpush3.msra.mxu0 %v9216_v38  ;;  %7820 = vmatpush3.msra.mxu1 %v9239_v59 }
 0x3b3   :  { %7790 = vmatprep.subr.mxu0 %v8341_v0  ;;  %7821 = vmatprep.subr.mxu1 %v8341_v0 }
 0x3b4   :  { %7791 = vmatpush3.msra.mxu0 %v9225_v55  ;;  %7822 = vmatpush3.msra.mxu1 %v9248_v52 }
 0x3b5   :  { %7793 = vmatmul.mubr.f32.vlgmr.msra.gmra.mxu0 %v2696_v2  ;;  %7823 = vmatprep.subr.mxu1 %v8341_v0 }
 0x3b6   :  { %7824 = vmatpush3.msra.mxu1 %v9254_v7  ;;  %7806 = vmatprep.subr.mxu0 %v8341_v0 }
 0x3b7   :  { %7825 = vmatprep.mubr.msk.f32.mxu1 %vm8342_vm1, %v8341_v0  ;;  %7839 = vmatprep.subr.mxu1 %v8341_v0 }
 0x3b8   :  { %7807 = vmatpush3.msra.mxu0 %v9152_v15  ;;  %7814 = vmatprep.mubr.msk.f32.mxu0 %vm8342_vm1, %v8341_v0 }
 0x3b9   :  { %7808 = vmatprep.subr.mxu0 %v8341_v0 }
 0x3ba   :  { %7809 = vmatpush3.msra.mxu0 %v9163_v27 }
 0x3bb   :  { %7810 = vmatprep.subr.mxu0 %v8341_v0 }
 0x3bc   :  { %7811 = vmatpush3.msra.mxu0 %v9174_v10 }
 0x3bd   :  { %7812 = vmatprep.subr.mxu0 %v8341_v0 }
 0x3be   :  { %7813 = vmatpush3.msra.mxu0 %v9182_v16 }
 0x3bf   :  { %7828 = vmatprep.subr.mxu0 %v8341_v0 }
 0x45b   :  { %v2793_v45 = vpop.f32.mrf.mxu1 }
 0x45d   :  { %v7761_v46 = vpop.f32.mrf.mxu1 }
 0x463   :  { %v2950_v6 = vpop.f32.mrf.mxu1 }
 0x464   :  { %v2702_v3 = vpop.f32.mrf.mxu0 }
 0x465   :  { %v7783_v62 = vpop.f32.mrf.mxu1  ;;  %v2794_v13 = vadd.f32 %v2793_v45, %v2702_v3 }
 0x466   :  { %v7750_v31 = vpop.f32.mrf.mxu0 }
 0x46c   :  { %v2873_v11 = vpop.f32.mrf.mxu0 }
 0x46d   :  { %v3108_v50 = vpop.f32.mrf.mxu1  ;;  %v2874_v21 = vadd.f32 %v2873_v11, %v2794_v13 }
 0x46e   :  { %v7772_v60 = vpop.f32.mrf.mxu0 }
 0x46f   :  { %v7805_v25 = vpop.f32.mrf.mxu1  ;;  %v2951_v19 = vadd.f32 %v2950_v6, %v2874_v21 }
 0x475   :  { %v3033_v33 = vpop.f32.mrf.mxu0 }
 0x476   :  { %v3034_v4 = vadd.f32 %v3033_v33, %v2951_v19 }
 0x477   :  { %v7794_v43 = vpop.f32.mrf.mxu0 }
 0x478   :  { %v3109_v18 = vadd.f32 %v3108_v50, %v3034_v4 }
 0x47a   :  { %3113 = vrot.lane.b32.xlu1 %v3109_v18, %s8344_s2  ;;  %v3130_v8 = vadd.f32 %v3109_v18, %v9354_v9 }
 0x47c   :  { %3132 = vrot.lane.b32.xlu0 %v3130_v8, %s8345_s22 }
 0x4ec   :  { %v3114_v48 = vpop.permute.xlu1 %3113 }
 0x4ed   :  { %v3116_v54 = vadd.f32 %v3114_v48, %v9338_v24  ;;  %v3123_v22 = vadd.f32 %v3114_v48, %v9340_v32 }
 0x4ee   :  { %v3133_v12 = vpop.permute.xlu0 %3132 }
 0x4ef   :  { %v7214_v61 = vmul.f32 -1.442695, %v3116_v54  ;;  %v7215_v24 = vmul.f32 -1.442695, %v3123_v22 }
 0x4f1   :  { %8220 = vpow2.f32 %v7214_v61 }
 0x4fe   :  { %v8221_v40 = vpop.eup %8220 }
 0x4ff   :  { %v3120_v42 = vadd.f32 1.0, %v8221_v40 }
 0x501   :  { %8222 = vrcp.f32 %v3120_v42 }
 0x50e   :  { %v8223_v44 = vpop.eup %8222 }
 0x50f   :  { %v3135_v28 = vmul.f32 %v8223_v44, %v3133_v12 }
 0x511   :  { %3137 = vrot.lane.b32.xlu1 %v3135_v28, %s8343_s20 }
 0x583   :  { %v3138_v53 = vpop.permute.xlu1 %3137 }
 0x584   :  { %v3140_v29 = vadd.f32 %v3138_v53, %v9340_v32 }
 0x586   :  { %8224 = vtanh.f32 %v3140_v29 }
 0x587   :  { %8226 = vpow2.f32 %v7215_v24 }
 0x593   :  { %v8225_v35 = vpop.eup %8224 }
 0x594   :  { %3144 = vrot.lane.b32.xlu0 %v8225_v35, %s8344_s2  ;;  %v8227_v57 = vpop.eup %8226 }
 0x595   :  { %v3127_v23 = vadd.f32 1.0, %v8227_v57 }
 0x597   :  { %8228 = vrcp.f32 %v3127_v23 }
 0x5a4   :  { %v8229_v5 = vpop.eup %8228 }
 0x5a5   :  { %v3142_v47 = vsub.f32 1.0, %v8229_v5  ;;  %v3149_v39 = vmul.f32 %v8229_v5, %v9363_v20 }
 0x606   :  { %v3145_v2 = vpop.permute.xlu0 %3144 }
 0x607   :  { %v3147_v30 = vmul.f32 %v3145_v2, %v3142_v47 }
 0x609   :  { %v9436_v58 = vadd.f32 %v3149_v39, %v3147_v30 }
 0x60b   :  { %v3152_v41 = vsel %vm2103_vm2, %v9436_v58, 0 }
 0x60c   :  { %v3223_v45 = vand.u32 4294901760, %v3152_v41 }
 0x60e   :  { %7826 = vmatmul.mubr.f32.vlgmr.msra.gmra.mxu1 %v3223_v45  ;;  %v3224_v46 = vsub.f32 %v3152_v41, %v3223_v45 }
 0x60f   :  { %7840 = vmatpush3.msra.mxu1 %v9152_v15  ;;  %7847 = vmatprep.mubr.msk.f32.mxu1 %vm8342_vm1, %v8341_v0 }
 0x610   :  { %7841 = vmatprep.subr.mxu1 %v8341_v0  ;;  %v3225_v6 = vand.u32 4294901760, %v3224_v46 }
 0x611   :  { %7842 = vmatpush3.msra.mxu1 %v9163_v27 }
 0x612   :  { %7843 = vmatprep.subr.mxu1 %v8341_v0  ;;  %v3226_v3 = vsub.f32 %v3224_v46, %v3225_v6 }
 0x613   :  { %7844 = vmatpush3.msra.mxu1 %v9174_v10 }
 0x614   :  { %7845 = vmatprep.subr.mxu1 %v8341_v0  ;;  %v3227_v62 = vand.u32 4294901760, %v3226_v3 }
 0x615   :  { %7846 = vmatpush3.msra.mxu1 %v9182_v16 }
 0x616   :  { %7848 = vmatmul.mubr.f32.vlgmr.msra.gmra.mxu1 %v3225_v6  ;;  %7861 = vmatprep.subr.mxu1 %v8341_v0 }
 0x617   :  { %7815 = vmatmul.mubr.f32.vlgmr.msra.gmra.mxu0 %v3227_v62  ;;  %7862 = vmatpush3.msra.mxu1 %v9152_v15 }
 0x618   :  { %7829 = vmatpush3.msra.mxu0 %v9169_v51  ;;  %7863 = vmatprep.subr.mxu1 %v8341_v0 }
 0x619   :  { %7830 = vmatprep.subr.mxu0 %v8341_v0  ;;  %7864 = vmatpush3.msra.mxu1 %v9163_v27 }
 0x61a   :  { %7831 = vmatpush3.msra.mxu0 %v9185_v26  ;;  %7865 = vmatprep.subr.mxu1 %v8341_v0 }
 0x61b   :  { %7832 = vmatprep.subr.mxu0 %v8341_v0  ;;  %7866 = vmatpush3.msra.mxu1 %v9174_v10 }
 0x61c   :  { %7833 = vmatpush3.msra.mxu0 %v9197_v17  ;;  %7867 = vmatprep.subr.mxu1 %v8341_v0 }
 0x61d   :  { %7834 = vmatprep.subr.mxu0 %v8341_v0  ;;  %7836 = vmatprep.mubr.msk.f32.mxu0 %vm8342_vm1, %v8341_v0 }
 0x61e   :  { %7835 = vmatpush3.msra.mxu0 %v9207_v36  ;;  %7868 = vmatpush3.msra.mxu1 %v9182_v16 }
 0x61f   :  { %7869 = vmatprep.mubr.msk.f32.mxu1 %vm8342_vm1, %v8341_v0  ;;  %7837 = vmatmul.mubr.f32.vlgmr.msra.gmra.mxu0 %v3224_v46 }
 0x620   :  { %7850 = vmatprep.subr.mxu0 %v8341_v0  ;;  %7870 = vmatmul.mubr.f32.vlgmr.msra.gmra.mxu1 %v3223_v45 }
 0x621   :  { %7851 = vmatpush3.msra.mxu0 %v9191_v56  ;;  %7858 = vmatprep.mubr.msk.f32.mxu0 %vm8342_vm1, %v8341_v0 }
 0x622   :  { %7852 = vmatprep.subr.mxu0 %v8341_v0  ;;  %7883 = vmatprep.subr.mxu1 %v8341_v0 }
 0x623   :  { %7853 = vmatpush3.msra.mxu0 %v9204_v1  ;;  %7884 = vmatpush3.msra.mxu1 %v9229_v49 }
 0x624   :  { %7854 = vmatprep.subr.mxu0 %v8341_v0  ;;  %7885 = vmatprep.subr.mxu1 %v8341_v0 }
 0x625   :  { %7855 = vmatpush3.msra.mxu0 %v9216_v38  ;;  %7886 = vmatpush3.msra.mxu1 %v9239_v59 }
 0x626   :  { %7856 = vmatprep.subr.mxu0 %v8341_v0  ;;  %7887 = vmatprep.subr.mxu1 %v8341_v0 }
 0x627   :  { %7857 = vmatpush3.msra.mxu0 %v9225_v55  ;;  %7888 = vmatpush3.msra.mxu1 %v9248_v52 }
 0x628   :  { %7859 = vmatmul.mubr.f32.vlgmr.msra.gmra.mxu0 %v3223_v45  ;;  %7889 = vmatprep.subr.mxu1 %v8341_v0 }
 0x629   :  { %7890 = vmatpush3.msra.mxu1 %v9254_v7  ;;  %7872 = vmatprep.subr.mxu0 %v8341_v0 }
 0x62a   :  { %7891 = vmatprep.mubr.msk.f32.mxu1 %vm8342_vm1, %v8341_v0  ;;  %7905 = vmatprep.subr.mxu1 %v8341_v0 }
 0x62b   :  { %7873 = vmatpush3.msra.mxu0 %v9152_v15  ;;  %7880 = vmatprep.mubr.msk.f32.mxu0 %vm8342_vm1, %v8341_v0 }
 0x62c   :  { %7874 = vmatprep.subr.mxu0 %v8341_v0 }
 0x62d   :  { %7875 = vmatpush3.msra.mxu0 %v9163_v27 }
 0x62e   :  { %7876 = vmatprep.subr.mxu0 %v8341_v0 }
 0x62f   :  { %7877 = vmatpush3.msra.mxu0 %v9174_v10 }
 0x630   :  { %7878 = vmatprep.subr.mxu0 %v8341_v0 }
 0x631   :  { %7879 = vmatpush3.msra.mxu0 %v9182_v16 }
 0x632   :  { %7894 = vmatprep.subr.mxu0 %v8341_v0 }
 0x6ce   :  { %v3320_v31 = vpop.f32.mrf.mxu1 }
 0x6d0   :  { %v7827_v11 = vpop.f32.mrf.mxu1 }
 0x6d6   :  { %v3477_v50 = vpop.f32.mrf.mxu1 }
 0x6d7   :  { %v3229_v13 = vpop.f32.mrf.mxu0 }
 0x6d8   :  { %v7849_v60 = vpop.f32.mrf.mxu1  ;;  %v3321_v33 = vadd.f32 %v3320_v31, %v3229_v13 }
 0x6d9   :  { %v7816_v25 = vpop.f32.mrf.mxu0 }
 0x6df   :  { %v3400_v21 = vpop.f32.mrf.mxu0 }
 0x6e0   :  { %v3635_v19 = vpop.f32.mrf.mxu1  ;;  %v3401_v18 = vadd.f32 %v3400_v21, %v3321_v33 }
 0x6e1   :  { %v7838_v4 = vpop.f32.mrf.mxu0 }
 0x6e2   :  { %v7871_v43 = vpop.f32.mrf.mxu1  ;;  %v3478_v8 = vadd.f32 %v3477_v50, %v3401_v18 }
 0x6e8   :  { %v3560_v48 = vpop.f32.mrf.mxu0 }
 0x6e9   :  { %v3561_v54 = vadd.f32 %v3560_v48, %v3478_v8 }
 0x6ea   :  { %v7860_v61 = vpop.f32.mrf.mxu0 }
 0x6eb   :  { %v3636_v40 = vadd.f32 %v3635_v19, %v3561_v54 }
 0x6ed   :  { %3640 = vrot.lane.b32.xlu1 %v3636_v40, %s8343_s20  ;;  %v3650_v29 = vadd.f32 %v3636_v40, %v9354_v9 }
 0x75f   :  { %v3641_v42 = vpop.permute.xlu1 %3640 }
 0x760   :  { %v3643_v44 = vadd.f32 %v3641_v42, %v9340_v32 }
 0x762   :  { %v7216_v12 = vmul.f32 -1.442695, %v3643_v44 }
 0x764   :  { %8230 = vpow2.f32 %v7216_v12 }
 0x771   :  { %v8231_v28 = vpop.eup %8230 }
 0x772   :  { %v3647_v53 = vadd.f32 1.0, %v8231_v28 }
 0x774   :  { %8232 = vrcp.f32 %v3647_v53 }
 0x781   :  { %v8233_v35 = vpop.eup %8232 }
 0x782   :  { %v3651_v22 = vmul.f32 %v8233_v35, %v3650_v29  ;;  %v3658_v5 = vsub.f32 1.0, %v8233_v35 }
 0x784   :  { %3653 = vrot.lane.b32.xlu0 %v3651_v22, %s8343_s20 }
 0x788   :  { %3664 = vrot.lane.b32.xlu0 %v9436_v58, %s8344_s2 }
 0x7f6   :  { %v3654_v24 = vpop.permute.xlu0 %3653 }
 0x7f7   :  { %v3656_v57 = vadd.f32 %v3654_v24, %v9344_v37 }
 0x7f9   :  { %8234 = vtanh.f32 %v3656_v57 }
 0x7fa   :  { %v3665_v32 = vpop.permute.xlu0 %3664 }
 0x7fb   :  { %v3667_v2 = vmul.f32 %v8233_v35, %v3665_v32 }
 0x806   :  { %v8235_v23 = vpop.eup %8234 }
 0x807   :  { %3660 = vrot.lane.b32.xlu1 %v8235_v23, %s8344_s2 }
 0x879   :  { %v3661_v47 = vpop.permute.xlu1 %3660 }
 0x87a   :  { %v3663_v39 = vmul.f32 %v3661_v47, %v3658_v5 }
 0x87c   :  { %v9508_v30 = vadd.f32 %v3667_v2, %v3663_v39 }
 0x87e   :  { %3670 = vrot.lane.b32.xlu1 %v9508_v30, %s8345_s22 }
 0x8f0   :  { %v3671_v41 = vpop.permute.xlu1 %3670 }
 0x8f1   :  { %v3672_v45 = vsel %vm2103_vm2, %v3671_v41, 0 }
 0x8f2   :  { %v3743_v46 = vand.u32 4294901760, %v3672_v45 }
 0x8f4   :  { %v3744_v6 = vsub.f32 %v3672_v45, %v3743_v46  ;;  %7892 = vmatmul.mubr.f32.vlgmr.msra.gmra.mxu1 %v3743_v46 }
 0x8f5   :  { %7906 = vmatpush3.msra.mxu1 %v9152_v15  ;;  %7913 = vmatprep.mubr.msk.f32.mxu1 %vm8342_vm1, %v8341_v0 }
 0x8f6   :  { %v3745_v3 = vand.u32 4294901760, %v3744_v6  ;;  %7907 = vmatprep.subr.mxu1 %v8341_v0 }
 0x8f7   :  { %7908 = vmatpush3.msra.mxu1 %v9163_v27 }
 0x8f8   :  { %v3746_v62 = vsub.f32 %v3744_v6, %v3745_v3  ;;  %7909 = vmatprep.subr.mxu1 %v8341_v0 }
 0x8f9   :  { %7910 = vmatpush3.msra.mxu1 %v9174_v10 }
 0x8fa   :  { %v3747_v31 = vand.u32 4294901760, %v3746_v62  ;;  %7911 = vmatprep.subr.mxu1 %v8341_v0 }
 0x8fb   :  { %7912 = vmatpush3.msra.mxu1 %v9182_v16 }
 0x8fc   :  { %7914 = vmatmul.mubr.f32.vlgmr.msra.gmra.mxu1 %v3745_v3  ;;  %7927 = vmatprep.subr.mxu1 %v8341_v0 }
 0x8fd   :  { %7881 = vmatmul.mubr.f32.vlgmr.msra.gmra.mxu0 %v3747_v31  ;;  %7928 = vmatpush3.msra.mxu1 %v9152_v15 }
 0x8fe   :  { %7895 = vmatpush3.msra.mxu0 %v9169_v51  ;;  %7929 = vmatprep.subr.mxu1 %v8341_v0 }
 0x8ff   :  { %7896 = vmatprep.subr.mxu0 %v8341_v0  ;;  %7930 = vmatpush3.msra.mxu1 %v9163_v27 }
 0x900   :  { %7897 = vmatpush3.msra.mxu0 %v9185_v26  ;;  %7931 = vmatprep.subr.mxu1 %v8341_v0 }
 0x901   :  { %7898 = vmatprep.subr.mxu0 %v8341_v0  ;;  %7932 = vmatpush3.msra.mxu1 %v9174_v10 }
 0x902   :  { %7899 = vmatpush3.msra.mxu0 %v9197_v17  ;;  %7933 = vmatprep.subr.mxu1 %v8341_v0 }
 0x903   :  { %7900 = vmatprep.subr.mxu0 %v8341_v0  ;;  %7902 = vmatprep.mubr.msk.f32.mxu0 %vm8342_vm1, %v8341_v0 }
 0x904   :  { %7901 = vmatpush3.msra.mxu0 %v9207_v36  ;;  %7934 = vmatpush3.msra.mxu1 %v9182_v16 }
 0x905   :  { %7935 = vmatprep.mubr.msk.f32.mxu1 %vm8342_vm1, %v8341_v0  ;;  %7903 = vmatmul.mubr.f32.vlgmr.msra.gmra.mxu0 %v3744_v6 }
 0x906   :  { %7916 = vmatprep.subr.mxu0 %v8341_v0  ;;  %7936 = vmatmul.mubr.f32.vlgmr.msra.gmra.mxu1 %v3743_v46 }
 0x907   :  { %7917 = vmatpush3.msra.mxu0 %v9191_v56  ;;  %7924 = vmatprep.mubr.msk.f32.mxu0 %vm8342_vm1, %v8341_v0 }
 0x908   :  { %7918 = vmatprep.subr.mxu0 %v8341_v0  ;;  %7949 = vmatprep.subr.mxu1 %v8341_v0 }
 0x909   :  { %7919 = vmatpush3.msra.mxu0 %v9204_v1  ;;  %7950 = vmatpush3.msra.mxu1 %v9229_v49 }
 0x90a   :  { %7920 = vmatprep.subr.mxu0 %v8341_v0  ;;  %7951 = vmatprep.subr.mxu1 %v8341_v0 }
 0x90b   :  { %7921 = vmatpush3.msra.mxu0 %v9216_v38  ;;  %7952 = vmatpush3.msra.mxu1 %v9239_v59 }
 0x90c   :  { %7922 = vmatprep.subr.mxu0 %v8341_v0  ;;  %7953 = vmatprep.subr.mxu1 %v8341_v0 }
 0x90d   :  { %7923 = vmatpush3.msra.mxu0 %v9225_v55  ;;  %7954 = vmatpush3.msra.mxu1 %v9248_v52 }
 0x90e   :  { %7925 = vmatmul.mubr.f32.vlgmr.msra.gmra.mxu0 %v3743_v46  ;;  %7955 = vmatprep.subr.mxu1 %v8341_v0 }
 0x90f   :  { %7956 = vmatpush3.msra.mxu1 %v9254_v7  ;;  %7938 = vmatprep.subr.mxu0 %v8341_v0 }
 0x910   :  { %7957 = vmatprep.mubr.msk.f32.mxu1 %vm8342_vm1, %v8341_v0  ;;  %7971 = vmatprep.subr.mxu1 %v8341_v0 }
 0x911   :  { %7939 = vmatpush3.msra.mxu0 %v9152_v15  ;;  %7946 = vmatprep.mubr.msk.f32.mxu0 %vm8342_vm1, %v8341_v0 }
 0x912   :  { %7940 = vmatprep.subr.mxu0 %v8341_v0 }
 0x913   :  { %7941 = vmatpush3.msra.mxu0 %v9163_v27 }
 0x914   :  { %7942 = vmatprep.subr.mxu0 %v8341_v0 }
 0x915   :  { %7943 = vmatpush3.msra.mxu0 %v9174_v10 }
 0x916   :  { %7944 = vmatprep.subr.mxu0 %v8341_v0 }
 0x917   :  { %7945 = vmatpush3.msra.mxu0 %v9182_v16 }
 0x918   :  { %7960 = vmatprep.subr.mxu0 %v8341_v0 }
 0x9b4   :  { %v3840_v11 = vpop.f32.mrf.mxu1 }
 0x9b6   :  { %v7893_v50 = vpop.f32.mrf.mxu1 }
 0x9bc   :  { %v3997_v13 = vpop.f32.mrf.mxu1 }
 0x9bd   :  { %v3749_v60 = vpop.f32.mrf.mxu0 }
 0x9be   :  { %v7915_v25 = vpop.f32.mrf.mxu1  ;;  %v3841_v4 = vadd.f32 %v3840_v11, %v3749_v60 }
 0x9bf   :  { %v7882_v21 = vpop.f32.mrf.mxu0 }
 0x9c5   :  { %v3920_v19 = vpop.f32.mrf.mxu0 }
 0x9c6   :  { %v4155_v33 = vpop.f32.mrf.mxu1  ;;  %v3921_v8 = vadd.f32 %v3920_v19, %v3841_v4 }
 0x9c7   :  { %v7904_v43 = vpop.f32.mrf.mxu0 }
 0x9c8   :  { %v7937_v18 = vpop.f32.mrf.mxu1  ;;  %v3998_v48 = vadd.f32 %v3997_v13, %v3921_v8 }
 0x9ce   :  { %v4080_v54 = vpop.f32.mrf.mxu0 }
 0x9cf   :  { %v4081_v61 = vadd.f32 %v4080_v54, %v3998_v48 }
 0x9d0   :  { %v7926_v40 = vpop.f32.mrf.mxu0 }
 0x9d1   :  { %v4156_v42 = vadd.f32 %v4155_v33, %v4081_v61 }
 0x9d3   :  { %4160 = vrot.lane.b32.xlu0 %v4156_v42, %s8345_s22  ;;  %v4170_v44 = vadd.f32 %v4156_v42, %v9354_v9 }
 0x9d5   :  { %4172 = vrot.lane.b32.xlu1 %v4170_v44, %s8344_s2 }
 0xa45   :  { %v4161_v12 = vpop.permute.xlu0 %4160 }
 0xa46   :  { %v4163_v28 = vadd.f32 %v4161_v12, %v9344_v37 }
 0xa47   :  { %v4173_v24 = vpop.permute.xlu1 %4172 }
 0xa48   :  { %v7217_v53 = vmul.f32 -1.442695, %v4163_v28 }
 0xa4a   :  { %8236 = vpow2.f32 %v7217_v53 }
 0xa57   :  { %v8237_v29 = vpop.eup %8236 }
 0xa58   :  { %v4167_v35 = vadd.f32 1.0, %v8237_v29 }
 0xa5a   :  { %8238 = vrcp.f32 %v4167_v35 }
 0xa67   :  { %v8239_v22 = vpop.eup %8238 }
 0xa68   :  { %v4175_v57 = vmul.f32 %v8239_v22, %v4173_v24  ;;  %v4182_v2 = vsub.f32 1.0, %v8239_v22 }
 0xa6a   :  { %4177 = vrot.lane.b32.xlu0 %v4175_v57, %s8343_s20 }
 0xa6e   :  { %4188 = vrot.lane.b32.xlu0 %v9508_v30, %s8344_s2 }
 0xadc   :  { %v4178_v23 = vpop.permute.xlu0 %4177 }
 0xadd   :  { %v4180_v32 = vadd.f32 %v4178_v23, %v9344_v37 }
 0xadf   :  { %8240 = vtanh.f32 %v4180_v32 }
 0xae0   :  { %v9582_v47 = vpop.permute.xlu0 %4188 }
 0xae1   :  { %v4191_v41 = vmul.f32 %v8239_v22, %v9582_v47 }
 0xaec   :  { %v8241_v5 = vpop.eup %8240 }
 0xaed   :  { %4184 = vrot.lane.b32.xlu1 %v8241_v5, %s8344_s2 }
 0xb5f   :  { %v4185_v39 = vpop.permute.xlu1 %4184 }
 0xb60   :  { %v4187_v45 = vmul.f32 %v4185_v39, %v4182_v2 }
 0xb62   :  { %v9585_v46 = vadd.f32 %v4191_v41, %v4187_v45 }
 0xb64   :  { %4194 = vrot.lane.b32.xlu1 %v9585_v46, %s8343_s20 }
 0xbd6   :  { %v4195_v30 = vpop.permute.xlu1 %4194 }
 0xbd7   :  { %v4196_v6 = vsel %vm2103_vm2, %v4195_v30, 0 }
 0xbd8   :  { %v4267_v37 = vand.u32 4294901760, %v4196_v6 }
 0xbda   :  { %v4268_v3 = vsub.f32 %v4196_v6, %v4267_v37  ;;  %7958 = vmatmul.mubr.f32.vlgmr.msra.gmra.mxu1 %v4267_v37 }
 0xbdb   :  { %7972 = vmatpush3.msra.mxu1 %v9152_v15  ;;  %7979 = vmatprep.mubr.msk.f32.mxu1 %vm8342_vm1, %v8341_v0 }
 0xbdc   :  { %v4269_v62 = vand.u32 4294901760, %v4268_v3  ;;  %7973 = vmatprep.subr.mxu1 %v8341_v0 }
 0xbdd   :  { %7974 = vmatpush3.msra.mxu1 %v9163_v27 }
 0xbde   :  { %v4270_v31 = vsub.f32 %v4268_v3, %v4269_v62  ;;  %7975 = vmatprep.subr.mxu1 %v8341_v0 }
 0xbdf   :  { %7976 = vmatpush3.msra.mxu1 %v9174_v10 }
 0xbe0   :  { %v4271_v11 = vand.u32 4294901760, %v4270_v31  ;;  %7977 = vmatprep.subr.mxu1 %v8341_v0 }
 0xbe1   :  { %7978 = vmatpush3.msra.mxu1 %v9182_v16 }
 0xbe2   :  { %7980 = vmatmul.mubr.f32.vlgmr.msra.gmra.mxu1 %v4269_v62  ;;  %7993 = vmatprep.subr.mxu1 %v8341_v0 }
 0xbe3   :  { %7947 = vmatmul.mubr.f32.vlgmr.msra.gmra.mxu0 %v4271_v11  ;;  %7994 = vmatpush3.msra.mxu1 %v9152_v15 }
 0xbe4   :  { %7961 = vmatpush3.msra.mxu0 %v9169_v51  ;;  %7995 = vmatprep.subr.mxu1 %v8341_v0 }
 0xbe5   :  { %7962 = vmatprep.subr.mxu0 %v8341_v0  ;;  %7996 = vmatpush3.msra.mxu1 %v9163_v27 }
 0xbe6   :  { %7963 = vmatpush3.msra.mxu0 %v9185_v26  ;;  %7997 = vmatprep.subr.mxu1 %v8341_v0 }
 0xbe7   :  { %7964 = vmatprep.subr.mxu0 %v8341_v0  ;;  %7998 = vmatpush3.msra.mxu1 %v9174_v10 }
 0xbe8   :  { %7965 = vmatpush3.msra.mxu0 %v9197_v17  ;;  %7999 = vmatprep.subr.mxu1 %v8341_v0 }
 0xbe9   :  { %7966 = vmatprep.subr.mxu0 %v8341_v0  ;;  %7968 = vmatprep.mubr.msk.f32.mxu0 %vm8342_vm1, %v8341_v0 }
 0xbea   :  { %7967 = vmatpush3.msra.mxu0 %v9207_v36  ;;  %8000 = vmatpush3.msra.mxu1 %v9182_v16 }
 0xbeb   :  { %8001 = vmatprep.mubr.msk.f32.mxu1 %vm8342_vm1, %v8341_v0  ;;  %7969 = vmatmul.mubr.f32.vlgmr.msra.gmra.mxu0 %v4268_v3 }
 0xbec   :  { %7982 = vmatprep.subr.mxu0 %v8341_v0  ;;  %8002 = vmatmul.mubr.f32.vlgmr.msra.gmra.mxu1 %v4267_v37 }
 0xbed   :  { %7983 = vmatpush3.msra.mxu0 %v9191_v56  ;;  %7990 = vmatprep.mubr.msk.f32.mxu0 %vm8342_vm1, %v8341_v0 }
 0xbee   :  { %7984 = vmatprep.subr.mxu0 %v8341_v0  ;;  %8015 = vmatprep.subr.mxu1 %v8341_v0 }
 0xbef   :  { %7985 = vmatpush3.msra.mxu0 %v9204_v1  ;;  %8016 = vmatpush3.msra.mxu1 %v9229_v49 }
 0xbf0   :  { %7986 = vmatprep.subr.mxu0 %v8341_v0  ;;  %8017 = vmatprep.subr.mxu1 %v8341_v0 }
 0xbf1   :  { %7987 = vmatpush3.msra.mxu0 %v9216_v38  ;;  %8018 = vmatpush3.msra.mxu1 %v9239_v59 }
 0xbf2   :  { %7988 = vmatprep.subr.mxu0 %v8341_v0  ;;  %8019 = vmatprep.subr.mxu1 %v8341_v0 }
 0xbf3   :  { %7989 = vmatpush3.msra.mxu0 %v9225_v55  ;;  %8020 = vmatpush3.msra.mxu1 %v9248_v52 }
 0xbf4   :  { %7991 = vmatmul.mubr.f32.vlgmr.msra.gmra.mxu0 %v4267_v37  ;;  %8021 = vmatprep.subr.mxu1 %v8341_v0 }
 0xbf5   :  { %8022 = vmatpush3.msra.mxu1 %v9254_v7  ;;  %8004 = vmatprep.subr.mxu0 %v8341_v0 }
 0xbf6   :  { %8023 = vmatprep.mubr.msk.f32.mxu1 %vm8342_vm1, %v8341_v0  ;;  %8037 = vmatprep.subr.mxu1 %v8341_v0 }
 0xbf7   :  { %8005 = vmatpush3.msra.mxu0 %v9152_v15  ;;  %8012 = vmatprep.mubr.msk.f32.mxu0 %vm8342_vm1, %v8341_v0 }
 0xbf8   :  { %8006 = vmatprep.subr.mxu0 %v8341_v0 }
 0xbf9   :  { %8007 = vmatpush3.msra.mxu0 %v9163_v27 }
 0xbfa   :  { %8008 = vmatprep.subr.mxu0 %v8341_v0 }
 0xbfb   :  { %8009 = vmatpush3.msra.mxu0 %v9174_v10 }
 0xbfc   :  { %8010 = vmatprep.subr.mxu0 %v8341_v0 }
 0xbfd   :  { %8011 = vmatpush3.msra.mxu0 %v9182_v16 }
 0xbfe   :  { %8026 = vmatprep.subr.mxu0 %v8341_v0 }
 0xc9a   :  { %v4364_v50 = vpop.f32.mrf.mxu1 }
 0xc9c   :  { %v7959_v13 = vpop.f32.mrf.mxu1 }
 0xca2   :  { %v4521_v60 = vpop.f32.mrf.mxu1 }
 0xca3   :  { %v4273_v25 = vpop.f32.mrf.mxu0 }
 0xca4   :  { %v7981_v21 = vpop.f32.mrf.mxu1  ;;  %v4365_v43 = vadd.f32 %v4364_v50, %v4273_v25 }
 0xca5   :  { %v7948_v19 = vpop.f32.mrf.mxu0 }
 0xcab   :  { %v4444_v33 = vpop.f32.mrf.mxu0 }
 0xcac   :  { %v4679_v4 = vpop.f32.mrf.mxu1  ;;  %v4445_v48 = vadd.f32 %v4444_v33, %v4365_v43 }
 0xcad   :  { %v7970_v18 = vpop.f32.mrf.mxu0 }
 0xcae   :  { %v8003_v8 = vpop.f32.mrf.mxu1  ;;  %v4522_v54 = vadd.f32 %v4521_v60, %v4445_v48 }
 0xcb4   :  { %v4604_v61 = vpop.f32.mrf.mxu0 }
 0xcb5   :  { %v4605_v40 = vadd.f32 %v4604_v61, %v4522_v54 }
 0xcb6   :  { %v7992_v42 = vpop.f32.mrf.mxu0 }
 0xcb7   :  { %v4680_v44 = vadd.f32 %v4679_v4, %v4605_v40 }
 0xcb9   :  { %v4690_v12 = vadd.f32 %v4680_v44, %v9354_v9  ;;  %v4683_v28 = vadd.f32 %v4680_v44, %v9346_v63 }
 0xcbb   :  { %4692 = vrot.lane.b32.xlu0 %v4690_v12, %s8343_s20  ;;  %v7218_v53 = vmul.f32 -1.442695, %v4683_v28 }
 0xcbd   :  { %8242 = vpow2.f32 %v7218_v53 }
 0xcca   :  { %v8243_v29 = vpop.eup %8242 }
 0xccb   :  { %v4687_v35 = vadd.f32 1.0, %v8243_v29 }
 0xccd   :  { %8244 = vrcp.f32 %v4687_v35 }
 0xcda   :  { %v8245_v22 = vpop.eup %8244 }
 0xcdb   :  { %v4702_v39 = vsub.f32 1.0, %v8245_v22 }
 0xd2d   :  { %v4693_v24 = vpop.permute.xlu0 %4692 }
 0xd2e   :  { %v4695_v57 = vmul.f32 %v8245_v22, %v4693_v24 }
 0xd30   :  { %4697 = vrot.lane.b32.xlu1 %v4695_v57, %s8343_s20 }
 0xd34   :  { %4708 = vrot.lane.b32.xlu1 %v9585_v46, %s8344_s2 }
 0xda2   :  { %v4698_v23 = vpop.permute.xlu1 %4697 }
 0xda3   :  { %v4700_v32 = vadd.f32 %v4698_v23, %v9346_v63 }
 0xda5   :  { %8246 = vtanh.f32 %v4700_v32 }
 0xda6   :  { %v4709_v2 = vpop.permute.xlu1 %4708 }
 0xda7   :  { %v4711_v45 = vmul.f32 %v8245_v22, %v4709_v2 }
 0xdb2   :  { %v8247_v5 = vpop.eup %8246 }
 0xdb3   :  { %4704 = vrot.lane.b32.xlu0 %v8247_v5, %s8344_s2 }
 0xe25   :  { %v4705_v41 = vpop.permute.xlu0 %4704 }
 0xe26   :  { %v4707_v30 = vmul.f32 %v4705_v41, %v4702_v39 }
 0xe28   :  { %v4712_v6 = vadd.f32 %v4711_v45, %v4707_v30 }
 0xe2a   :  { %4714 = vrot.lane.b32.xlu0 %v4712_v6, %s8344_s2 }
 0xe9c   :  { %v9659_v37 = vpop.permute.xlu0 %4714 }
 0xe9d   :  { %v4716_v3 = vsel %vm2103_vm2, %v9659_v37, 0 }
 0xe9e   :  { %v4787_v62 = vand.u32 4294901760, %v4716_v3 }
 0xea0   :  { %v4788_v31 = vsub.f32 %v4716_v3, %v4787_v62  ;;  %8024 = vmatmul.mubr.f32.vlgmr.msra.gmra.mxu1 %v4787_v62 }
 0xea1   :  { %8038 = vmatpush3.msra.mxu1 %v9152_v15  ;;  %8045 = vmatprep.mubr.msk.f32.mxu1 %vm8342_vm1, %v8341_v0 }
 0xea2   :  { %8039 = vmatprep.subr.mxu1 %v8341_v0  ;;  %v4789_v11 = vand.u32 4294901760, %v4788_v31 }
 0xea3   :  { %8040 = vmatpush3.msra.mxu1 %v9163_v27 }
 0xea4   :  { %8041 = vmatprep.subr.mxu1 %v8341_v0  ;;  %v4790_v50 = vsub.f32 %v4788_v31, %v4789_v11 }
 0xea5   :  { %8042 = vmatpush3.msra.mxu1 %v9174_v10 }
 0xea6   :  { %8043 = vmatprep.subr.mxu1 %v8341_v0  ;;  %v4791_v13 = vand.u32 4294901760, %v4790_v50 }
 0xea7   :  { %8044 = vmatpush3.msra.mxu1 %v9182_v16 }
 0xea8   :  { %8046 = vmatmul.mubr.f32.vlgmr.msra.gmra.mxu1 %v4789_v11  ;;  %8059 = vmatprep.subr.mxu1 %v8341_v0 }
 0xea9   :  { %8013 = vmatmul.mubr.f32.vlgmr.msra.gmra.mxu0 %v4791_v13  ;;  %8060 = vmatpush3.msra.mxu1 %v9152_v15 }
 0xeaa   :  { %8027 = vmatpush3.msra.mxu0 %v9169_v51  ;;  %8061 = vmatprep.subr.mxu1 %v8341_v0 }
 0xeab   :  { %8028 = vmatprep.subr.mxu0 %v8341_v0  ;;  %8062 = vmatpush3.msra.mxu1 %v9163_v27 }
 0xeac   :  { %8029 = vmatpush3.msra.mxu0 %v9185_v26  ;;  %8063 = vmatprep.subr.mxu1 %v8341_v0 }
 0xead   :  { %8030 = vmatprep.subr.mxu0 %v8341_v0  ;;  %8064 = vmatpush3.msra.mxu1 %v9174_v10 }
 0xeae   :  { %8031 = vmatpush3.msra.mxu0 %v9197_v17  ;;  %8065 = vmatprep.subr.mxu1 %v8341_v0 }
 0xeaf   :  { %8032 = vmatprep.subr.mxu0 %v8341_v0  ;;  %8034 = vmatprep.mubr.msk.f32.mxu0 %vm8342_vm1, %v8341_v0 }
 0xeb0   :  { %8033 = vmatpush3.msra.mxu0 %v9207_v36  ;;  %8066 = vmatpush3.msra.mxu1 %v9182_v16 }
 0xeb1   :  { %8067 = vmatprep.mubr.msk.f32.mxu1 %vm8342_vm1, %v8341_v0  ;;  %8035 = vmatmul.mubr.f32.vlgmr.msra.gmra.mxu0 %v4788_v31 }
 0xeb2   :  { %8048 = vmatprep.subr.mxu0 %v8341_v0  ;;  %8068 = vmatmul.mubr.f32.vlgmr.msra.gmra.mxu1 %v4787_v62 }
 0xeb3   :  { %8049 = vmatpush3.msra.mxu0 %v9191_v56  ;;  %8056 = vmatprep.mubr.msk.f32.mxu0 %vm8342_vm1, %v8341_v0 }
 0xeb4   :  { %8050 = vmatprep.subr.mxu0 %v8341_v0  ;;  %8081 = vmatprep.subr.mxu1 %v8341_v0 }
 0xeb5   :  { %8051 = vmatpush3.msra.mxu0 %v9204_v1  ;;  %8082 = vmatpush3.msra.mxu1 %v9229_v49 }
 0xeb6   :  { %8052 = vmatprep.subr.mxu0 %v8341_v0  ;;  %8083 = vmatprep.subr.mxu1 %v8341_v0 }
 0xeb7   :  { %8053 = vmatpush3.msra.mxu0 %v9216_v38  ;;  %8084 = vmatpush3.msra.mxu1 %v9239_v59 }
 0xeb8   :  { %8054 = vmatprep.subr.mxu0 %v8341_v0  ;;  %8085 = vmatprep.subr.mxu1 %v8341_v0 }
 0xeb9   :  { %8055 = vmatpush3.msra.mxu0 %v9225_v55  ;;  %8086 = vmatpush3.msra.mxu1 %v9248_v52 }
 0xeba   :  { %8057 = vmatmul.mubr.f32.vlgmr.msra.gmra.mxu0 %v4787_v62  ;;  %8087 = vmatprep.subr.mxu1 %v8341_v0 }
 0xebb   :  { %8088 = vmatpush3.msra.mxu1 %v9254_v7  ;;  %8070 = vmatprep.subr.mxu0 %v8341_v0 }
 0xebc   :  { %8089 = vmatprep.mubr.msk.f32.mxu1 %vm8342_vm1, %v8341_v0  ;;  %8103 = vmatprep.subr.mxu1 %v8341_v0 }
 0xebd   :  { %8071 = vmatpush3.msra.mxu0 %v9152_v15  ;;  %8078 = vmatprep.mubr.msk.f32.mxu0 %vm8342_vm1, %v8341_v0 }
 0xebe   :  { %8072 = vmatprep.subr.mxu0 %v8341_v0 }
 0xebf   :  { %8073 = vmatpush3.msra.mxu0 %v9163_v27 }
 0xec0   :  { %8074 = vmatprep.subr.mxu0 %v8341_v0 }
 0xec1   :  { %8075 = vmatpush3.msra.mxu0 %v9174_v10 }
 0xec2   :  { %8076 = vmatprep.subr.mxu0 %v8341_v0 }
 0xec3   :  { %8077 = vmatpush3.msra.mxu0 %v9182_v16 }
 0xec4   :  { %8092 = vmatprep.subr.mxu0 %v8341_v0 }
 0xf60   :  { %v4884_v60 = vpop.f32.mrf.mxu1 }
 0xf62   :  { %v8025_v25 = vpop.f32.mrf.mxu1 }
 0xf68   :  { %v5041_v21 = vpop.f32.mrf.mxu1 }
 0xf69   :  { %v4793_v19 = vpop.f32.mrf.mxu0 }
 0xf6a   :  { %v8047_v33 = vpop.f32.mrf.mxu1  ;;  %v4885_v8 = vadd.f32 %v4884_v60, %v4793_v19 }
 0xf6b   :  { %v8014_v4 = vpop.f32.mrf.mxu0 }
 0xf71   :  { %v4964_v43 = vpop.f32.mrf.mxu0 }
 0xf72   :  { %v5199_v18 = vpop.f32.mrf.mxu1  ;;  %v4965_v61 = vadd.f32 %v4964_v43, %v4885_v8 }
 0xf73   :  { %v8036_v48 = vpop.f32.mrf.mxu0 }
 0xf74   :  { %v8069_v54 = vpop.f32.mrf.mxu1  ;;  %v5042_v40 = vadd.f32 %v5041_v21, %v4965_v61 }
 0xf7a   :  { %v5124_v42 = vpop.f32.mrf.mxu0 }
 0xf7b   :  { %v5125_v44 = vadd.f32 %v5124_v42, %v5042_v40 }
 0xf7c   :  { %v8058_v12 = vpop.f32.mrf.mxu0 }
 0xf7d   :  { %v5200_v28 = vadd.f32 %v5199_v18, %v5125_v44 }
 0xf7f   :  { %5204 = vrot.lane.b32.xlu1 %v5200_v28, %s8344_s2  ;;  %v5221_v53 = vadd.f32 %v5200_v28, %v9354_v9 }
 0xf81   :  { %5223 = vrot.lane.b32.xlu0 %v5221_v53, %s8345_s22 }
 0xff1   :  { %v5205_v29 = vpop.permute.xlu1 %5204 }
 0xff2   :  { %v5207_v35 = vadd.f32 %v5205_v29, %v9346_v63  ;;  %v5214_v45 = vadd.f32 %v5205_v29, %v9350_v34 }
 0xff3   :  { %v5224_v32 = vpop.permute.xlu0 %5223 }
 0xff4   :  { %v7219_v22 = vmul.f32 -1.442695, %v5207_v35  ;;  %v7220_v63 = vmul.f32 -1.442695, %v5214_v45 }
 0xff6   :  { %8248 = vpow2.f32 %v7219_v22 }
0x1003   :  { %v8249_v24 = vpop.eup %8248 }
0x1004   :  { %v5211_v57 = vadd.f32 1.0, %v8249_v24 }
0x1006   :  { %8250 = vrcp.f32 %v5211_v57 }
0x1013   :  { %v8251_v23 = vpop.eup %8250 }
0x1014   :  { %v5226_v5 = vmul.f32 %v8251_v23, %v5224_v32 }
0x1016   :  { %5228 = vrot.lane.b32.xlu1 %v5226_v5, %s8343_s20 }
0x1088   :  { %v5229_v2 = vpop.permute.xlu1 %5228 }
0x1089   :  { %v5231_v39 = vadd.f32 %v5229_v2, %v9350_v34 }
0x108b   :  { %8252 = vtanh.f32 %v5231_v39 }
0x108c   :  { %8254 = vpow2.f32 %v7220_v63 }
0x1098   :  { %v8253_v41 = vpop.eup %8252 }
0x1099   :  { %5235 = vrot.lane.b32.xlu0 %v8253_v41, %s8344_s2  ;;  %v8255_v30 = vpop.eup %8254 }
0x109a   :  { %v5218_v6 = vadd.f32 1.0, %v8255_v30 }
0x109c   :  { %8256 = vrcp.f32 %v5218_v6 }
0x10a9   :  { %v8257_v3 = vpop.eup %8256 }
0x10aa   :  { %v5233_v62 = vsub.f32 1.0, %v8257_v3  ;;  %v5240_v11 = vmul.f32 %v8257_v3, %v9659_v37 }
0x110b   :  { %v5236_v31 = vpop.permute.xlu0 %5235 }
0x110c   :  { %v5238_v50 = vmul.f32 %v5236_v31, %v5233_v62 }
0x110e   :  { %v9732_v13 = vadd.f32 %v5240_v11, %v5238_v50 }
0x1110   :  { %v5243_v60 = vsel %vm2103_vm2, %v9732_v13, 0 }
0x1111   :  { %v5314_v25 = vand.u32 4294901760, %v5243_v60 }
0x1113   :  { %8090 = vmatmul.mubr.f32.vlgmr.msra.gmra.mxu1 %v5314_v25  ;;  %v5315_v21 = vsub.f32 %v5243_v60, %v5314_v25 }
0x1114   :  { %8104 = vmatpush3.msra.mxu1 %v9152_v15  ;;  %8111 = vmatprep.mubr.msk.f32.mxu1 %vm8342_vm1, %v8341_v0 }
0x1115   :  { %8105 = vmatprep.subr.mxu1 %v8341_v0  ;;  %v5316_v19 = vand.u32 4294901760, %v5315_v21 }
0x1116   :  { %8106 = vmatpush3.msra.mxu1 %v9163_v27 }
0x1117   :  { %8107 = vmatprep.subr.mxu1 %v8341_v0  ;;  %v5317_v33 = vsub.f32 %v5315_v21, %v5316_v19 }
0x1118   :  { %8108 = vmatpush3.msra.mxu1 %v9174_v10 }
0x1119   :  { %8109 = vmatprep.subr.mxu1 %v8341_v0  ;;  %v5318_v4 = vand.u32 4294901760, %v5317_v33 }
0x111a   :  { %8110 = vmatpush3.msra.mxu1 %v9182_v16 }
0x111b   :  { %8112 = vmatmul.mubr.f32.vlgmr.msra.gmra.mxu1 %v5316_v19  ;;  %8125 = vmatprep.subr.mxu1 %v8341_v0 }
0x111c   :  { %8079 = vmatmul.mubr.f32.vlgmr.msra.gmra.mxu0 %v5318_v4  ;;  %8126 = vmatpush3.msra.mxu1 %v9152_v15 }
0x111d   :  { %8093 = vmatpush3.msra.mxu0 %v9169_v51  ;;  %8127 = vmatprep.subr.mxu1 %v8341_v0 }
0x111e   :  { %8094 = vmatprep.subr.mxu0 %v8341_v0  ;;  %8128 = vmatpush3.msra.mxu1 %v9163_v27 }
0x111f   :  { %8095 = vmatpush3.msra.mxu0 %v9185_v26  ;;  %8129 = vmatprep.subr.mxu1 %v8341_v0 }
0x1120   :  { %8096 = vmatprep.subr.mxu0 %v8341_v0  ;;  %8130 = vmatpush3.msra.mxu1 %v9174_v10 }
0x1121   :  { %8097 = vmatpush3.msra.mxu0 %v9197_v17  ;;  %8131 = vmatprep.subr.mxu1 %v8341_v0 }
0x1122   :  { %8098 = vmatprep.subr.mxu0 %v8341_v0  ;;  %8100 = vmatprep.mubr.msk.f32.mxu0 %vm8342_vm1, %v8341_v0 }
0x1123   :  { %8099 = vmatpush3.msra.mxu0 %v9207_v36  ;;  %8132 = vmatpush3.msra.mxu1 %v9182_v16 }
0x1124   :  { %8133 = vmatprep.mubr.msk.f32.mxu1 %vm8342_vm1, %v8341_v0  ;;  %8101 = vmatmul.mubr.f32.vlgmr.msra.gmra.mxu0 %v5315_v21 }
0x1125   :  { %8114 = vmatprep.subr.mxu0 %v8341_v0  ;;  %8134 = vmatmul.mubr.f32.vlgmr.msra.gmra.mxu1 %v5314_v25 }
0x1126   :  { %8115 = vmatpush3.msra.mxu0 %v9191_v56  ;;  %8122 = vmatprep.mubr.msk.f32.mxu0 %vm8342_vm1, %v8341_v0 }
0x1127   :  { %8116 = vmatprep.subr.mxu0 %v8341_v0  ;;  %8147 = vmatprep.subr.mxu1 %v8341_v0 }
0x1128   :  { %8117 = vmatpush3.msra.mxu0 %v9204_v1  ;;  %8148 = vmatpush3.msra.mxu1 %v9229_v49 }
0x1129   :  { %8118 = vmatprep.subr.mxu0 %v8341_v0  ;;  %8149 = vmatprep.subr.mxu1 %v8341_v0 }
0x112a   :  { %8119 = vmatpush3.msra.mxu0 %v9216_v38  ;;  %8150 = vmatpush3.msra.mxu1 %v9239_v59 }
0x112b   :  { %8120 = vmatprep.subr.mxu0 %v8341_v0  ;;  %8151 = vmatprep.subr.mxu1 %v8341_v0 }
0x112c   :  { %8121 = vmatpush3.msra.mxu0 %v9225_v55  ;;  %8152 = vmatpush3.msra.mxu1 %v9248_v52 }
0x112d   :  { %8123 = vmatmul.mubr.f32.vlgmr.msra.gmra.mxu0 %v5314_v25  ;;  %8153 = vmatprep.subr.mxu1 %v8341_v0 }
0x112e   :  { %8154 = vmatpush3.msra.mxu1 %v9254_v7  ;;  %8136 = vmatprep.subr.mxu0 %v8341_v0 }
0x112f   :  { %8155 = vmatprep.mubr.msk.f32.mxu1 %vm8342_vm1, %v8341_v0  ;;  %8169 = vmatprep.subr.mxu1 %v8341_v0 }
0x1130   :  { %8137 = vmatpush3.msra.mxu0 %v9152_v15  ;;  %8144 = vmatprep.mubr.msk.f32.mxu0 %vm8342_vm1, %v8341_v0 }
0x1131   :  { %8138 = vmatprep.subr.mxu0 %v8341_v0 }
0x1132   :  { %8139 = vmatpush3.msra.mxu0 %v9163_v27 }
0x1133   :  { %8140 = vmatprep.subr.mxu0 %v8341_v0 }
0x1134   :  { %8141 = vmatpush3.msra.mxu0 %v9174_v10 }
0x1135   :  { %8142 = vmatprep.subr.mxu0 %v8341_v0 }
0x1136   :  { %8143 = vmatpush3.msra.mxu0 %v9182_v16 }
0x1137   :  { %8158 = vmatprep.subr.mxu0 %v8341_v0 }
0x11d3   :  { %v5411_v49 = vpop.f32.mrf.mxu1 }
0x11d5   :  { %v8091_v59 = vpop.f32.mrf.mxu1 }
0x11db   :  { %v5568_v52 = vpop.f32.mrf.mxu1 }
0x11dc   :  { %v5320_v7 = vpop.f32.mrf.mxu0 }
0x11dd   :  { %v8113_v43 = vpop.f32.mrf.mxu1  ;;  %v5412_v54 = vadd.f32 %v5411_v49, %v5320_v7 }
0x11de   :  { %v8080_v18 = vpop.f32.mrf.mxu0 }
0x11e4   :  { %v5491_v8 = vpop.f32.mrf.mxu0 }
0x11e5   :  { %v5726_v48 = vpop.f32.mrf.mxu1  ;;  %v5492_v42 = vadd.f32 %v5491_v8, %v5412_v54 }
0x11e6   :  { %v8102_v61 = vpop.f32.mrf.mxu0 }
0x11e7   :  { %v8135_v40 = vpop.f32.mrf.mxu1  ;;  %v5569_v44 = vadd.f32 %v5568_v52, %v5492_v42 }
0x11ed   :  { %v5651_v12 = vpop.f32.mrf.mxu0 }
0x11ee   :  { %v5652_v28 = vadd.f32 %v5651_v12, %v5569_v44  ;;  %v6335_v44 = vld [vmem:[#allocation6 + $0xf8] sm:$0xff] }
0x11ef   :  { %v8124_v53 = vpop.f32.mrf.mxu0  ;;  %v6319_v12 = vld [vmem:[#allocation6 + $0x78] sm:$0xff] }
0x11f0   :  { %v5727_v29 = vadd.f32 %v5726_v48, %v5652_v28  ;;  %v6334_v28 = vld [vmem:[#allocation6 + $0xf0] sm:$0xff]  ;;  %v9862_v53 = vand.u32 4294901760, %v6335_v44 }
0x11f2   :  { %5731 = vrot.lane.b32.xlu1 %v5727_v29, %s8343_s20  ;;  %v5741_v32 = vadd.f32 %v5727_v29, %v9354_v9  ;;  %v9864_v29 = vand.u32 4294901760, %v6319_v12 }
0x1264   :  { %v5732_v35 = vpop.permute.xlu1 %5731 }
0x1265   :  { %v5734_v22 = vadd.f32 %v5732_v35, %v9350_v34  ;;  %v9866_v35 = vand.u32 4294901760, %v6334_v28 }
0x1267   :  { %v7221_v24 = vmul.f32 -1.442695, %v5734_v22  ;;  %v6318_v22 = vld [vmem:[#allocation6 + $0x70] sm:$0xff] }
0x1269   :  { %8258 = vpow2.f32 %v7221_v24  ;;  %v6333_v24 = vld [vmem:[#allocation6 + $0xe8] sm:$0xff] }
0x1276   :  { %v8259_v57 = vpop.eup %8258 }
0x1277   :  { %v5738_v23 = vadd.f32 1.0, %v8259_v57  ;;  %v6317_v57 = vld [vmem:[#allocation6 + $0x68] sm:$0xff] }
0x1279   :  { %8260 = vrcp.f32 %v5738_v23  ;;  %v9870_v23 = vand.u32 4294901760, %v6333_v24 }
0x1286   :  { %v8261_v5 = vpop.eup %8260 }
0x1287   :  { %v5742_v2 = vmul.f32 %v8261_v5, %v5741_v32  ;;  %v5749_v63 = vsub.f32 1.0, %v8261_v5  ;;  %v9875_v32 = vsub.f32 %v6335_v44, %v9862_v53 }
0x1289   :  { %5744 = vrot.lane.b32.xlu0 %v5742_v2, %s8343_s20  ;;  %10460 = vst [vmem:[#allocation9_spill] sm:$0xff] %v9875_v32  ;;  %v9881_v2 = vsub.f32 %v6334_v28, %v9866_v35 }
0x128d   :  { %5755 = vrot.lane.b32.xlu0 %v9732_v13, %s8344_s2 }
0x12fb   :  { %v5745_v39 = vpop.permute.xlu0 %5744 }
0x12fc   :  { %v5747_v41 = vadd.f32 %v5745_v39, %v9352_v14 }
0x12fe   :  { %8262 = vtanh.f32 %v5747_v41  ;;  %v6316_v41 = vld [vmem:[#allocation6 + $0x60] sm:$0xff] }
0x12ff   :  { %v5756_v34 = vpop.permute.xlu0 %5755 }
0x1300   :  { %v5758_v6 = vmul.f32 %v8261_v5, %v5756_v34  ;;  %v9878_v5 = vsub.f32 %v6319_v12, %v9864_v29  ;;  %v9890_v34 = vsub.f32 %v6333_v24, %v9870_v23 }
0x130b   :  { %v8263_v45 = vpop.eup %8262 }
0x130c   :  { %5751 = vrot.lane.b32.xlu1 %v8263_v45, %s8344_s2 }
0x137e   :  { %v5752_v30 = vpop.permute.xlu1 %5751 }
0x137f   :  { %v5754_v3 = vmul.f32 %v5752_v30, %v5749_v63  ;;  %v10409_v30 = vand.u32 4294901760, %v9875_v32 }
0x1381   :  { %v9804_v62 = vadd.f32 %v5758_v6, %v5754_v3  ;;  %v10406_v6 = vand.u32 4294901760, %v9878_v5  ;;  %v10405_v3 = vand.u32 4294901760, %v9881_v2 }
0x1383   :  { %5761 = vrot.lane.b32.xlu1 %v9804_v62, %s8345_s22 }
0x13f5   :  { %v5762_v31 = vpop.permute.xlu1 %5761 }
0x13f6   :  { %v5763_v11 = vsel %vm2103_vm2, %v5762_v31, 0  ;;  %v10402_v31 = vand.u32 4294901760, %v9890_v34 }
0x13f7   :  { %v5834_v50 = vand.u32 4294901760, %v5763_v11 }
0x13f9   :  { %v5835_v60 = vsub.f32 %v5763_v11, %v5834_v50  ;;  %8156 = vmatmul.mubr.f32.vlgmr.msra.gmra.mxu1 %v5834_v50 }
0x13fa   :  { %8170 = vmatpush3.msra.mxu1 %v9152_v15  ;;  %8177 = vmatprep.mubr.msk.f32.mxu1 %vm8342_vm1, %v8341_v0 }
0x13fb   :  { %v5836_v25 = vand.u32 4294901760, %v5835_v60  ;;  %8171 = vmatprep.subr.mxu1 %v8341_v0 }
0x13fc   :  { %8172 = vmatpush3.msra.mxu1 %v9163_v27 }
0x13fd   :  { %v5837_v21 = vsub.f32 %v5835_v60, %v5836_v25  ;;  %8173 = vmatprep.subr.mxu1 %v8341_v0 }
0x13fe   :  { %8174 = vmatpush3.msra.mxu1 %v9174_v10 }
0x13ff   :  { %v5838_v19 = vand.u32 4294901760, %v5837_v21  ;;  %8175 = vmatprep.subr.mxu1 %v8341_v0  ;;  %v6578_v21 = vsub.f32 %v9881_v2, %v10405_v3 }
0x1400   :  { %8176 = vmatpush3.msra.mxu1 %v9182_v16 }
0x1401   :  { %8178 = vmatmul.mubr.f32.vlgmr.msra.gmra.mxu1 %v5836_v25  ;;  %8191 = vmatprep.subr.mxu1 %v8341_v0  ;;  %v6459_v25 = vsub.f32 %v9878_v5, %v10406_v6 }
0x1402   :  { %8145 = vmatmul.mubr.f32.vlgmr.msra.gmra.mxu0 %v5838_v19  ;;  %8192 = vmatpush3.msra.mxu1 %v9152_v15 }
0x1403   :  { %8159 = vmatpush3.msra.mxu0 %v9169_v51  ;;  %8193 = vmatprep.subr.mxu1 %v8341_v0 }
0x1404   :  { %8160 = vmatprep.subr.mxu0 %v8341_v0  ;;  %8194 = vmatpush3.msra.mxu1 %v9163_v27 }
0x1405   :  { %8161 = vmatpush3.msra.mxu0 %v9185_v26  ;;  %8195 = vmatprep.subr.mxu1 %v8341_v0 }
0x1406   :  { %8162 = vmatprep.subr.mxu0 %v8341_v0  ;;  %8196 = vmatpush3.msra.mxu1 %v9174_v10 }
0x1407   :  { %8163 = vmatpush3.msra.mxu0 %v9197_v17  ;;  %8197 = vmatprep.subr.mxu1 %v8341_v0 }
0x1408   :  { %8164 = vmatprep.subr.mxu0 %v8341_v0  ;;  %8166 = vmatprep.mubr.msk.f32.mxu0 %vm8342_vm1, %v8341_v0 }
0x1409   :  { %8165 = vmatpush3.msra.mxu0 %v9207_v36  ;;  %8198 = vmatpush3.msra.mxu1 %v9182_v16 }
0x140a   :  { %8199 = vmatprep.mubr.msk.f32.mxu1 %vm8342_vm1, %v8341_v0  ;;  %8167 = vmatmul.mubr.f32.vlgmr.msra.gmra.mxu0 %v5835_v60  ;;  %v6571_v60 = vsub.f32 %v9875_v32, %v10409_v30  ;;  %v6307_v30 = vld [vmem:[#allocation6 + $0x18] sm:$0xff] }
0x140b   :  { %8180 = vmatprep.subr.mxu0 %v8341_v0  ;;  %8200 = vmatmul.mubr.f32.vlgmr.msra.gmra.mxu1 %v5834_v50 }
0x140c   :  { %8181 = vmatpush3.msra.mxu0 %v9191_v56  ;;  %8188 = vmatprep.mubr.msk.f32.mxu0 %vm8342_vm1, %v8341_v0 }
0x140d   :  { %8182 = vmatprep.subr.mxu0 %v8341_v0 }
0x140e   :  { %8183 = vmatpush3.msra.mxu0 %v9204_v1 }
0x140f   :  { %8184 = vmatprep.subr.mxu0 %v8341_v0 }
0x1410   :  { %8185 = vmatpush3.msra.mxu0 %v9216_v38 }
0x1411   :  { %8186 = vmatprep.subr.mxu0 %v8341_v0 }
0x1412   :  { %8187 = vmatpush3.msra.mxu0 %v9225_v55 }
0x1413   :  { %8189 = vmatmul.mubr.f32.vlgmr.msra.gmra.mxu0 %v5834_v50  ;;  %7464 = vmatprep.subr.mxu0 %v9862_v53  ;;  %v9903_v50 = vand.u32 4294901760, %v6316_v41 }
0x1414   :  { %7465 = vmatpush3.msra.mxu0 %v9864_v29 }
0x1415   :  { %7466 = vmatprep.subr.mxu0 %v9866_v35 }
0x14b9   :  { %v5931_v15 = vpop.f32.mrf.mxu1 }
0x14bb   :  { %v8157_v27 = vpop.f32.mrf.mxu1 }
0x14c1   :  { %v6088_v51 = vpop.f32.mrf.mxu1 }
0x14c2   :  { %v5840_v10 = vpop.f32.mrf.mxu0 }
0x14c3   :  { %v8179_v16 = vpop.f32.mrf.mxu1  ;;  %v5932_v36 = vadd.f32 %v5931_v15, %v5840_v10 }
0x14c4   :  { %v8146_v26 = vpop.f32.mrf.mxu0  ;;  %v6331_v16 = vld [vmem:[#allocation6 + $0xd8] sm:$0xff] }
0x14c5   :  { %v6315_v26 = vld [vmem:[#allocation6 + $0x58] sm:$0xff] }
0x14ca   :  { %v6011_v56 = vpop.f32.mrf.mxu0 }
0x14cb   :  { %v6246_v17 = vpop.f32.mrf.mxu1  ;;  %v6012_v4 = vadd.f32 %v6011_v56, %v5932_v36  ;;  %v6330_v56 = vld [vmem:[#allocation6 + $0xd0] sm:$0xff]  ;;  %v6460_v36 = vand.u32 4294901760, %v6459_v25 }
0x14cc   :  { %v8168_v33 = vpop.f32.mrf.mxu0 }
0x14cd   :  { %v8201_v1 = vpop.f32.mrf.mxu1  ;;  %v6089_v49 = vadd.f32 %v6088_v51, %v6012_v4  ;;  %v6585_v51 = vsub.f32 %v9890_v34, %v10402_v31  ;;  %v6579_v33 = vand.u32 4294901760, %v6578_v21  ;;  %v6314_v4 = vld [vmem:[#allocation6 + $0x50] sm:$0xff] }
0x14d3   :  { %v6171_v59 = vpop.f32.mrf.mxu0 }
0x14d4   :  { %v6172_v38 = vadd.f32 %v6171_v59, %v6089_v49  ;;  %v6329_v49 = vld [vmem:[#allocation6 + $0xc8] sm:$0xff] }
0x14d5   :  { %v8190_v52 = vpop.f32.mrf.mxu0 }
0x14d6   :  { %v6247_v0 = vadd.f32 %v6246_v17, %v6172_v38  ;;  %v6572_v17 = vand.u32 4294901760, %v6571_v60  ;;  %v6586_v38 = vand.u32 4294901760, %v6585_v51  ;;  %v6312_v51 = vld [vmem:[#allocation6 + $0x40] sm:$0xff] }
0x14d8   :  { %6251 = vrot.lane.b32.xlu0 %v6247_v0, %s8345_s22  ;;  %v6261_v55 = vadd.f32 %v6247_v0, %v9354_v9  ;;  %7499 = vmatprep.subr.mxu1 %v6572_v17  ;;  %v9937_v0 = vsub.f32 %v6316_v41, %v9903_v50 }
0x14d9   :  { %7500 = vmatpush3.msra.mxu1 %v6460_v36 }
0x14da   :  { %6263 = vrot.lane.b32.xlu1 %v6261_v55, %s8344_s2  ;;  %v9939_v55 = vand.u32 4294901760, %v6331_v16  ;;  %7501 = vmatprep.subr.mxu1 %v6579_v33 }
0x14dc   :  { %v9953_v44 = vsub.f32 %v6331_v16, %v9939_v55 }
0x154a   :  { %v6252_v7 = vpop.permute.xlu0 %6251 }
0x154b   :  { %v6254_v43 = vadd.f32 %v6252_v7, %v9352_v14  ;;  %v9941_v7 = vand.u32 4294901760, %v6315_v26 }
0x154c   :  { %v6264_v61 = vpop.permute.xlu1 %6263 }
0x154d   :  { %v7222_v18 = vmul.f32 -1.442695, %v6254_v43  ;;  %v6313_v43 = vld [vmem:[#allocation6 + $0x48] sm:$0xff]  ;;  %v9956_v12 = vsub.f32 %v6315_v26, %v9941_v7 }
0x154f   :  { %8264 = vpow2.f32 %v7222_v18  ;;  %v10395_v41 = vand.u32 4294901760, %v9956_v12 }
0x1551   :  { %v6487_v26 = vsub.f32 %v9956_v12, %v10395_v41 }
0x155c   :  { %v8265_v8 = vpop.eup %8264 }
0x155d   :  { %v6258_v48 = vadd.f32 1.0, %v8265_v8  ;;  %v9943_v8 = vand.u32 4294901760, %v6330_v56 }
0x155f   :  { %8266 = vrcp.f32 %v6258_v48  ;;  %v9945_v48 = vand.u32 4294901760, %v6314_v4  ;;  %v9959_v28 = vsub.f32 %v6330_v56, %v9943_v8 }
0x1561   :  { %v10394_v25 = vand.u32 4294901760, %v9959_v28 }
0x1563   :  { %v6606_v17 = vsub.f32 %v9959_v28, %v10394_v25 }
0x156c   :  { %v9851_v54 = vpop.eup %8266 }
0x156d   :  { %v6266_v40 = vmul.f32 %v9851_v54, %v6264_v61  ;;  %v9947_v61 = vand.u32 4294901760, %v6329_v49 }
0x156f   :  { %6268 = vrot.lane.b32.xlu0 %v6266_v40, %s8343_s20  ;;  %v6328_v40 = vld [vmem:[#allocation6 + $0xc0] sm:$0xff]  ;;  %v9965_v24 = vsub.f32 %v6329_v49, %v9947_v61  ;;  %v6327_v49 = vld [vmem:[#allocation6 + $0xb8] sm:$0xff] }
0x1570   :  { %v9975_v60 = vand.u32 4294901760, %v6328_v40 }
0x1572   :  { %v9992_v56 = vsub.f32 %v6328_v40, %v9975_v60  ;;  %v10007_v40 = vand.u32 4294901760, %v6312_v51 }
0x1573   :  { %6279 = vrot.lane.b32.xlu0 %v9804_v62, %s8344_s2 }
0x1574   :  { %10461 = vst [vmem:[#allocation10_spill] sm:$0xff] %v9992_v56 }
0x1577   :  { %6284 = vrot.lane.b32.xlu0 %v9436_v58, %s8345_s22  ;;  %v9868_v58 = vand.u32 4294901760, %v6318_v22 }
0x1579   :  { %v9887_v45 = vsub.f32 %v6318_v22, %v9868_v58  ;;  %7467 = vmatpush3.msra.mxu0 %v9868_v58  ;;  %v9962_v22 = vsub.f32 %v6314_v4, %v9945_v48 }
0x157a   :  { %7468 = vmatprep.subr.mxu0 %v9870_v23 }
0x157b   :  { %6287 = vrot.lane.b32.xlu0 %v9585_v46, %s8345_s22  ;;  %v9872_v46 = vand.u32 4294901760, %v6317_v57  ;;  %v10403_v62 = vand.u32 4294901760, %v9887_v45  ;;  %v10392_v21 = vand.u32 4294901760, %v9962_v22 }
0x157d   :  { %v9893_v63 = vsub.f32 %v6317_v57, %v9872_v46  ;;  %v6466_v27 = vsub.f32 %v9887_v45, %v10403_v62  ;;  %7469 = vmatpush3.msra.mxu0 %v9872_v46  ;;  %v6494_v36 = vsub.f32 %v9962_v22, %v10392_v21  ;;  %v6607_v21 = vand.u32 4294901760, %v6606_v17  ;;  %v6309_v17 = vld [vmem:[#allocation6 + $0x28] sm:$0xff]  ;;  %v6308_v62 = vld [vmem:[#allocation6 + $0x20] sm:$0xff] }
0x157f   :  { %v10401_v11 = vand.u32 4294901760, %v9893_v63  ;;  %v6467_v59 = vand.u32 4294901760, %v6466_v27 }
0x1581   :  { %v6473_v10 = vsub.f32 %v9893_v63, %v10401_v11  ;;  %7502 = vmatpush3.msra.mxu1 %v6467_v59  ;;  %v6311_v59 = vld [vmem:[#allocation6 + $0x38] sm:$0xff] }
0x1582   :  { %7503 = vmatprep.subr.mxu1 %v6586_v38  ;;  %v6326_v38 = vld [vmem:[#allocation6 + $0xb0] sm:$0xff] }
0x1583   :  { %v6474_v18 = vand.u32 4294901760, %v6473_v10 }
0x1585   :  { %7504 = vmatpush3.msra.mxu1 %v6474_v18  ;;  %v10399_v18 = vand.u32 4294901760, %v9992_v56 }
0x15e1   :  { %v6269_v9 = vpop.permute.xlu0 %6268 }
0x15e2   :  { %v6271_v42 = vadd.f32 %v6269_v9, %v9352_v14  ;;  %v6332_v14 = vld [vmem:[#allocation6 + $0xe0] sm:$0xff] }
0x15e3   :  { %v9883_v39 = vand.u32 4294901760, %v6332_v14 }
0x15e4   :  { %8268 = vtanh.f32 %v6271_v42  ;;  %v10398_v42 = vand.u32 4294901760, %v9937_v0 }
0x15e5   :  { %v9916_v19 = vsub.f32 %v6332_v14, %v9883_v39  ;;  %7470 = vmatprep.subr.mxu0 %v9883_v39  ;;  %v10396_v14 = vand.u32 4294901760, %v9953_v44 }
0x15e6   :  { %7471 = vmatpush3.msra.mxu0 %v9903_v50  ;;  %v6480_v57 = vsub.f32 %v9937_v0, %v10398_v42  ;;  %v6324_v42 = vld [vmem:[#allocation6 + $0xa0] sm:$0xff] }
0x15e7   :  { %v10400_v1 = vand.u32 4294901760, %v9916_v19  ;;  %7472 = vmatprep.subr.mxu0 %v9939_v55  ;;  %v6599_v16 = vsub.f32 %v9953_v44, %v10396_v14  ;;  %v10022_v14 = vand.u32 4294901760, %v6311_v59 }
0x15e8   :  { %7473 = vmatpush3.msra.mxu0 %v9941_v7  ;;  %v6481_v10 = vand.u32 4294901760, %v6480_v57  ;;  %v6325_v57 = vld [vmem:[#allocation6 + $0xa8] sm:$0xff] }
0x15e9   :  { %v6592_v52 = vsub.f32 %v9916_v19, %v10400_v1  ;;  %7474 = vmatprep.subr.mxu0 %v9943_v8  ;;  %v10036_v11 = vsub.f32 %v6311_v59, %v10022_v14 }
0x15ea   :  { %7475 = vmatpush3.msra.mxu0 %v9945_v48 }
0x15eb   :  { %v6593_v9 = vand.u32 4294901760, %v6592_v52  ;;  %7476 = vmatprep.subr.mxu0 %v9947_v61  ;;  %v6600_v52 = vand.u32 4294901760, %v6599_v16  ;;  %v10018_v16 = vsub.f32 %v6312_v51, %v10007_v40  ;;  %10464 = vst [vmem:[#allocation13_spill] sm:$0xff] %v10036_v11  ;;  %v10408_v59 = vand.u32 4294901760, %v10036_v11 }
0x15ed   :  { %7505 = vmatprep.subr.mxu1 %v6593_v9  ;;  %v6310_v9 = vld [vmem:[#allocation6 + $0x30] sm:$0xff]  ;;  %10462 = vst [vmem:[#allocation11_spill] sm:$0xff] %v10018_v16  ;;  %v10404_v51 = vand.u32 4294901760, %v10018_v16 }
0x15ee   :  { %7506 = vmatpush3.msra.mxu1 %v6481_v10  ;;  %v6620_v10 = vsub.f32 %v9992_v56, %v10399_v18 }
0x15ef   :  { %7507 = vmatprep.subr.mxu1 %v6600_v52  ;;  %v10029_v52 = vand.u32 4294901760, %v6325_v57 }
0x15f0   :  { %v6621_v18 = vand.u32 4294901760, %v6620_v10  ;;  %v10048_v10 = vand.u32 4294901760, %v6309_v17 }
0x15f1   :  { %v8269_v15 = vpop.eup %8268 }
0x15f2   :  { %6275 = vrot.lane.b32.xlu1 %v8269_v15, %s8344_s2  ;;  %v10393_v15 = vand.u32 4294901760, %v9965_v24  ;;  %10468 = vst [vmem:[#allocation17_spill] sm:$0xff] %v10048_v10 }
0x15f4   :  { %v6613_v33 = vsub.f32 %v9965_v24, %v10393_v15  ;;  %v6495_v15 = vand.u32 4294901760, %v6494_v36 }
0x15f6   :  { %6290 = vrot.lane.b32.xlu1 %v9732_v13, %s8345_s22  ;;  %v9967_v13 = vand.u32 4294901760, %v6313_v43  ;;  %v6614_v25 = vand.u32 4294901760, %v6613_v33  ;;  %v10025_v33 = vand.u32 4294901760, %v6326_v38 }
0x15f8   :  { %v9982_v27 = vsub.f32 %v6313_v43, %v9967_v13  ;;  %v6488_v43 = vand.u32 4294901760, %v6487_v26  ;;  %7477 = vmatpush3.msra.mxu0 %v9967_v13  ;;  %v10020_v26 = vand.u32 4294901760, %v6327_v49 }
0x15f9   :  { %7478 = vmatprep.subr.mxu0 %v9975_v60 }
0x15fa   :  { %v10397_v4 = vand.u32 4294901760, %v9982_v27  ;;  %7479 = vmatpush3.msra.mxu0 %v10007_v40  ;;  %7508 = vmatpush3.msra.mxu1 %v6488_v43  ;;  %v10033_v1 = vsub.f32 %v6327_v49, %v10020_v26  ;;  %v6508_v49 = vsub.f32 %v10018_v16, %v10404_v51  ;;  %v6306_v16 = vld [vmem:[#allocation6 + $0x10] sm:$0xff] }
0x15fb   :  { %7509 = vmatprep.subr.mxu1 %v6607_v21  ;;  %7480 = vmatprep.subr.mxu0 %v10020_v26  ;;  %v10046_v21 = vsub.f32 %v6325_v57, %v10029_v52 }
0x15fc   :  { %v6501_v41 = vsub.f32 %v9982_v27, %v10397_v4  ;;  %v10027_v4 = vand.u32 4294901760, %v6310_v9  ;;  %10463 = vst [vmem:[#allocation12_spill] sm:$0xff] %v10033_v1  ;;  %7510 = vmatpush3.msra.mxu1 %v6495_v15  ;;  %7481 = vmatpush3.msra.mxu0 %v10022_v14  ;;  %v10407_v15 = vand.u32 4294901760, %v10033_v1  ;;  %v6509_v51 = vand.u32 4294901760, %v6508_v49 }
0x15fd   :  { %10467 = vst [vmem:[#allocation16_spill] sm:$0xff] %v10046_v21  ;;  %7511 = vmatprep.subr.mxu1 %v6614_v25  ;;  %7482 = vmatprep.subr.mxu0 %v10025_v33  ;;  %v10422_v31 = vand.u32 4294901760, %v10046_v21  ;;  %v10063_v25 = vsub.f32 %v6309_v17, %v10048_v10 }
0x15fe   :  { %v6502_v36 = vand.u32 4294901760, %v6501_v41  ;;  %v10040_v41 = vsub.f32 %v6326_v38, %v10025_v33  ;;  %v10043_v43 = vsub.f32 %v6310_v9, %v10027_v4  ;;  %v10056_v38 = vand.u32 4294901760, %v6324_v42  ;;  %7483 = vmatpush3.msra.mxu0 %v10027_v4 }
0x15ff   :  { %10469 = vst [vmem:[#allocation18_spill] sm:$0xff] %v10063_v25  ;;  %v6627_v3 = vsub.f32 %v10033_v1, %v10407_v15  ;;  %7484 = vmatprep.subr.mxu0 %v10029_v52  ;;  %v6641_v49 = vsub.f32 %v10046_v21, %v10422_v31  ;;  %v10429_v15 = vand.u32 4294901760, %v10063_v25 }
0x1600   :  { %10465 = vst [vmem:[#allocation14_spill] sm:$0xff] %v10040_v41  ;;  %10466 = vst [vmem:[#allocation15_spill] sm:$0xff] %v10043_v43  ;;  %7512 = vmatpush3.msra.mxu1 %v6502_v36  ;;  %v10414_v9 = vand.u32 4294901760, %v10040_v41  ;;  %v10419_v57 = vand.u32 4294901760, %v10043_v43  ;;  %v6515_v36 = vsub.f32 %v10036_v11, %v10408_v59  ;;  %v10073_v6 = vsub.f32 %v6324_v42, %v10056_v38  ;;  %v6323_v59 = vld [vmem:[#allocation6 + $0x98] sm:$0xff]  ;;  %v6322_v42 = vld [vmem:[#allocation6 + $0x90] sm:$0xff] }
0x1601   :  { %7513 = vmatprep.subr.mxu1 %v6621_v18  ;;  %7485 = vmatpush3.msra.mxu0 %v10048_v10  ;;  %v6628_v11 = vand.u32 4294901760, %v6627_v3  ;;  %v6642_v21 = vand.u32 4294901760, %v6641_v49  ;;  %v6529_v56 = vsub.f32 %v10063_v25, %v10429_v15  ;;  %v10102_v10 = vand.u32 4294901760, %v6307_v30 }
0x1602   :  { %10470 = vst [vmem:[#allocation19_spill] sm:$0xff] %v10073_v6  ;;  %v6634_v17 = vsub.f32 %v10040_v41, %v10414_v9  ;;  %v6522_v18 = vsub.f32 %v10043_v43, %v10419_v57  ;;  %7514 = vmatpush3.msra.mxu1 %v6509_v51  ;;  %v6516_v1 = vand.u32 4294901760, %v6515_v36  ;;  %v10430_v9 = vand.u32 4294901760, %v10073_v6  ;;  %v6321_v57 = vld [vmem:[#allocation6 + $0x88] sm:$0xff]  ;;  %7486 = vmatprep.subr.mxu0 %v10056_v38 }
0x1603   :  { %v10088_v41 = vand.u32 4294901760, %v6308_v62  ;;  %7515 = vmatprep.subr.mxu1 %v6628_v11  ;;  %v10100_v36 = vand.u32 4294901760, %v6323_v59  ;;  %v10107_v49 = vand.u32 4294901760, %v6306_v16  ;;  %v10109_v11 = vand.u32 4294901760, %v6321_v57 }
0x1604   :  { %v6635_v43 = vand.u32 4294901760, %v6634_v17  ;;  %v6523_v31 = vand.u32 4294901760, %v6522_v18  ;;  %v6648_v3 = vsub.f32 %v10073_v6, %v10430_v9  ;;  %7516 = vmatpush3.msra.mxu1 %v6516_v1  ;;  %v6530_v17 = vand.u32 4294901760, %v6529_v56 }
0x1605   :  { %v10098_v51 = vsub.f32 %v6308_v62, %v10088_v41  ;;  %7487 = vmatpush3.msra.mxu0 %v10088_v41  ;;  %v10105_v18 = vand.u32 4294901760, %v6322_v42  ;;  %v10113_v62 = vsub.f32 %v6323_v59, %v10100_v36  ;;  %v10116_v6 = vsub.f32 %v6307_v30, %v10102_v10 }
0x1606   :  { %7517 = vmatprep.subr.mxu1 %v6635_v43  ;;  %v6649_v15 = vand.u32 4294901760, %v6648_v3  ;;  %7488 = vmatprep.subr.mxu0 %v10100_v36  ;;  %v10123_v56 = vsub.f32 %v6306_v16, %v10107_v49  ;;  %v10126_v43 = vsub.f32 %v6321_v57, %v10109_v11 }
0x1607   :  { %10471 = vst [vmem:[#allocation20_spill] sm:$0xff] %v10098_v51  ;;  %v10433_v9 = vand.u32 4294901760, %v10098_v51  ;;  %10472 = vst [vmem:[#allocation21_spill] sm:$0xff] %v10113_v62  ;;  %7518 = vmatpush3.msra.mxu1 %v6523_v31  ;;  %v10120_v1 = vsub.f32 %v6322_v42, %v10105_v18  ;;  %7489 = vmatpush3.msra.mxu0 %v10102_v10  ;;  %v10434_v59 = vand.u32 4294901760, %v10113_v62  ;;  %v10441_v31 = vand.u32 4294901760, %v10116_v6 }
0x1608   :  { %10473 = vst [vmem:[#allocation22_spill] sm:$0xff] %v10116_v6  ;;  %10475 = vst [vmem:[#allocation24_spill] sm:$0xff] %v10123_v56  ;;  %7519 = vmatprep.subr.mxu1 %v6642_v21  ;;  %7490 = vmatprep.subr.mxu0 %v10105_v18  ;;  %v10447_v42 = vand.u32 4294901760, %v10123_v56 }
0x1609   :  { %10474 = vst [vmem:[#allocation23_spill] sm:$0xff] %v10120_v1  ;;  %v6536_v30 = vsub.f32 %v10098_v51, %v10433_v9  ;;  %7520 = vmatpush3.msra.mxu1 %v6530_v17  ;;  %v10442_v16 = vand.u32 4294901760, %v10120_v1  ;;  %7491 = vmatpush3.msra.mxu0 %v10107_v49  ;;  %v6655_v3 = vsub.f32 %v10113_v62, %v10434_v59 }
0x160a   :  { %7521 = vmatprep.subr.mxu1 %v6649_v15  ;;  %v6543_v9 = vsub.f32 %v10116_v6, %v10441_v31  ;;  %7492 = vmatprep.subr.mxu0 %v10109_v11  ;;  %v6550_v57 = vsub.f32 %v10123_v56, %v10447_v42  ;;  %v10476_v15 = vand.u32 4294901760, %v10126_v43  ;;  %v6320_v6 = vld [vmem:[#allocation6 + $0x80] sm:$0xff] }
0x160b   :  { %v6537_v21 = vand.u32 4294901760, %v6536_v30  ;;  %v6662_v17 = vsub.f32 %v10120_v1, %v10442_v16  ;;  %v6656_v59 = vand.u32 4294901760, %v6655_v3  ;;  %v6305_v16 = vld [vmem:[#allocation6 + $0x8] sm:$0xff]  ;;  %v10157_v42 = vand.u32 4294901760, %v6320_v6  ;;  %v6304_v56 = vld [vmem:[#allocation6] sm:$0xff] }
0x160c   :  { %v6669_v30 = vsub.f32 %v10126_v43, %v10476_v15  ;;  %v6544_v62 = vand.u32 4294901760, %v6543_v9  ;;  %v6551_v25 = vand.u32 4294901760, %v6550_v57  ;;  %v10155_v1 = vand.u32 4294901760, %v6305_v16 }
0x160d   :  { %7522 = vmatpush3.msra.mxu1 %v6537_v21  ;;  %v6663_v51 = vand.u32 4294901760, %v6662_v17  ;;  %v10162_v21 = vand.u32 4294901760, %v6304_v56  ;;  %v10166_v9 = vsub.f32 %v6320_v6, %v10157_v42  ;;  %v6280_v17 = vpop.permute.xlu0 %6279 }
0x160e   :  { %7523 = vmatprep.subr.mxu1 %v6656_v59  ;;  %v6670_v31 = vand.u32 4294901760, %v6669_v30  ;;  %v10160_v15 = vsub.f32 %v6305_v16, %v10155_v1  ;;  %7493 = vmatpush3.msra.mxu0 %v10155_v1  ;;  %v6273_v30 = vsub.f32 1.0, %v9851_v54 }
0x160f   :  { %7524 = vmatpush3.msra.mxu1 %v6544_v62  ;;  %7494 = vmatprep.subr.mxu0 %v10157_v42  ;;  %v10454_v62 = vand.u32 4294901760, %v10166_v9 }
0x1610   :  { %7525 = vmatprep.subr.mxu1 %v6663_v51  ;;  %10477 = vst [vmem:[#allocation25_spill] sm:$0xff] %v10160_v15  ;;  %v10171_v51 = vsub.f32 %v6304_v56, %v10162_v21  ;;  %7495 = vmatpush3.msra.mxu0 %v10162_v21 }
0x1611   :  { %7526 = vmatpush3.msra.mxu1 %v6551_v25  ;;  %v10450_v25 = vand.u32 4294901760, %v10160_v15  ;;  %7534 = vmatprep.subr.mxu0 %v9875_v32  ;;  %v6282_v32 = vmul.f32 %v9851_v54, %v6280_v17 }
0x1612   :  { %7527 = vmatprep.subr.mxu1 %v6670_v31  ;;  %v10455_v6 = vand.u32 4294901760, %v10171_v51  ;;  %v6676_v31 = vsub.f32 %v10166_v9, %v10454_v62 }
0x1613   :  { %v6557_v59 = vsub.f32 %v10160_v15, %v10450_v25 }
0x1614   :  { %v6564_v56 = vsub.f32 %v10171_v51, %v10455_v6  ;;  %v6677_v57 = vand.u32 4294901760, %v6676_v31 }
0x1615   :  { %v6558_v16 = vand.u32 4294901760, %v6557_v59  ;;  %v6285_v59 = vpop.permute.xlu0 %6284 }
0x1616   :  { %v6565_v3 = vand.u32 4294901760, %v6564_v56  ;;  %v6297_v31 = vsel %vm2103_vm2, %v9363_v20, %v6285_v59 }
0x1617   :  { %7528 = vmatpush3.msra.mxu1 %v6558_v16  ;;  %v6298_v56 = vsel %vm148_vm0, %v6297_v31, %v9582_v47 }
0x1618   :  { %7529 = vmatprep.subr.mxu1 %v6677_v57 }
0x1619   :  { %7530 = vmatpush3.msra.mxu1 %v6565_v3  ;;  %v6288_v16 = vpop.permute.xlu0 %6287 }
0x161a   :  { %7569 = vmatprep.subr.mxu1 %v9862_v53  ;;  %v6300_v57 = vsel %vm6299_vm3, %v6298_v56, %v6288_v16  ;;  %v10479_v56 = vld [vmem:[#allocation17_spill] sm:$0xff] }
0x161b   :  { %v10194_v6 = vand.u32 4294901760, %v6300_v57 }
0x161d   :  { %10478 = vst [vmem:[#allocation26_spill] sm:$0xff] %v10194_v6 }
0x1664   :  { %v6276_v25 = vpop.permute.xlu1 %6275 }
0x1665   :  { %v6278_v15 = vmul.f32 %v6276_v25, %v6273_v30 }
0x1667   :  { %v6283_v62 = vadd.f32 %v6282_v32, %v6278_v15  ;;  %v10199_v32 = vsub.f32 %v6300_v57, %v10194_v6  ;;  %v10480_v57 = vld [vmem:[#allocation10_spill] sm:$0xff] }
0x1668   :  { %v6291_v3 = vpop.permute.xlu1 %6290 }
0x1669   :  { %6294 = vrot.lane.b32.xlu1 %v6283_v62, %s8345_s22  ;;  %v6301_v54 = vsel %vm2103_vm2, %v9659_v37, %v6291_v3  ;;  %v6447_v30 = vand.u32 4294901760, %v10199_v32  ;;  %v10481_v3 = vld [vmem:[#allocation11_spill] sm:$0xff] }
0x166a   :  { %v6302_v25 = vsel %vm148_vm0, %v6301_v54, %v6280_v17  ;;  %v10482_v54 = vld [vmem:[#allocation12_spill] sm:$0xff] }
0x166b   :  { %v6448_v59 = vsub.f32 %v10199_v32, %v6447_v30 }
0x166d   :  { %v6449_v16 = vand.u32 4294901760, %v6448_v59  ;;  %v10488_v59 = vld [vmem:[#allocation19_spill] sm:$0xff] }
0x16db   :  { %v6295_v15 = vpop.permute.xlu1 %6294 }
0x16dc   :  { %v6303_v62 = vsel %vm6299_vm3, %v6302_v25, %v6295_v15  ;;  %v10483_v15 = vld [vmem:[#allocation13_spill] sm:$0xff]  ;;  %v10484_v25 = vld [vmem:[#allocation14_spill] sm:$0xff] }
0x16dd   :  { %v10202_v20 = vand.u32 4294901760, %v6303_v62 }
0x16df   :  { %v6440_v47 = vsub.f32 %v6303_v62, %v10202_v20  ;;  %6680 = vmatprep.mubr.f32.mxu1 %v10202_v20  ;;  %v10485_v62 = vld [vmem:[#allocation15_spill] sm:$0xff] }
0x16e0   :  { %6682 = vmatmul.mubr.f32.vlgmr.msra.gmra.mxu1 %v10194_v6  ;;  %v10492_v6 = vld [vmem:[#allocation23_spill] sm:$0xff] }
0x16e1   :  { %7570 = vmatpush3.msra.mxu1 %v9864_v29  ;;  %v6441_v37 = vand.u32 4294901760, %v6440_v47 }
0x16e2   :  { %7571 = vmatprep.subr.mxu1 %v9866_v35 }
0x16e3   :  { %7572 = vmatpush3.msra.mxu1 %v9868_v58  ;;  %6924 = vmatprep.mubr.f32.mxu1 %v6441_v37  ;;  %v6442_v17 = vsub.f32 %v6440_v47, %v6441_v37  ;;  %v10487_v37 = vld [vmem:[#allocation18_spill] sm:$0xff] }
0x16e4   :  { %7573 = vmatprep.subr.mxu1 %v9870_v23 }
0x16e5   :  { %7574 = vmatpush3.msra.mxu1 %v9872_v46  ;;  %v6443_v31 = vand.u32 4294901760, %v6442_v17  ;;  %v10489_v17 = vld [vmem:[#allocation20_spill] sm:$0xff] }
0x16e6   :  { %7575 = vmatprep.subr.mxu1 %v9883_v39 }
0x16e7   :  { %7576 = vmatpush3.msra.mxu1 %v9903_v50  ;;  %6444 = vmatprep.mubr.f32.mxu0 %v6443_v31  ;;  %v10490_v31 = vld [vmem:[#allocation21_spill] sm:$0xff] }
0x16e8   :  { %7577 = vmatprep.subr.mxu1 %v9939_v55  ;;  %6450 = vmatmul.mubr.f32.vlgmr.msra.gmra.mxu0 %v6449_v16  ;;  %v10491_v16 = vld [vmem:[#allocation22_spill] sm:$0xff] }
0x16e9   :  { %7535 = vmatpush3.msra.mxu0 %v9878_v5  ;;  %7578 = vmatpush3.msra.mxu1 %v9941_v7 }
0x16ea   :  { %7536 = vmatprep.subr.mxu0 %v9881_v2  ;;  %6817 = vmatprep.mubr.f32.mxu0 %v6440_v47  ;;  %v10486_v47 = vld [vmem:[#allocation16_spill] sm:$0xff] }
0x16eb   :  { %7579 = vmatprep.subr.mxu1 %v9943_v8  ;;  %7537 = vmatpush3.msra.mxu0 %v9887_v45 }
0x16ec   :  { %7580 = vmatpush3.msra.mxu1 %v9945_v48  ;;  %7538 = vmatprep.subr.mxu0 %v9890_v34 }
0x16ed   :  { %7581 = vmatprep.subr.mxu1 %v9947_v61  ;;  %7539 = vmatpush3.msra.mxu0 %v9893_v63 }
0x16ee   :  { %7582 = vmatpush3.msra.mxu1 %v9967_v13  ;;  %7540 = vmatprep.subr.mxu0 %v9916_v19 }
0x16ef   :  { %7583 = vmatprep.subr.mxu1 %v9975_v60  ;;  %7541 = vmatpush3.msra.mxu0 %v9937_v0 }
0x16f0   :  { %7584 = vmatpush3.msra.mxu1 %v10007_v40  ;;  %7542 = vmatprep.subr.mxu0 %v9953_v44 }
0x16f1   :  { %7585 = vmatprep.subr.mxu1 %v10020_v26  ;;  %7543 = vmatpush3.msra.mxu0 %v9956_v12 }
0x16f2   :  { %7586 = vmatpush3.msra.mxu1 %v10022_v14  ;;  %7544 = vmatprep.subr.mxu0 %v9959_v28 }
0x16f3   :  { %7587 = vmatprep.subr.mxu1 %v10025_v33  ;;  %7545 = vmatpush3.msra.mxu0 %v9962_v22 }
0x16f4   :  { %7588 = vmatpush3.msra.mxu1 %v10027_v4  ;;  %7546 = vmatprep.subr.mxu0 %v9965_v24 }
0x16f5   :  { %7589 = vmatprep.subr.mxu1 %v10029_v52  ;;  %7547 = vmatpush3.msra.mxu0 %v9982_v27 }
0x16f6   :  { %7590 = vmatpush3.msra.mxu1 %v10479_v56  ;;  %7548 = vmatprep.subr.mxu0 %v10480_v57 }
0x16f7   :  { %7591 = vmatprep.subr.mxu1 %v10056_v38  ;;  %7549 = vmatpush3.msra.mxu0 %v10481_v3 }
0x16f8   :  { %7592 = vmatpush3.msra.mxu1 %v10088_v41  ;;  %7550 = vmatprep.subr.mxu0 %v10482_v54 }
0x16f9   :  { %7593 = vmatprep.subr.mxu1 %v10100_v36  ;;  %7551 = vmatpush3.msra.mxu0 %v10483_v15 }
0x16fa   :  { %7594 = vmatpush3.msra.mxu1 %v10102_v10  ;;  %7552 = vmatprep.subr.mxu0 %v10484_v25 }
0x16fb   :  { %7595 = vmatprep.subr.mxu1 %v10105_v18  ;;  %7553 = vmatpush3.msra.mxu0 %v10485_v62 }
0x16fc   :  { %7596 = vmatpush3.msra.mxu1 %v10107_v49  ;;  %7554 = vmatprep.subr.mxu0 %v10486_v47 }
0x16fd   :  { %7597 = vmatprep.subr.mxu1 %v10109_v11  ;;  %7555 = vmatpush3.msra.mxu0 %v10487_v37 }
0x16fe   :  { %7598 = vmatpush3.msra.mxu1 %v10155_v1  ;;  %7556 = vmatprep.subr.mxu0 %v10488_v59 }
0x16ff   :  { %7599 = vmatprep.subr.mxu1 %v10157_v42  ;;  %7557 = vmatpush3.msra.mxu0 %v10489_v17  ;;  %v10493_v17 = vld [vmem:[#allocation24_spill] sm:$0xff] }
0x1700   :  { %7600 = vmatpush3.msra.mxu1 %v10162_v21  ;;  %7558 = vmatprep.subr.mxu0 %v10490_v31 }
0x1701   :  { %6928 = vmatmul.mubr.f32.vlgmr.msra.gmra.mxu1 %v6447_v30  ;;  %7639 = vmatprep.subr.mxu1 %v9862_v53  ;;  %v10494_v30 = vld [vmem:[#allocation25_spill] sm:$0xff] }
0x1702   :  { %7559 = vmatpush3.msra.mxu0 %v10491_v16  ;;  %7640 = vmatpush3.msra.mxu1 %v9864_v29  ;;  %v10495_v53 = vld [vmem:[#allocation9_spill] sm:$0xff] }
0x1703   :  { %7198 = vmatprep.mubr.f32.mxu1 %v10202_v20  ;;  %7560 = vmatprep.subr.mxu0 %v10492_v6  ;;  %v10496_v29 = vand.u32 4294901760, %v10495_v53 }
0x1704   :  { %7641 = vmatprep.subr.mxu1 %v9866_v35  ;;  %7561 = vmatpush3.msra.mxu0 %v10493_v17  ;;  %v10497_v35 = vand.u32 4294901760, %v9878_v5  ;;  %v10501_v5 = vand.u32 4294901760, %v9893_v63  ;;  %v10506_v63 = vand.u32 4294901760, %v9959_v28  ;;  %v10517_v28 = vand.u32 4294901760, %v10487_v37 }
0x1705   :  { %7642 = vmatpush3.msra.mxu1 %v9868_v58  ;;  %7562 = vmatprep.subr.mxu0 %v10126_v43  ;;  %v10498_v58 = vand.u32 4294901760, %v9881_v2  ;;  %v10502_v2 = vand.u32 4294901760, %v9916_v19  ;;  %v10508_v19 = vand.u32 4294901760, %v9965_v24  ;;  %v10519_v24 = vld [vmem:[#allocation20_spill] sm:$0xff] }
0x1706   :  { %7643 = vmatprep.subr.mxu1 %v9870_v23  ;;  %7563 = vmatpush3.msra.mxu0 %v10494_v30  ;;  %v10499_v23 = vand.u32 4294901760, %v9887_v45  ;;  %v10504_v45 = vand.u32 4294901760, %v9953_v44  ;;  %v10515_v44 = vand.u32 4294901760, %v10485_v62 }
0x1707   :  { %7644 = vmatpush3.msra.mxu1 %v9872_v46  ;;  %7564 = vmatprep.subr.mxu0 %v10166_v9  ;;  %v10500_v46 = vand.u32 4294901760, %v9890_v34  ;;  %v10505_v34 = vand.u32 4294901760, %v9956_v12  ;;  %v10516_v12 = vand.u32 4294901760, %v10486_v47 }
0x1708   :  { %7645 = vmatprep.subr.mxu1 %v9883_v39  ;;  %7565 = vmatpush3.msra.mxu0 %v10171_v51  ;;  %v10503_v39 = vand.u32 4294901760, %v9937_v0  ;;  %v10509_v0 = vand.u32 4294901760, %v9982_v27  ;;  %v10523_v27 = vand.u32 4294901760, %v10491_v16 }
0x1709   :  { %7646 = vmatpush3.msra.mxu1 %v9903_v50  ;;  %6820 = vmatmul.mubr.f32.vlgmr.msra.gmra.mxu0 %v10199_v32  ;;  %v10507_v50 = vand.u32 4294901760, %v9962_v22  ;;  %v10518_v22 = vand.u32 4294901760, %v10488_v59 }
0x170a   :  { %7604 = vmatprep.subr.mxu0 %v10496_v29  ;;  %7647 = vmatprep.subr.mxu1 %v9939_v55  ;;  %v10510_v55 = vand.u32 4294901760, %v10480_v57 }
0x170b   :  { %7605 = vmatpush3.msra.mxu0 %v10497_v35  ;;  %7094 = vmatprep.mubr.f32.mxu0 %v10202_v20 }
0x170c   :  { %7648 = vmatpush3.msra.mxu1 %v9941_v7  ;;  %7606 = vmatprep.subr.mxu0 %v10498_v58  ;;  %v10511_v7 = vand.u32 4294901760, %v10481_v3 }
0x170d   :  { %7649 = vmatprep.subr.mxu1 %v9943_v8  ;;  %7607 = vmatpush3.msra.mxu0 %v10499_v23  ;;  %v10512_v8 = vand.u32 4294901760, %v10482_v54 }
0x170e   :  { %7650 = vmatpush3.msra.mxu1 %v9945_v48  ;;  %7608 = vmatprep.subr.mxu0 %v10500_v46  ;;  %v10513_v48 = vand.u32 4294901760, %v10483_v15 }
0x170f   :  { %7651 = vmatprep.subr.mxu1 %v9947_v61  ;;  %7609 = vmatpush3.msra.mxu0 %v10501_v5  ;;  %v10514_v61 = vand.u32 4294901760, %v10484_v25 }
0x1710   :  { %7652 = vmatpush3.msra.mxu1 %v9967_v13  ;;  %7610 = vmatprep.subr.mxu0 %v10502_v2  ;;  %v10520_v13 = vand.u32 4294901760, %v10519_v24 }
0x1711   :  { %7653 = vmatprep.subr.mxu1 %v9975_v60  ;;  %7611 = vmatpush3.msra.mxu0 %v10503_v39  ;;  %v10522_v60 = vld [vmem:[#allocation26_spill] sm:$0xff] }
0x1712   :  { %7654 = vmatpush3.msra.mxu1 %v10007_v40  ;;  %7612 = vmatprep.subr.mxu0 %v10504_v45  ;;  %v10525_v40 = vand.u32 4294901760, %v10493_v17 }
0x1713   :  { %7655 = vmatprep.subr.mxu1 %v10020_v26  ;;  %7613 = vmatpush3.msra.mxu0 %v10505_v34  ;;  %v10526_v26 = vand.u32 4294901760, %v10126_v43 }
0x1714   :  { %7656 = vmatpush3.msra.mxu1 %v10022_v14  ;;  %7614 = vmatprep.subr.mxu0 %v10506_v63  ;;  %v10521_v14 = vand.u32 4294901760, %v10490_v31 }
0x1715   :  { %7657 = vmatprep.subr.mxu1 %v10025_v33  ;;  %7615 = vmatpush3.msra.mxu0 %v10507_v50  ;;  %v10527_v33 = vand.u32 4294901760, %v10494_v30 }
0x1716   :  { %7658 = vmatpush3.msra.mxu1 %v10027_v4  ;;  %7616 = vmatprep.subr.mxu0 %v10508_v19  ;;  %v10524_v4 = vand.u32 4294901760, %v10492_v6 }
0x1717   :  { %7659 = vmatprep.subr.mxu1 %v10029_v52  ;;  %7617 = vmatpush3.msra.mxu0 %v10509_v0  ;;  %v10528_v52 = vand.u32 4294901760, %v10166_v9 }
0x1718   :  { %7660 = vmatpush3.msra.mxu1 %v10479_v56  ;;  %7618 = vmatprep.subr.mxu0 %v10510_v55 }
0x1719   :  { %7661 = vmatprep.subr.mxu1 %v10056_v38  ;;  %7619 = vmatpush3.msra.mxu0 %v10511_v7 }
0x171a   :  { %7662 = vmatpush3.msra.mxu1 %v10088_v41  ;;  %7620 = vmatprep.subr.mxu0 %v10512_v8  ;;  %v10529_v41 = vand.u32 4294901760, %v10171_v51 }
0x171b   :  { %7663 = vmatprep.subr.mxu1 %v10100_v36  ;;  %7621 = vmatpush3.msra.mxu0 %v10513_v48 }
0x171c   :  { %7664 = vmatpush3.msra.mxu1 %v10102_v10  ;;  %7622 = vmatprep.subr.mxu0 %v10514_v61 }
0x171d   :  { %7665 = vmatprep.subr.mxu1 %v10105_v18  ;;  %7623 = vmatpush3.msra.mxu0 %v10515_v44 }
0x171e   :  { %7666 = vmatpush3.msra.mxu1 %v10107_v49  ;;  %7624 = vmatprep.subr.mxu0 %v10516_v12 }
0x171f   :  { %7667 = vmatprep.subr.mxu1 %v10109_v11  ;;  %7625 = vmatpush3.msra.mxu0 %v10517_v28 }
0x1720   :  { %7668 = vmatpush3.msra.mxu1 %v10155_v1  ;;  %7626 = vmatprep.subr.mxu0 %v10518_v22  ;;  %v7223_v1 = vld [vmem:[%s10388_s6] ss:$0 sm:$0xff] }
0x1721   :  { %7669 = vmatprep.subr.mxu1 %v10157_v42  ;;  %7627 = vmatpush3.msra.mxu0 %v10520_v13 }
0x1722   :  { %7670 = vmatpush3.msra.mxu1 %v10162_v21  ;;  %7628 = vmatprep.subr.mxu0 %v10521_v14 }
0x1723   :  { %7200 = vmatmul.mubr.f32.vlgmr.msra.gmra.mxu1 %v10522_v60  ;;  %7629 = vmatpush3.msra.mxu0 %v10523_v27 }
0x1724   :  { %7630 = vmatprep.subr.mxu0 %v10524_v4 }
0x1725   :  { %7631 = vmatpush3.msra.mxu0 %v10525_v40 }
0x1726   :  { %7632 = vmatprep.subr.mxu0 %v10526_v26 }
0x1727   :  { %7633 = vmatpush3.msra.mxu0 %v10527_v33 }
0x1728   :  { %7634 = vmatprep.subr.mxu0 %v10528_v52 }
0x1729   :  { %7635 = vmatpush3.msra.mxu0 %v10529_v41 }
0x172a   :  { %7096 = vmatmul.mubr.f32.vlgmr.msra.gmra.mxu0 %v10522_v60 }
0x17a0   :  { %v7531_v38 = vpop.f32.mrf.mxu1 }
0x17a2   :  { %v7532_v11 = vpop.f32.mrf.mxu1 }
0x17a3   :  { %v7533_v9 = vadd.f32 %v7532_v11, %v7531_v38 }
0x17a8   :  { %v7496_v10 = vpop.f32.mrf.mxu0 }
0x17aa   :  { %v7497_v36 = vpop.f32.mrf.mxu0 }
0x17ab   :  { %v7498_v49 = vadd.f32 %v7497_v36, %v7496_v10 }
0x17ad   :  { %v6452_v21 = vadd.f32 %v7498_v49, %v7223_v1 }
0x17af   :  { %v6684_v51 = vadd.f32 %v7533_v9, %v6452_v21 }
0x17c1   :  { %v7601_v43 = vpop.f32.mrf.mxu1 }
0x17c3   :  { %v7602_v32 = vpop.f32.mrf.mxu1 }
0x17c4   :  { %v7603_v3 = vadd.f32 %v7602_v32, %v7601_v43 }
0x17c9   :  { %v7566_v18 = vpop.f32.mrf.mxu0 }
0x17cb   :  { %v7567_v42 = vpop.f32.mrf.mxu0 }
0x17cc   :  { %v7568_v6 = vadd.f32 %v7567_v42, %v7566_v18 }
0x17ce   :  { %v6822_v56 = vadd.f32 %v7568_v6, %v6684_v51 }
0x17d0   :  { %v6930_v25 = vadd.f32 %v7603_v3, %v6822_v56 }
0x17e3   :  { %v7671_v20 = vpop.f32.mrf.mxu1 }
0x17e5   :  { %v7672_v54 = vpop.f32.mrf.mxu1 }
0x17e6   :  { %v7673_v47 = vadd.f32 %v7672_v54, %v7671_v20 }
0x17ea   :  { %v7636_v57 = vpop.f32.mrf.mxu0 }
0x17ec   :  { %v7637_v15 = vpop.f32.mrf.mxu0 }
0x17ed   :  { %v7638_v62 = vadd.f32 %v7637_v15, %v7636_v57 }
0x17ef   :  { %v7098_v37 = vadd.f32 %v7638_v62, %v6930_v25 }
0x17f1   :  { %v7202_v59 = vadd.f32 %v7673_v47, %v7098_v37 }
0x17f3   :  { %7205 = vst [vmem:[%s10389_s7] sm:$0x3] %v7202_v59 }
0x17f4   :  { %7210 = vsyncpa [#allocation3], 1 }
0x17f5   :  { %7211 = vsyncpa [#allocation5], 1 }

</bundles_post_ra>
